<compile_context>
chip_gen: v7x
topology: tpu7x:2x2x1
jax: 0.10.0
libtpu: 0.0.40
codegen_flags: <defaults>
</compile_context>

<pallas_src>
import numpy as np

import jax
import jax.numpy as jnp
from jax.experimental import pallas as pl
from jax.experimental.pallas import tpu as pltpu

# ----------------------------------------------------------------------------
# Feature-extractor config (wav2vec2-base schedule, scaled channels).
# ----------------------------------------------------------------------------
CONV_DIM = 32                                   # real model: 512
CONV_KERNEL = (10, 3, 3, 3, 3, 2, 2)
CONV_STRIDE = (5, 2, 2, 2, 2, 2, 2)
GN_EPS = 1e-5


def _gelu(x):
    # Exact GELU (erf form) == PyTorch nn.GELU() default.  erf runs on the EUP.
    return 0.5 * x * (1.0 + jax.lax.erf(x * np.float32(0.7071067811865476)))


# ----------------------------------------------------------------------------
# Single fused kernel: all 7 conv layers + GroupNorm + GELU, whole batch.
# ----------------------------------------------------------------------------
def _make_fused_kernel(batch, t0, t0_pad, rest_kernels, rest_strides, t_sched):
    """All shape/schedule arguments are static Python ints / tuples."""
    n_rest = len(rest_kernels)

    def kernel(xw_ref, w0_ref, g_ref, b_ref, *rest):
        w_refs = rest[:n_rest]                  # (K, C, C) bf16, layers 1..6
        o_ref = rest[n_rest]                    # (B, t_final, C) f32 output
        buf = rest[n_rest + 1]                  # (B*t0_pad, C) f32 scratch

        w0 = w0_ref[...]                        # (10, C) bf16
        gamma = g_ref[...]                      # (1, C) f32
        beta = b_ref[...]                       # (1, C) f32

        for b in range(batch):                  # static loop, B folded in-call
            base = b * t0_pad                   # 8-aligned per-batch row band

            # ---- layer 0: Conv1d(1->C, k=10, s=5) == ONE (t0,10)@(10,C) dot.
            h = jnp.dot(xw_ref[b], w0,
                        preferred_element_type=jnp.float32)        # (t0, C)

            # GroupNorm(C, C): per-channel stats over time, biased var, f32.
            mean = jnp.mean(h, axis=0, keepdims=True)              # (1, C)
            var = jnp.mean(jnp.square(h - mean), axis=0, keepdims=True)
            h = (h - mean) * jax.lax.rsqrt(var + GN_EPS)
            h = _gelu(h * gamma + beta)                            # (t0, C)
            buf[base:base + t0, :] = h

            # ---- layers 1..6: Conv1d(C->C, k, s=2, no bias) + GELU.
            # Stride applied by strided tap reads -> exactly K dots of shape
            # (t_out, C) @ (C, C), f32 accumulation.  Output is fully computed
            # as a value before the store, so the scratch is reused in place.
            for li in range(n_rest):
                kk = rest_kernels[li]
                ss = rest_strides[li]
                t_out = t_sched[li]
                w_ref = w_refs[li]                                 # (K, C, C)

                acc = jnp.dot(
                    buf[pl.ds(base, t_out, stride=ss), :].astype(jnp.bfloat16),
                    w_ref[0], preferred_element_type=jnp.float32)
                for k in range(1, kk):
                    acc = acc + jnp.dot(
                        buf[pl.ds(base + k, t_out, stride=ss), :]
                        .astype(jnp.bfloat16),
                        w_ref[k], preferred_element_type=jnp.float32)

                h = _gelu(acc)                                     # (t_out, C)
                if li + 1 < n_rest:
                    buf[base:base + t_out, :] = h                  # in place
                else:
                    o_ref[b, :, :] = h.astype(o_ref.dtype)

    return kernel


# ----------------------------------------------------------------------------
# Parameters (deterministic, in-script).  Conv weights are stored in the
# layout and dtype the kernel consumes (bf16 MXU operands, no per-forward
# transposes): layer 0 as (K0, C); layers 1..6 as (K, C_in, C_out).
# ----------------------------------------------------------------------------
def init_params(key):
    ws = []
    c_in = 1
    for k in CONV_KERNEL:
        key, sub = jax.random.split(key)
        fan_in = c_in * k
        w = jax.random.normal(sub, (CONV_DIM, c_in, k), dtype=jnp.float32)
        ws.append(w * jnp.sqrt(2.0 / fan_in).astype(jnp.float32))
        c_in = CONV_DIM

    w0 = jnp.transpose(ws[0][:, 0, :]).astype(jnp.bfloat16)        # (10, C)
    w_rest = [jnp.transpose(w, (2, 1, 0)).astype(jnp.bfloat16)     # (K, Ci, Co)
              for w in ws[1:]]
    return {
        "w0": w0,
        "w_rest": w_rest,
        "gn_gamma": jnp.ones((1, CONV_DIM), jnp.float32),
        "gn_beta": jnp.zeros((1, CONV_DIM), jnp.float32),
    }


# ----------------------------------------------------------------------------
# ClientNet.forward equivalent.
# ----------------------------------------------------------------------------
@jax.jit
def client_net_forward(input_values, params):
    """input_values: (B, num_samples) float32 waveform -> (B, T_final * C)."""
    B, n = input_values.shape
    k0, s0 = CONV_KERNEL[0], CONV_STRIDE[0]
    assert k0 == 2 * s0  # wav2vec2 layer-0 schedule (10, 5)

    n_frames = n // s0
    t0 = n_frames - 1                               # T after layer 0
    x_r = input_values[:, :n_frames * s0].astype(jnp.float32)
    x_r = x_r.reshape(B, n_frames, s0)
    # Layer-0 im2col (tiny: B*t0*10 values) built once here: output step t
    # sees samples [5t, 5t+10) == frames t and t+1 concatenated.  Cast to
    # bf16 — it is only ever an MXU operand.
    xw = jnp.concatenate([x_r[:, :t0, :], x_r[:, 1:t0 + 1, :]], axis=-1)
    xw = xw.astype(jnp.bfloat16)                    # (B, t0, 10)

    # Static time schedule for layers 1..6.
    rest_k = CONV_KERNEL[1:]
    rest_s = CONV_STRIDE[1:]
    t_sched = []
    t_cur = t0
    for k, s in zip(rest_k, rest_s):
        t_cur = (t_cur - k) // s + 1
        t_sched.append(t_cur)
    t_final = t_sched[-1]
    t0_pad = ((t0 + 7) // 8) * 8                    # sublane-aligned band

    in_arrays = [xw, params["w0"], params["gn_gamma"], params["gn_beta"],
                 *params["w_rest"]]

    # Advisory cost estimate for the XLA scheduler.
    flops = 2 * B * t0 * k0 * CONV_DIM
    for k, t in zip(rest_k, t_sched):
        flops += 2 * B * t * k * CONV_DIM * CONV_DIM
    transcendentals = B * (t0 + sum(t_sched)) * CONV_DIM
    bytes_accessed = int(
        sum(int(np.prod(a.shape)) * a.dtype.itemsize for a in in_arrays)
        + B * t_final * CONV_DIM * 4)

    out = pl.pallas_call(
        _make_fused_kernel(B, t0, t0_pad, rest_k, rest_s, tuple(t_sched)),
        out_shape=jax.ShapeDtypeStruct((B, t_final, CONV_DIM), jnp.float32),
        scratch_shapes=[
            pltpu.VMEM((B * t0_pad, CONV_DIM), jnp.float32),
        ],
        compiler_params=pltpu.CompilerParams(
            vmem_limit_bytes=32 * 1024 * 1024),
        cost_estimate=pl.CostEstimate(flops=int(flops),
                                      transcendentals=int(transcendentals),
                                      bytes_accessed=bytes_accessed),
    )(*in_arrays)

    # Channels-last (B, T, C) -> flatten == PyTorch transpose(1,2)+flatten(1).
    return out.reshape(B, t_final * CONV_DIM)


if __name__ == "__main__":
    key = jax.random.PRNGKey(0)
    k_x, k_p = jax.random.split(key)

    B, NUM_SAMPLES = 2, 800
    input_values = jax.random.normal(k_x, (B, NUM_SAMPLES), dtype=jnp.float32)
    params = init_params(k_p)

    out = client_net_forward(input_values, params)
    out = jax.block_until_ready(out)

    # Lengths: 800 -> 159 -> 79 -> 39 -> 19 -> 9 -> 4 -> 2; output (2, 2*32).
    assert out.shape == (B, 2 * CONV_DIM), out.shape
    assert out.dtype == jnp.float32
    assert bool(jnp.isfinite(out).all())
    print("KERNEL_OK")
</pallas_src>

<mosaic_0001>
module attributes {stable_mosaic.version = 11 : i64} {
  func.func @kernel(%arg0: memref<2x159x10xbf16, #tpu.memory_space<vmem>>, %arg1: memref<10x32xbf16, #tpu.memory_space<vmem>>, %arg2: memref<1x32xf32, #tpu.memory_space<vmem>>, %arg3: memref<1x32xf32, #tpu.memory_space<vmem>>, %arg4: memref<3x32x32xbf16, #tpu.memory_space<vmem>>, %arg5: memref<3x32x32xbf16, #tpu.memory_space<vmem>>, %arg6: memref<3x32x32xbf16, #tpu.memory_space<vmem>>, %arg7: memref<3x32x32xbf16, #tpu.memory_space<vmem>>, %arg8: memref<2x32x32xbf16, #tpu.memory_space<vmem>>, %arg9: memref<2x32x32xbf16, #tpu.memory_space<vmem>>, %arg10: memref<2x2x32xf32, #tpu.memory_space<vmem>>, %arg11: memref<320x32xf32, #tpu.memory_space<vmem>>) attributes {dimension_semantics = [], scalar_prefetch = 0 : i64, scratch_operands = 1 : i64, tpu.core_type = #tpu.core_type<tc>} {
    %c0 = arith.constant 0 : index
    %c0_0 = arith.constant 0 : index
    %0 = vector.load %arg1[%c0, %c0_0] : memref<10x32xbf16, #tpu.memory_space<vmem>>, vector<10x32xbf16>
    %c0_1 = arith.constant 0 : index
    %c0_2 = arith.constant 0 : index
    %1 = vector.load %arg2[%c0_1, %c0_2] : memref<1x32xf32, #tpu.memory_space<vmem>>, vector<1x32xf32>
    %c0_3 = arith.constant 0 : index
    %c0_4 = arith.constant 0 : index
    %2 = vector.load %arg3[%c0_3, %c0_4] : memref<1x32xf32, #tpu.memory_space<vmem>>, vector<1x32xf32>
    %c0_5 = arith.constant 0 : index
    %c0_6 = arith.constant 0 : index
    %c0_7 = arith.constant 0 : index
    %3 = vector.load %arg0[%c0_5, %c0_6, %c0_7] : memref<2x159x10xbf16, #tpu.memory_space<vmem>>, vector<1x159x10xbf16>
    %4 = vector.shape_cast %3 : vector<1x159x10xbf16> to vector<159x10xbf16>
    %cst = arith.constant dense<0.000000e+00> : vector<159x32xf32>
    %5 = tpu.matmul %4, %0, %cst {dimension_numbers = #tpu.dot_dimension_numbers<[1], [0], [0], [1], [0, 0, 1, 1], [], []>} : vector<159x10xbf16>, vector<10x32xbf16>, vector<159x32xf32> -> vector<159x32xf32>
    %cst_8 = arith.constant dense<0.000000e+00> : vector<32xf32>
    %6 = vector.multi_reduction <add>, %5, %cst_8 [0] : vector<159x32xf32> to vector<32xf32>
    %7 = vector.shape_cast %6 : vector<32xf32> to vector<1x32xf32>
    %cst_9 = arith.constant 1.590000e+02 : f32
    %8 = vector.broadcast %cst_9 : f32 to vector<1x32xf32>
    %9 = arith.divf %7, %8 : vector<1x32xf32>
    %10 = vector.broadcast %9 : vector<1x32xf32> to vector<159x32xf32>
    %11 = arith.subf %5, %10 : vector<159x32xf32>
    %12 = arith.mulf %11, %11 : vector<159x32xf32>
    %cst_10 = arith.constant dense<0.000000e+00> : vector<32xf32>
    %13 = vector.multi_reduction <add>, %12, %cst_10 [0] : vector<159x32xf32> to vector<32xf32>
    %14 = vector.shape_cast %13 : vector<32xf32> to vector<1x32xf32>
    %cst_11 = arith.constant 1.590000e+02 : f32
    %15 = vector.broadcast %cst_11 : f32 to vector<1x32xf32>
    %16 = arith.divf %14, %15 : vector<1x32xf32>
    %17 = vector.broadcast %9 : vector<1x32xf32> to vector<159x32xf32>
    %18 = arith.subf %5, %17 : vector<159x32xf32>
    %cst_12 = arith.constant 9.99999974E-6 : f32
    %19 = vector.broadcast %cst_12 : f32 to vector<1x32xf32>
    %20 = arith.addf %16, %19 : vector<1x32xf32>
    %21 = math.rsqrt %20 : vector<1x32xf32>
    %22 = vector.broadcast %21 : vector<1x32xf32> to vector<159x32xf32>
    %23 = arith.mulf %18, %22 : vector<159x32xf32>
    %24 = vector.broadcast %1 : vector<1x32xf32> to vector<159x32xf32>
    %25 = arith.mulf %23, %24 : vector<159x32xf32>
    %26 = vector.broadcast %2 : vector<1x32xf32> to vector<159x32xf32>
    %27 = arith.addf %25, %26 : vector<159x32xf32>
    %cst_13 = arith.constant 5.000000e-01 : f32
    %28 = vector.broadcast %cst_13 : f32 to vector<159x32xf32>
    %29 = arith.mulf %28, %27 : vector<159x32xf32>
    %cst_14 = arith.constant 0.707106769 : f32
    %30 = vector.broadcast %cst_14 : f32 to vector<159x32xf32>
    %31 = arith.mulf %27, %30 : vector<159x32xf32>
    %32 = math.erf %31 : vector<159x32xf32>
    %cst_15 = arith.constant 1.000000e+00 : f32
    %33 = vector.broadcast %cst_15 : f32 to vector<159x32xf32>
    %34 = arith.addf %33, %32 : vector<159x32xf32>
    %35 = arith.mulf %29, %34 : vector<159x32xf32>
    %c0_16 = arith.constant 0 : index
    %c0_17 = arith.constant 0 : index
    %36 = vector.load %arg11[%c0_16, %c0_17] : memref<320x32xf32, #tpu.memory_space<vmem>>, vector<159x32xf32>
    tpu.vector_store %arg11[%c0_16, %c0_17], %35 {strides = array<i32>} : memref<320x32xf32, #tpu.memory_space<vmem>>, vector<159x32xf32>,
    %c0_18 = arith.constant 0 : index
    %c0_19 = arith.constant 0 : index
    %37 = tpu.strided_load %arg11[%c0_18, %c0_19] {strides = array<i32: 2, 1>} : memref<320x32xf32, #tpu.memory_space<vmem>>, vector<79x32xf32>
    %38 = arith.truncf %37 : vector<79x32xf32> to vector<79x32xbf16>
    %c0_20 = arith.constant 0 : index
    %c0_21 = arith.constant 0 : index
    %c0_22 = arith.constant 0 : index
    %39 = vector.load %arg4[%c0_20, %c0_21, %c0_22] : memref<3x32x32xbf16, #tpu.memory_space<vmem>>, vector<1x32x32xbf16>
    %40 = vector.shape_cast %39 : vector<1x32x32xbf16> to vector<32x32xbf16>
    %cst_23 = arith.constant dense<0.000000e+00> : vector<79x32xf32>
    %41 = tpu.matmul %38, %40, %cst_23 {dimension_numbers = #tpu.dot_dimension_numbers<[1], [0], [0], [1], [0, 0, 1, 1], [], []>} : vector<79x32xbf16>, vector<32x32xbf16>, vector<79x32xf32> -> vector<79x32xf32>
    %c1 = arith.constant 1 : index
    %c0_24 = arith.constant 0 : index
    %42 = tpu.strided_load %arg11[%c1, %c0_24] {strides = array<i32: 2, 1>} : memref<320x32xf32, #tpu.memory_space<vmem>>, vector<79x32xf32>
    %43 = arith.truncf %42 : vector<79x32xf32> to vector<79x32xbf16>
    %c1_25 = arith.constant 1 : index
    %c0_26 = arith.constant 0 : index
    %c0_27 = arith.constant 0 : index
    %44 = vector.load %arg4[%c1_25, %c0_26, %c0_27] : memref<3x32x32xbf16, #tpu.memory_space<vmem>>, vector<1x32x32xbf16>
    %45 = vector.shape_cast %44 : vector<1x32x32xbf16> to vector<32x32xbf16>
    %cst_28 = arith.constant dense<0.000000e+00> : vector<79x32xf32>
    %46 = tpu.matmul %43, %45, %cst_28 {dimension_numbers = #tpu.dot_dimension_numbers<[1], [0], [0], [1], [0, 0, 1, 1], [], []>} : vector<79x32xbf16>, vector<32x32xbf16>, vector<79x32xf32> -> vector<79x32xf32>
    %47 = arith.addf %41, %46 : vector<79x32xf32>
    %c2 = arith.constant 2 : index
    %c0_29 = arith.constant 0 : index
    %48 = tpu.strided_load %arg11[%c2, %c0_29] {strides = array<i32: 2, 1>} : memref<320x32xf32, #tpu.memory_space<vmem>>, vector<79x32xf32>
    %49 = arith.truncf %48 : vector<79x32xf32> to vector<79x32xbf16>
    %c2_30 = arith.constant 2 : index
    %c0_31 = arith.constant 0 : index
    %c0_32 = arith.constant 0 : index
    %50 = vector.load %arg4[%c2_30, %c0_31, %c0_32] : memref<3x32x32xbf16, #tpu.memory_space<vmem>>, vector<1x32x32xbf16>
    %51 = vector.shape_cast %50 : vector<1x32x32xbf16> to vector<32x32xbf16>
    %cst_33 = arith.constant dense<0.000000e+00> : vector<79x32xf32>
    %52 = tpu.matmul %49, %51, %cst_33 {dimension_numbers = #tpu.dot_dimension_numbers<[1], [0], [0], [1], [0, 0, 1, 1], [], []>} : vector<79x32xbf16>, vector<32x32xbf16>, vector<79x32xf32> -> vector<79x32xf32>
    %53 = arith.addf %47, %52 : vector<79x32xf32>
    %cst_34 = arith.constant 5.000000e-01 : f32
    %54 = vector.broadcast %cst_34 : f32 to vector<79x32xf32>
    %55 = arith.mulf %54, %53 : vector<79x32xf32>
    %cst_35 = arith.constant 0.707106769 : f32
    %56 = vector.broadcast %cst_35 : f32 to vector<79x32xf32>
    %57 = arith.mulf %53, %56 : vector<79x32xf32>
    %58 = math.erf %57 : vector<79x32xf32>
    %cst_36 = arith.constant 1.000000e+00 : f32
    %59 = vector.broadcast %cst_36 : f32 to vector<79x32xf32>
    %60 = arith.addf %59, %58 : vector<79x32xf32>
    %61 = arith.mulf %55, %60 : vector<79x32xf32>
    %c0_37 = arith.constant 0 : index
    %c0_38 = arith.constant 0 : index
    %62 = vector.load %arg11[%c0_37, %c0_38] : memref<320x32xf32, #tpu.memory_space<vmem>>, vector<79x32xf32>
    tpu.vector_store %arg11[%c0_37, %c0_38], %61 {strides = array<i32>} : memref<320x32xf32, #tpu.memory_space<vmem>>, vector<79x32xf32>,
    %c0_39 = arith.constant 0 : index
    %c0_40 = arith.constant 0 : index
    %63 = tpu.strided_load %arg11[%c0_39, %c0_40] {strides = array<i32: 2, 1>} : memref<320x32xf32, #tpu.memory_space<vmem>>, vector<39x32xf32>
    %64 = arith.truncf %63 : vector<39x32xf32> to vector<39x32xbf16>
    %c0_41 = arith.constant 0 : index
    %c0_42 = arith.constant 0 : index
    %c0_43 = arith.constant 0 : index
    %65 = vector.load %arg5[%c0_41, %c0_42, %c0_43] : memref<3x32x32xbf16, #tpu.memory_space<vmem>>, vector<1x32x32xbf16>
    %66 = vector.shape_cast %65 : vector<1x32x32xbf16> to vector<32x32xbf16>
    %cst_44 = arith.constant dense<0.000000e+00> : vector<39x32xf32>
    %67 = tpu.matmul %64, %66, %cst_44 {dimension_numbers = #tpu.dot_dimension_numbers<[1], [0], [0], [1], [0, 0, 1, 1], [], []>} : vector<39x32xbf16>, vector<32x32xbf16>, vector<39x32xf32> -> vector<39x32xf32>
    %c1_45 = arith.constant 1 : index
    %c0_46 = arith.constant 0 : index
    %68 = tpu.strided_load %arg11[%c1_45, %c0_46] {strides = array<i32: 2, 1>} : memref<320x32xf32, #tpu.memory_space<vmem>>, vector<39x32xf32>
    %69 = arith.truncf %68 : vector<39x32xf32> to vector<39x32xbf16>
    %c1_47 = arith.constant 1 : index
    %c0_48 = arith.constant 0 : index
    %c0_49 = arith.constant 0 : index
    %70 = vector.load %arg5[%c1_47, %c0_48, %c0_49] : memref<3x32x32xbf16, #tpu.memory_space<vmem>>, vector<1x32x32xbf16>
    %71 = vector.shape_cast %70 : vector<1x32x32xbf16> to vector<32x32xbf16>
    %cst_50 = arith.constant dense<0.000000e+00> : vector<39x32xf32>
    %72 = tpu.matmul %69, %71, %cst_50 {dimension_numbers = #tpu.dot_dimension_numbers<[1], [0], [0], [1], [0, 0, 1, 1], [], []>} : vector<39x32xbf16>, vector<32x32xbf16>, vector<39x32xf32> -> vector<39x32xf32>
    %73 = arith.addf %67, %72 : vector<39x32xf32>
    %c2_51 = arith.constant 2 : index
    %c0_52 = arith.constant 0 : index
    %74 = tpu.strided_load %arg11[%c2_51, %c0_52] {strides = array<i32: 2, 1>} : memref<320x32xf32, #tpu.memory_space<vmem>>, vector<39x32xf32>
    %75 = arith.truncf %74 : vector<39x32xf32> to vector<39x32xbf16>
    %c2_53 = arith.constant 2 : index
    %c0_54 = arith.constant 0 : index
    %c0_55 = arith.constant 0 : index
    %76 = vector.load %arg5[%c2_53, %c0_54, %c0_55] : memref<3x32x32xbf16, #tpu.memory_space<vmem>>, vector<1x32x32xbf16>
    %77 = vector.shape_cast %76 : vector<1x32x32xbf16> to vector<32x32xbf16>
    %cst_56 = arith.constant dense<0.000000e+00> : vector<39x32xf32>
    %78 = tpu.matmul %75, %77, %cst_56 {dimension_numbers = #tpu.dot_dimension_numbers<[1], [0], [0], [1], [0, 0, 1, 1], [], []>} : vector<39x32xbf16>, vector<32x32xbf16>, vector<39x32xf32> -> vector<39x32xf32>
    %79 = arith.addf %73, %78 : vector<39x32xf32>
    %cst_57 = arith.constant 5.000000e-01 : f32
    %80 = vector.broadcast %cst_57 : f32 to vector<39x32xf32>
    %81 = arith.mulf %80, %79 : vector<39x32xf32>
    %cst_58 = arith.constant 0.707106769 : f32
    %82 = vector.broadcast %cst_58 : f32 to vector<39x32xf32>
    %83 = arith.mulf %79, %82 : vector<39x32xf32>
    %84 = math.erf %83 : vector<39x32xf32>
    %cst_59 = arith.constant 1.000000e+00 : f32
    %85 = vector.broadcast %cst_59 : f32 to vector<39x32xf32>
    %86 = arith.addf %85, %84 : vector<39x32xf32>
    %87 = arith.mulf %81, %86 : vector<39x32xf32>
    %c0_60 = arith.constant 0 : index
    %c0_61 = arith.constant 0 : index
    %88 = vector.load %arg11[%c0_60, %c0_61] : memref<320x32xf32, #tpu.memory_space<vmem>>, vector<39x32xf32>
    tpu.vector_store %arg11[%c0_60, %c0_61], %87 {strides = array<i32>} : memref<320x32xf32, #tpu.memory_space<vmem>>, vector<39x32xf32>,
    %c0_62 = arith.constant 0 : index
    %c0_63 = arith.constant 0 : index
    %89 = tpu.strided_load %arg11[%c0_62, %c0_63] {strides = array<i32: 2, 1>} : memref<320x32xf32, #tpu.memory_space<vmem>>, vector<19x32xf32>
    %90 = arith.truncf %89 : vector<19x32xf32> to vector<19x32xbf16>
    %c0_64 = arith.constant 0 : index
    %c0_65 = arith.constant 0 : index
    %c0_66 = arith.constant 0 : index
    %91 = vector.load %arg6[%c0_64, %c0_65, %c0_66] : memref<3x32x32xbf16, #tpu.memory_space<vmem>>, vector<1x32x32xbf16>
    %92 = vector.shape_cast %91 : vector<1x32x32xbf16> to vector<32x32xbf16>
    %cst_67 = arith.constant dense<0.000000e+00> : vector<19x32xf32>
    %93 = tpu.matmul %90, %92, %cst_67 {dimension_numbers = #tpu.dot_dimension_numbers<[1], [0], [0], [1], [0, 0, 1, 1], [], []>} : vector<19x32xbf16>, vector<32x32xbf16>, vector<19x32xf32> -> vector<19x32xf32>
    %c1_68 = arith.constant 1 : index
    %c0_69 = arith.constant 0 : index
    %94 = tpu.strided_load %arg11[%c1_68, %c0_69] {strides = array<i32: 2, 1>} : memref<320x32xf32, #tpu.memory_space<vmem>>, vector<19x32xf32>
    %95 = arith.truncf %94 : vector<19x32xf32> to vector<19x32xbf16>
    %c1_70 = arith.constant 1 : index
    %c0_71 = arith.constant 0 : index
    %c0_72 = arith.constant 0 : index
    %96 = vector.load %arg6[%c1_70, %c0_71, %c0_72] : memref<3x32x32xbf16, #tpu.memory_space<vmem>>, vector<1x32x32xbf16>
    %97 = vector.shape_cast %96 : vector<1x32x32xbf16> to vector<32x32xbf16>
    %cst_73 = arith.constant dense<0.000000e+00> : vector<19x32xf32>
    %98 = tpu.matmul %95, %97, %cst_73 {dimension_numbers = #tpu.dot_dimension_numbers<[1], [0], [0], [1], [0, 0, 1, 1], [], []>} : vector<19x32xbf16>, vector<32x32xbf16>, vector<19x32xf32> -> vector<19x32xf32>
    %99 = arith.addf %93, %98 : vector<19x32xf32>
    %c2_74 = arith.constant 2 : index
    %c0_75 = arith.constant 0 : index
    %100 = tpu.strided_load %arg11[%c2_74, %c0_75] {strides = array<i32: 2, 1>} : memref<320x32xf32, #tpu.memory_space<vmem>>, vector<19x32xf32>
    %101 = arith.truncf %100 : vector<19x32xf32> to vector<19x32xbf16>
    %c2_76 = arith.constant 2 : index
    %c0_77 = arith.constant 0 : index
    %c0_78 = arith.constant 0 : index
    %102 = vector.load %arg6[%c2_76, %c0_77, %c0_78] : memref<3x32x32xbf16, #tpu.memory_space<vmem>>, vector<1x32x32xbf16>
    %103 = vector.shape_cast %102 : vector<1x32x32xbf16> to vector<32x32xbf16>
    %cst_79 = arith.constant dense<0.000000e+00> : vector<19x32xf32>
    %104 = tpu.matmul %101, %103, %cst_79 {dimension_numbers = #tpu.dot_dimension_numbers<[1], [0], [0], [1], [0, 0, 1, 1], [], []>} : vector<19x32xbf16>, vector<32x32xbf16>, vector<19x32xf32> -> vector<19x32xf32>
    %105 = arith.addf %99, %104 : vector<19x32xf32>
    %cst_80 = arith.constant 5.000000e-01 : f32
    %106 = vector.broadcast %cst_80 : f32 to vector<19x32xf32>
    %107 = arith.mulf %106, %105 : vector<19x32xf32>
    %cst_81 = arith.constant 0.707106769 : f32
    %108 = vector.broadcast %cst_81 : f32 to vector<19x32xf32>
    %109 = arith.mulf %105, %108 : vector<19x32xf32>
    %110 = math.erf %109 : vector<19x32xf32>
    %cst_82 = arith.constant 1.000000e+00 : f32
    %111 = vector.broadcast %cst_82 : f32 to vector<19x32xf32>
    %112 = arith.addf %111, %110 : vector<19x32xf32>
    %113 = arith.mulf %107, %112 : vector<19x32xf32>
    %c0_83 = arith.constant 0 : index
    %c0_84 = arith.constant 0 : index
    %114 = vector.load %arg11[%c0_83, %c0_84] : memref<320x32xf32, #tpu.memory_space<vmem>>, vector<19x32xf32>
    tpu.vector_store %arg11[%c0_83, %c0_84], %113 {strides = array<i32>} : memref<320x32xf32, #tpu.memory_space<vmem>>, vector<19x32xf32>,
    %c0_85 = arith.constant 0 : index
    %c0_86 = arith.constant 0 : index
    %115 = tpu.strided_load %arg11[%c0_85, %c0_86] {strides = array<i32: 2, 1>} : memref<320x32xf32, #tpu.memory_space<vmem>>, vector<9x32xf32>
    %116 = arith.truncf %115 : vector<9x32xf32> to vector<9x32xbf16>
    %c0_87 = arith.constant 0 : index
    %c0_88 = arith.constant 0 : index
    %c0_89 = arith.constant 0 : index
    %117 = vector.load %arg7[%c0_87, %c0_88, %c0_89] : memref<3x32x32xbf16, #tpu.memory_space<vmem>>, vector<1x32x32xbf16>
    %118 = vector.shape_cast %117 : vector<1x32x32xbf16> to vector<32x32xbf16>
    %cst_90 = arith.constant dense<0.000000e+00> : vector<9x32xf32>
    %119 = tpu.matmul %116, %118, %cst_90 {dimension_numbers = #tpu.dot_dimension_numbers<[1], [0], [0], [1], [0, 0, 1, 1], [], []>} : vector<9x32xbf16>, vector<32x32xbf16>, vector<9x32xf32> -> vector<9x32xf32>
    %c1_91 = arith.constant 1 : index
    %c0_92 = arith.constant 0 : index
    %120 = tpu.strided_load %arg11[%c1_91, %c0_92] {strides = array<i32: 2, 1>} : memref<320x32xf32, #tpu.memory_space<vmem>>, vector<9x32xf32>
    %121 = arith.truncf %120 : vector<9x32xf32> to vector<9x32xbf16>
    %c1_93 = arith.constant 1 : index
    %c0_94 = arith.constant 0 : index
    %c0_95 = arith.constant 0 : index
    %122 = vector.load %arg7[%c1_93, %c0_94, %c0_95] : memref<3x32x32xbf16, #tpu.memory_space<vmem>>, vector<1x32x32xbf16>
    %123 = vector.shape_cast %122 : vector<1x32x32xbf16> to vector<32x32xbf16>
    %cst_96 = arith.constant dense<0.000000e+00> : vector<9x32xf32>
    %124 = tpu.matmul %121, %123, %cst_96 {dimension_numbers = #tpu.dot_dimension_numbers<[1], [0], [0], [1], [0, 0, 1, 1], [], []>} : vector<9x32xbf16>, vector<32x32xbf16>, vector<9x32xf32> -> vector<9x32xf32>
    %125 = arith.addf %119, %124 : vector<9x32xf32>
    %c2_97 = arith.constant 2 : index
    %c0_98 = arith.constant 0 : index
    %126 = tpu.strided_load %arg11[%c2_97, %c0_98] {strides = array<i32: 2, 1>} : memref<320x32xf32, #tpu.memory_space<vmem>>, vector<9x32xf32>
    %127 = arith.truncf %126 : vector<9x32xf32> to vector<9x32xbf16>
    %c2_99 = arith.constant 2 : index
    %c0_100 = arith.constant 0 : index
    %c0_101 = arith.constant 0 : index
    %128 = vector.load %arg7[%c2_99, %c0_100, %c0_101] : memref<3x32x32xbf16, #tpu.memory_space<vmem>>, vector<1x32x32xbf16>
    %129 = vector.shape_cast %128 : vector<1x32x32xbf16> to vector<32x32xbf16>
    %cst_102 = arith.constant dense<0.000000e+00> : vector<9x32xf32>
    %130 = tpu.matmul %127, %129, %cst_102 {dimension_numbers = #tpu.dot_dimension_numbers<[1], [0], [0], [1], [0, 0, 1, 1], [], []>} : vector<9x32xbf16>, vector<32x32xbf16>, vector<9x32xf32> -> vector<9x32xf32>
    %131 = arith.addf %125, %130 : vector<9x32xf32>
    %cst_103 = arith.constant 5.000000e-01 : f32
    %132 = vector.broadcast %cst_103 : f32 to vector<9x32xf32>
    %133 = arith.mulf %132, %131 : vector<9x32xf32>
    %cst_104 = arith.constant 0.707106769 : f32
    %134 = vector.broadcast %cst_104 : f32 to vector<9x32xf32>
    %135 = arith.mulf %131, %134 : vector<9x32xf32>
    %136 = math.erf %135 : vector<9x32xf32>
    %cst_105 = arith.constant 1.000000e+00 : f32
    %137 = vector.broadcast %cst_105 : f32 to vector<9x32xf32>
    %138 = arith.addf %137, %136 : vector<9x32xf32>
    %139 = arith.mulf %133, %138 : vector<9x32xf32>
    %c0_106 = arith.constant 0 : index
    %c0_107 = arith.constant 0 : index
    %140 = vector.load %arg11[%c0_106, %c0_107] : memref<320x32xf32, #tpu.memory_space<vmem>>, vector<9x32xf32>
    tpu.vector_store %arg11[%c0_106, %c0_107], %139 {strides = array<i32>} : memref<320x32xf32, #tpu.memory_space<vmem>>, vector<9x32xf32>,
    %c0_108 = arith.constant 0 : index
    %c0_109 = arith.constant 0 : index
    %141 = tpu.strided_load %arg11[%c0_108, %c0_109] {strides = array<i32: 2, 1>} : memref<320x32xf32, #tpu.memory_space<vmem>>, vector<4x32xf32>
    %142 = arith.truncf %141 : vector<4x32xf32> to vector<4x32xbf16>
    %c0_110 = arith.constant 0 : index
    %c0_111 = arith.constant 0 : index
    %c0_112 = arith.constant 0 : index
    %143 = vector.load %arg8[%c0_110, %c0_111, %c0_112] : memref<2x32x32xbf16, #tpu.memory_space<vmem>>, vector<1x32x32xbf16>
    %144 = vector.shape_cast %143 : vector<1x32x32xbf16> to vector<32x32xbf16>
    %cst_113 = arith.constant dense<0.000000e+00> : vector<4x32xf32>
    %145 = tpu.matmul %142, %144, %cst_113 {dimension_numbers = #tpu.dot_dimension_numbers<[1], [0], [0], [1], [0, 0, 1, 1], [], []>} : vector<4x32xbf16>, vector<32x32xbf16>, vector<4x32xf32> -> vector<4x32xf32>
    %c1_114 = arith.constant 1 : index
    %c0_115 = arith.constant 0 : index
    %146 = tpu.strided_load %arg11[%c1_114, %c0_115] {strides = array<i32: 2, 1>} : memref<320x32xf32, #tpu.memory_space<vmem>>, vector<4x32xf32>
    %147 = arith.truncf %146 : vector<4x32xf32> to vector<4x32xbf16>
    %c1_116 = arith.constant 1 : index
    %c0_117 = arith.constant 0 : index
    %c0_118 = arith.constant 0 : index
    %148 = vector.load %arg8[%c1_116, %c0_117, %c0_118] : memref<2x32x32xbf16, #tpu.memory_space<vmem>>, vector<1x32x32xbf16>
    %149 = vector.shape_cast %148 : vector<1x32x32xbf16> to vector<32x32xbf16>
    %cst_119 = arith.constant dense<0.000000e+00> : vector<4x32xf32>
    %150 = tpu.matmul %147, %149, %cst_119 {dimension_numbers = #tpu.dot_dimension_numbers<[1], [0], [0], [1], [0, 0, 1, 1], [], []>} : vector<4x32xbf16>, vector<32x32xbf16>, vector<4x32xf32> -> vector<4x32xf32>
    %151 = arith.addf %145, %150 : vector<4x32xf32>
    %cst_120 = arith.constant 5.000000e-01 : f32
    %152 = vector.broadcast %cst_120 : f32 to vector<4x32xf32>
    %153 = arith.mulf %152, %151 : vector<4x32xf32>
    %cst_121 = arith.constant 0.707106769 : f32
    %154 = vector.broadcast %cst_121 : f32 to vector<4x32xf32>
    %155 = arith.mulf %151, %154 : vector<4x32xf32>
    %156 = math.erf %155 : vector<4x32xf32>
    %cst_122 = arith.constant 1.000000e+00 : f32
    %157 = vector.broadcast %cst_122 : f32 to vector<4x32xf32>
    %158 = arith.addf %157, %156 : vector<4x32xf32>
    %159 = arith.mulf %153, %158 : vector<4x32xf32>
    %c0_123 = arith.constant 0 : index
    %c0_124 = arith.constant 0 : index
    %160 = vector.load %arg11[%c0_123, %c0_124] : memref<320x32xf32, #tpu.memory_space<vmem>>, vector<4x32xf32>
    tpu.vector_store %arg11[%c0_123, %c0_124], %159 {strides = array<i32>} : memref<320x32xf32, #tpu.memory_space<vmem>>, vector<4x32xf32>,
    %c0_125 = arith.constant 0 : index
    %c0_126 = arith.constant 0 : index
    %161 = tpu.strided_load %arg11[%c0_125, %c0_126] {strides = array<i32: 2, 1>} : memref<320x32xf32, #tpu.memory_space<vmem>>, vector<2x32xf32>
    %162 = arith.truncf %161 : vector<2x32xf32> to vector<2x32xbf16>
    %c0_127 = arith.constant 0 : index
    %c0_128 = arith.constant 0 : index
    %c0_129 = arith.constant 0 : index
    %163 = vector.load %arg9[%c0_127, %c0_128, %c0_129] : memref<2x32x32xbf16, #tpu.memory_space<vmem>>, vector<1x32x32xbf16>
    %164 = vector.shape_cast %163 : vector<1x32x32xbf16> to vector<32x32xbf16>
    %cst_130 = arith.constant dense<0.000000e+00> : vector<2x32xf32>
    %165 = tpu.matmul %162, %164, %cst_130 {dimension_numbers = #tpu.dot_dimension_numbers<[1], [0], [0], [1], [0, 0, 1, 1], [], []>} : vector<2x32xbf16>, vector<32x32xbf16>, vector<2x32xf32> -> vector<2x32xf32>
    %c1_131 = arith.constant 1 : index
    %c0_132 = arith.constant 0 : index
    %166 = tpu.strided_load %arg11[%c1_131, %c0_132] {strides = array<i32: 2, 1>} : memref<320x32xf32, #tpu.memory_space<vmem>>, vector<2x32xf32>
    %167 = arith.truncf %166 : vector<2x32xf32> to vector<2x32xbf16>
    %c1_133 = arith.constant 1 : index
    %c0_134 = arith.constant 0 : index
    %c0_135 = arith.constant 0 : index
    %168 = vector.load %arg9[%c1_133, %c0_134, %c0_135] : memref<2x32x32xbf16, #tpu.memory_space<vmem>>, vector<1x32x32xbf16>
    %169 = vector.shape_cast %168 : vector<1x32x32xbf16> to vector<32x32xbf16>
    %cst_136 = arith.constant dense<0.000000e+00> : vector<2x32xf32>
    %170 = tpu.matmul %167, %169, %cst_136 {dimension_numbers = #tpu.dot_dimension_numbers<[1], [0], [0], [1], [0, 0, 1, 1], [], []>} : vector<2x32xbf16>, vector<32x32xbf16>, vector<2x32xf32> -> vector<2x32xf32>
    %171 = arith.addf %165, %170 : vector<2x32xf32>
    %cst_137 = arith.constant 5.000000e-01 : f32
    %172 = vector.broadcast %cst_137 : f32 to vector<2x32xf32>
    %173 = arith.mulf %172, %171 : vector<2x32xf32>
    %cst_138 = arith.constant 0.707106769 : f32
    %174 = vector.broadcast %cst_138 : f32 to vector<2x32xf32>
    %175 = arith.mulf %171, %174 : vector<2x32xf32>
    %176 = math.erf %175 : vector<2x32xf32>
    %cst_139 = arith.constant 1.000000e+00 : f32
    %177 = vector.broadcast %cst_139 : f32 to vector<2x32xf32>
    %178 = arith.addf %177, %176 : vector<2x32xf32>
    %179 = arith.mulf %173, %178 : vector<2x32xf32>
    %c0_140 = arith.constant 0 : index
    %c0_141 = arith.constant 0 : index
    %c0_142 = arith.constant 0 : index
    %180 = vector.load %arg10[%c0_140, %c0_141, %c0_142] : memref<2x2x32xf32, #tpu.memory_space<vmem>>, vector<1x2x32xf32>
    %181 = vector.shape_cast %180 : vector<1x2x32xf32> to vector<2x32xf32>
    %182 = vector.shape_cast %179 : vector<2x32xf32> to vector<1x2x32xf32>
    tpu.vector_store %arg10[%c0_140, %c0_141, %c0_142], %182 {strides = array<i32>} : memref<2x2x32xf32, #tpu.memory_space<vmem>>, vector<1x2x32xf32>,
    %c1_143 = arith.constant 1 : index
    %c0_144 = arith.constant 0 : index
    %c0_145 = arith.constant 0 : index
    %183 = vector.load %arg0[%c1_143, %c0_144, %c0_145] : memref<2x159x10xbf16, #tpu.memory_space<vmem>>, vector<1x159x10xbf16>
    %184 = vector.shape_cast %183 : vector<1x159x10xbf16> to vector<159x10xbf16>
    %cst_146 = arith.constant dense<0.000000e+00> : vector<159x32xf32>
    %185 = tpu.matmul %184, %0, %cst_146 {dimension_numbers = #tpu.dot_dimension_numbers<[1], [0], [0], [1], [0, 0, 1, 1], [], []>} : vector<159x10xbf16>, vector<10x32xbf16>, vector<159x32xf32> -> vector<159x32xf32>
    %cst_147 = arith.constant dense<0.000000e+00> : vector<32xf32>
    %186 = vector.multi_reduction <add>, %185, %cst_147 [0] : vector<159x32xf32> to vector<32xf32>
    %187 = vector.shape_cast %186 : vector<32xf32> to vector<1x32xf32>
    %cst_148 = arith.constant 1.590000e+02 : f32
    %188 = vector.broadcast %cst_148 : f32 to vector<1x32xf32>
    %189 = arith.divf %187, %188 : vector<1x32xf32>
    %190 = vector.broadcast %189 : vector<1x32xf32> to vector<159x32xf32>
    %191 = arith.subf %185, %190 : vector<159x32xf32>
    %192 = arith.mulf %191, %191 : vector<159x32xf32>
    %cst_149 = arith.constant dense<0.000000e+00> : vector<32xf32>
    %193 = vector.multi_reduction <add>, %192, %cst_149 [0] : vector<159x32xf32> to vector<32xf32>
    %194 = vector.shape_cast %193 : vector<32xf32> to vector<1x32xf32>
    %cst_150 = arith.constant 1.590000e+02 : f32
    %195 = vector.broadcast %cst_150 : f32 to vector<1x32xf32>
    %196 = arith.divf %194, %195 : vector<1x32xf32>
    %197 = vector.broadcast %189 : vector<1x32xf32> to vector<159x32xf32>
    %198 = arith.subf %185, %197 : vector<159x32xf32>
    %cst_151 = arith.constant 9.99999974E-6 : f32
    %199 = vector.broadcast %cst_151 : f32 to vector<1x32xf32>
    %200 = arith.addf %196, %199 : vector<1x32xf32>
    %201 = math.rsqrt %200 : vector<1x32xf32>
    %202 = vector.broadcast %201 : vector<1x32xf32> to vector<159x32xf32>
    %203 = arith.mulf %198, %202 : vector<159x32xf32>
    %204 = vector.broadcast %1 : vector<1x32xf32> to vector<159x32xf32>
    %205 = arith.mulf %203, %204 : vector<159x32xf32>
    %206 = vector.broadcast %2 : vector<1x32xf32> to vector<159x32xf32>
    %207 = arith.addf %205, %206 : vector<159x32xf32>
    %cst_152 = arith.constant 5.000000e-01 : f32
    %208 = vector.broadcast %cst_152 : f32 to vector<159x32xf32>
    %209 = arith.mulf %208, %207 : vector<159x32xf32>
    %cst_153 = arith.constant 0.707106769 : f32
    %210 = vector.broadcast %cst_153 : f32 to vector<159x32xf32>
    %211 = arith.mulf %207, %210 : vector<159x32xf32>
    %212 = math.erf %211 : vector<159x32xf32>
    %cst_154 = arith.constant 1.000000e+00 : f32
    %213 = vector.broadcast %cst_154 : f32 to vector<159x32xf32>
    %214 = arith.addf %213, %212 : vector<159x32xf32>
    %215 = arith.mulf %209, %214 : vector<159x32xf32>
    %c160 = arith.constant 160 : index
    %c0_155 = arith.constant 0 : index
    %216 = vector.load %arg11[%c160, %c0_155] : memref<320x32xf32, #tpu.memory_space<vmem>>, vector<159x32xf32>
    tpu.vector_store %arg11[%c160, %c0_155], %215 {strides = array<i32>} : memref<320x32xf32, #tpu.memory_space<vmem>>, vector<159x32xf32>,
    %c160_156 = arith.constant 160 : index
    %c0_157 = arith.constant 0 : index
    %217 = tpu.strided_load %arg11[%c160_156, %c0_157] {strides = array<i32: 2, 1>} : memref<320x32xf32, #tpu.memory_space<vmem>>, vector<79x32xf32>
    %218 = arith.truncf %217 : vector<79x32xf32> to vector<79x32xbf16>
    %c0_158 = arith.constant 0 : index
    %c0_159 = arith.constant 0 : index
    %c0_160 = arith.constant 0 : index
    %219 = vector.load %arg4[%c0_158, %c0_159, %c0_160] : memref<3x32x32xbf16, #tpu.memory_space<vmem>>, vector<1x32x32xbf16>
    %220 = vector.shape_cast %219 : vector<1x32x32xbf16> to vector<32x32xbf16>
    %cst_161 = arith.constant dense<0.000000e+00> : vector<79x32xf32>
    %221 = tpu.matmul %218, %220, %cst_161 {dimension_numbers = #tpu.dot_dimension_numbers<[1], [0], [0], [1], [0, 0, 1, 1], [], []>} : vector<79x32xbf16>, vector<32x32xbf16>, vector<79x32xf32> -> vector<79x32xf32>
    %c161 = arith.constant 161 : index
    %c0_162 = arith.constant 0 : index
    %222 = tpu.strided_load %arg11[%c161, %c0_162] {strides = array<i32: 2, 1>} : memref<320x32xf32, #tpu.memory_space<vmem>>, vector<79x32xf32>
    %223 = arith.truncf %222 : vector<79x32xf32> to vector<79x32xbf16>
    %c1_163 = arith.constant 1 : index
    %c0_164 = arith.constant 0 : index
    %c0_165 = arith.constant 0 : index
    %224 = vector.load %arg4[%c1_163, %c0_164, %c0_165] : memref<3x32x32xbf16, #tpu.memory_space<vmem>>, vector<1x32x32xbf16>
    %225 = vector.shape_cast %224 : vector<1x32x32xbf16> to vector<32x32xbf16>
    %cst_166 = arith.constant dense<0.000000e+00> : vector<79x32xf32>
    %226 = tpu.matmul %223, %225, %cst_166 {dimension_numbers = #tpu.dot_dimension_numbers<[1], [0], [0], [1], [0, 0, 1, 1], [], []>} : vector<79x32xbf16>, vector<32x32xbf16>, vector<79x32xf32> -> vector<79x32xf32>
    %227 = arith.addf %221, %226 : vector<79x32xf32>
    %c162 = arith.constant 162 : index
    %c0_167 = arith.constant 0 : index
    %228 = tpu.strided_load %arg11[%c162, %c0_167] {strides = array<i32: 2, 1>} : memref<320x32xf32, #tpu.memory_space<vmem>>, vector<79x32xf32>
    %229 = arith.truncf %228 : vector<79x32xf32> to vector<79x32xbf16>
    %c2_168 = arith.constant 2 : index
    %c0_169 = arith.constant 0 : index
    %c0_170 = arith.constant 0 : index
    %230 = vector.load %arg4[%c2_168, %c0_169, %c0_170] : memref<3x32x32xbf16, #tpu.memory_space<vmem>>, vector<1x32x32xbf16>
    %231 = vector.shape_cast %230 : vector<1x32x32xbf16> to vector<32x32xbf16>
    %cst_171 = arith.constant dense<0.000000e+00> : vector<79x32xf32>
    %232 = tpu.matmul %229, %231, %cst_171 {dimension_numbers = #tpu.dot_dimension_numbers<[1], [0], [0], [1], [0, 0, 1, 1], [], []>} : vector<79x32xbf16>, vector<32x32xbf16>, vector<79x32xf32> -> vector<79x32xf32>
    %233 = arith.addf %227, %232 : vector<79x32xf32>
    %cst_172 = arith.constant 5.000000e-01 : f32
    %234 = vector.broadcast %cst_172 : f32 to vector<79x32xf32>
    %235 = arith.mulf %234, %233 : vector<79x32xf32>
    %cst_173 = arith.constant 0.707106769 : f32
    %236 = vector.broadcast %cst_173 : f32 to vector<79x32xf32>
    %237 = arith.mulf %233, %236 : vector<79x32xf32>
    %238 = math.erf %237 : vector<79x32xf32>
    %cst_174 = arith.constant 1.000000e+00 : f32
    %239 = vector.broadcast %cst_174 : f32 to vector<79x32xf32>
    %240 = arith.addf %239, %238 : vector<79x32xf32>
    %241 = arith.mulf %235, %240 : vector<79x32xf32>
    %c160_175 = arith.constant 160 : index
    %c0_176 = arith.constant 0 : index
    %242 = vector.load %arg11[%c160_175, %c0_176] : memref<320x32xf32, #tpu.memory_space<vmem>>, vector<79x32xf32>
    tpu.vector_store %arg11[%c160_175, %c0_176], %241 {strides = array<i32>} : memref<320x32xf32, #tpu.memory_space<vmem>>, vector<79x32xf32>,
    %c160_177 = arith.constant 160 : index
    %c0_178 = arith.constant 0 : index
    %243 = tpu.strided_load %arg11[%c160_177, %c0_178] {strides = array<i32: 2, 1>} : memref<320x32xf32, #tpu.memory_space<vmem>>, vector<39x32xf32>
    %244 = arith.truncf %243 : vector<39x32xf32> to vector<39x32xbf16>
    %c0_179 = arith.constant 0 : index
    %c0_180 = arith.constant 0 : index
    %c0_181 = arith.constant 0 : index
    %245 = vector.load %arg5[%c0_179, %c0_180, %c0_181] : memref<3x32x32xbf16, #tpu.memory_space<vmem>>, vector<1x32x32xbf16>
    %246 = vector.shape_cast %245 : vector<1x32x32xbf16> to vector<32x32xbf16>
    %cst_182 = arith.constant dense<0.000000e+00> : vector<39x32xf32>
    %247 = tpu.matmul %244, %246, %cst_182 {dimension_numbers = #tpu.dot_dimension_numbers<[1], [0], [0], [1], [0, 0, 1, 1], [], []>} : vector<39x32xbf16>, vector<32x32xbf16>, vector<39x32xf32> -> vector<39x32xf32>
    %c161_183 = arith.constant 161 : index
    %c0_184 = arith.constant 0 : index
    %248 = tpu.strided_load %arg11[%c161_183, %c0_184] {strides = array<i32: 2, 1>} : memref<320x32xf32, #tpu.memory_space<vmem>>, vector<39x32xf32>
    %249 = arith.truncf %248 : vector<39x32xf32> to vector<39x32xbf16>
    %c1_185 = arith.constant 1 : index
    %c0_186 = arith.constant 0 : index
    %c0_187 = arith.constant 0 : index
    %250 = vector.load %arg5[%c1_185, %c0_186, %c0_187] : memref<3x32x32xbf16, #tpu.memory_space<vmem>>, vector<1x32x32xbf16>
    %251 = vector.shape_cast %250 : vector<1x32x32xbf16> to vector<32x32xbf16>
    %cst_188 = arith.constant dense<0.000000e+00> : vector<39x32xf32>
    %252 = tpu.matmul %249, %251, %cst_188 {dimension_numbers = #tpu.dot_dimension_numbers<[1], [0], [0], [1], [0, 0, 1, 1], [], []>} : vector<39x32xbf16>, vector<32x32xbf16>, vector<39x32xf32> -> vector<39x32xf32>
    %253 = arith.addf %247, %252 : vector<39x32xf32>
    %c162_189 = arith.constant 162 : index
    %c0_190 = arith.constant 0 : index
    %254 = tpu.strided_load %arg11[%c162_189, %c0_190] {strides = array<i32: 2, 1>} : memref<320x32xf32, #tpu.memory_space<vmem>>, vector<39x32xf32>
    %255 = arith.truncf %254 : vector<39x32xf32> to vector<39x32xbf16>
    %c2_191 = arith.constant 2 : index
    %c0_192 = arith.constant 0 : index
    %c0_193 = arith.constant 0 : index
    %256 = vector.load %arg5[%c2_191, %c0_192, %c0_193] : memref<3x32x32xbf16, #tpu.memory_space<vmem>>, vector<1x32x32xbf16>
    %257 = vector.shape_cast %256 : vector<1x32x32xbf16> to vector<32x32xbf16>
    %cst_194 = arith.constant dense<0.000000e+00> : vector<39x32xf32>
    %258 = tpu.matmul %255, %257, %cst_194 {dimension_numbers = #tpu.dot_dimension_numbers<[1], [0], [0], [1], [0, 0, 1, 1], [], []>} : vector<39x32xbf16>, vector<32x32xbf16>, vector<39x32xf32> -> vector<39x32xf32>
    %259 = arith.addf %253, %258 : vector<39x32xf32>
    %cst_195 = arith.constant 5.000000e-01 : f32
    %260 = vector.broadcast %cst_195 : f32 to vector<39x32xf32>
    %261 = arith.mulf %260, %259 : vector<39x32xf32>
    %cst_196 = arith.constant 0.707106769 : f32
    %262 = vector.broadcast %cst_196 : f32 to vector<39x32xf32>
    %263 = arith.mulf %259, %262 : vector<39x32xf32>
    %264 = math.erf %263 : vector<39x32xf32>
    %cst_197 = arith.constant 1.000000e+00 : f32
    %265 = vector.broadcast %cst_197 : f32 to vector<39x32xf32>
    %266 = arith.addf %265, %264 : vector<39x32xf32>
    %267 = arith.mulf %261, %266 : vector<39x32xf32>
    %c160_198 = arith.constant 160 : index
    %c0_199 = arith.constant 0 : index
    %268 = vector.load %arg11[%c160_198, %c0_199] : memref<320x32xf32, #tpu.memory_space<vmem>>, vector<39x32xf32>
    tpu.vector_store %arg11[%c160_198, %c0_199], %267 {strides = array<i32>} : memref<320x32xf32, #tpu.memory_space<vmem>>, vector<39x32xf32>,
    %c160_200 = arith.constant 160 : index
    %c0_201 = arith.constant 0 : index
    %269 = tpu.strided_load %arg11[%c160_200, %c0_201] {strides = array<i32: 2, 1>} : memref<320x32xf32, #tpu.memory_space<vmem>>, vector<19x32xf32>
    %270 = arith.truncf %269 : vector<19x32xf32> to vector<19x32xbf16>
    %c0_202 = arith.constant 0 : index
    %c0_203 = arith.constant 0 : index
    %c0_204 = arith.constant 0 : index
    %271 = vector.load %arg6[%c0_202, %c0_203, %c0_204] : memref<3x32x32xbf16, #tpu.memory_space<vmem>>, vector<1x32x32xbf16>
    %272 = vector.shape_cast %271 : vector<1x32x32xbf16> to vector<32x32xbf16>
    %cst_205 = arith.constant dense<0.000000e+00> : vector<19x32xf32>
    %273 = tpu.matmul %270, %272, %cst_205 {dimension_numbers = #tpu.dot_dimension_numbers<[1], [0], [0], [1], [0, 0, 1, 1], [], []>} : vector<19x32xbf16>, vector<32x32xbf16>, vector<19x32xf32> -> vector<19x32xf32>
    %c161_206 = arith.constant 161 : index
    %c0_207 = arith.constant 0 : index
    %274 = tpu.strided_load %arg11[%c161_206, %c0_207] {strides = array<i32: 2, 1>} : memref<320x32xf32, #tpu.memory_space<vmem>>, vector<19x32xf32>
    %275 = arith.truncf %274 : vector<19x32xf32> to vector<19x32xbf16>
    %c1_208 = arith.constant 1 : index
    %c0_209 = arith.constant 0 : index
    %c0_210 = arith.constant 0 : index
    %276 = vector.load %arg6[%c1_208, %c0_209, %c0_210] : memref<3x32x32xbf16, #tpu.memory_space<vmem>>, vector<1x32x32xbf16>
    %277 = vector.shape_cast %276 : vector<1x32x32xbf16> to vector<32x32xbf16>
    %cst_211 = arith.constant dense<0.000000e+00> : vector<19x32xf32>
    %278 = tpu.matmul %275, %277, %cst_211 {dimension_numbers = #tpu.dot_dimension_numbers<[1], [0], [0], [1], [0, 0, 1, 1], [], []>} : vector<19x32xbf16>, vector<32x32xbf16>, vector<19x32xf32> -> vector<19x32xf32>
    %279 = arith.addf %273, %278 : vector<19x32xf32>
    %c162_212 = arith.constant 162 : index
    %c0_213 = arith.constant 0 : index
    %280 = tpu.strided_load %arg11[%c162_212, %c0_213] {strides = array<i32: 2, 1>} : memref<320x32xf32, #tpu.memory_space<vmem>>, vector<19x32xf32>
    %281 = arith.truncf %280 : vector<19x32xf32> to vector<19x32xbf16>
    %c2_214 = arith.constant 2 : index
    %c0_215 = arith.constant 0 : index
    %c0_216 = arith.constant 0 : index
    %282 = vector.load %arg6[%c2_214, %c0_215, %c0_216] : memref<3x32x32xbf16, #tpu.memory_space<vmem>>, vector<1x32x32xbf16>
    %283 = vector.shape_cast %282 : vector<1x32x32xbf16> to vector<32x32xbf16>
    %cst_217 = arith.constant dense<0.000000e+00> : vector<19x32xf32>
    %284 = tpu.matmul %281, %283, %cst_217 {dimension_numbers = #tpu.dot_dimension_numbers<[1], [0], [0], [1], [0, 0, 1, 1], [], []>} : vector<19x32xbf16>, vector<32x32xbf16>, vector<19x32xf32> -> vector<19x32xf32>
    %285 = arith.addf %279, %284 : vector<19x32xf32>
    %cst_218 = arith.constant 5.000000e-01 : f32
    %286 = vector.broadcast %cst_218 : f32 to vector<19x32xf32>
    %287 = arith.mulf %286, %285 : vector<19x32xf32>
    %cst_219 = arith.constant 0.707106769 : f32
    %288 = vector.broadcast %cst_219 : f32 to vector<19x32xf32>
    %289 = arith.mulf %285, %288 : vector<19x32xf32>
    %290 = math.erf %289 : vector<19x32xf32>
    %cst_220 = arith.constant 1.000000e+00 : f32
    %291 = vector.broadcast %cst_220 : f32 to vector<19x32xf32>
    %292 = arith.addf %291, %290 : vector<19x32xf32>
    %293 = arith.mulf %287, %292 : vector<19x32xf32>
    %c160_221 = arith.constant 160 : index
    %c0_222 = arith.constant 0 : index
    %294 = vector.load %arg11[%c160_221, %c0_222] : memref<320x32xf32, #tpu.memory_space<vmem>>, vector<19x32xf32>
    tpu.vector_store %arg11[%c160_221, %c0_222], %293 {strides = array<i32>} : memref<320x32xf32, #tpu.memory_space<vmem>>, vector<19x32xf32>,
    %c160_223 = arith.constant 160 : index
    %c0_224 = arith.constant 0 : index
    %295 = tpu.strided_load %arg11[%c160_223, %c0_224] {strides = array<i32: 2, 1>} : memref<320x32xf32, #tpu.memory_space<vmem>>, vector<9x32xf32>
    %296 = arith.truncf %295 : vector<9x32xf32> to vector<9x32xbf16>
    %c0_225 = arith.constant 0 : index
    %c0_226 = arith.constant 0 : index
    %c0_227 = arith.constant 0 : index
    %297 = vector.load %arg7[%c0_225, %c0_226, %c0_227] : memref<3x32x32xbf16, #tpu.memory_space<vmem>>, vector<1x32x32xbf16>
    %298 = vector.shape_cast %297 : vector<1x32x32xbf16> to vector<32x32xbf16>
    %cst_228 = arith.constant dense<0.000000e+00> : vector<9x32xf32>
    %299 = tpu.matmul %296, %298, %cst_228 {dimension_numbers = #tpu.dot_dimension_numbers<[1], [0], [0], [1], [0, 0, 1, 1], [], []>} : vector<9x32xbf16>, vector<32x32xbf16>, vector<9x32xf32> -> vector<9x32xf32>
    %c161_229 = arith.constant 161 : index
    %c0_230 = arith.constant 0 : index
    %300 = tpu.strided_load %arg11[%c161_229, %c0_230] {strides = array<i32: 2, 1>} : memref<320x32xf32, #tpu.memory_space<vmem>>, vector<9x32xf32>
    %301 = arith.truncf %300 : vector<9x32xf32> to vector<9x32xbf16>
    %c1_231 = arith.constant 1 : index
    %c0_232 = arith.constant 0 : index
    %c0_233 = arith.constant 0 : index
    %302 = vector.load %arg7[%c1_231, %c0_232, %c0_233] : memref<3x32x32xbf16, #tpu.memory_space<vmem>>, vector<1x32x32xbf16>
    %303 = vector.shape_cast %302 : vector<1x32x32xbf16> to vector<32x32xbf16>
    %cst_234 = arith.constant dense<0.000000e+00> : vector<9x32xf32>
    %304 = tpu.matmul %301, %303, %cst_234 {dimension_numbers = #tpu.dot_dimension_numbers<[1], [0], [0], [1], [0, 0, 1, 1], [], []>} : vector<9x32xbf16>, vector<32x32xbf16>, vector<9x32xf32> -> vector<9x32xf32>
    %305 = arith.addf %299, %304 : vector<9x32xf32>
    %c162_235 = arith.constant 162 : index
    %c0_236 = arith.constant 0 : index
    %306 = tpu.strided_load %arg11[%c162_235, %c0_236] {strides = array<i32: 2, 1>} : memref<320x32xf32, #tpu.memory_space<vmem>>, vector<9x32xf32>
    %307 = arith.truncf %306 : vector<9x32xf32> to vector<9x32xbf16>
    %c2_237 = arith.constant 2 : index
    %c0_238 = arith.constant 0 : index
    %c0_239 = arith.constant 0 : index
    %308 = vector.load %arg7[%c2_237, %c0_238, %c0_239] : memref<3x32x32xbf16, #tpu.memory_space<vmem>>, vector<1x32x32xbf16>
    %309 = vector.shape_cast %308 : vector<1x32x32xbf16> to vector<32x32xbf16>
    %cst_240 = arith.constant dense<0.000000e+00> : vector<9x32xf32>
    %310 = tpu.matmul %307, %309, %cst_240 {dimension_numbers = #tpu.dot_dimension_numbers<[1], [0], [0], [1], [0, 0, 1, 1], [], []>} : vector<9x32xbf16>, vector<32x32xbf16>, vector<9x32xf32> -> vector<9x32xf32>
    %311 = arith.addf %305, %310 : vector<9x32xf32>
    %cst_241 = arith.constant 5.000000e-01 : f32
    %312 = vector.broadcast %cst_241 : f32 to vector<9x32xf32>
    %313 = arith.mulf %312, %311 : vector<9x32xf32>
    %cst_242 = arith.constant 0.707106769 : f32
    %314 = vector.broadcast %cst_242 : f32 to vector<9x32xf32>
    %315 = arith.mulf %311, %314 : vector<9x32xf32>
    %316 = math.erf %315 : vector<9x32xf32>
    %cst_243 = arith.constant 1.000000e+00 : f32
    %317 = vector.broadcast %cst_243 : f32 to vector<9x32xf32>
    %318 = arith.addf %317, %316 : vector<9x32xf32>
    %319 = arith.mulf %313, %318 : vector<9x32xf32>
    %c160_244 = arith.constant 160 : index
    %c0_245 = arith.constant 0 : index
    %320 = vector.load %arg11[%c160_244, %c0_245] : memref<320x32xf32, #tpu.memory_space<vmem>>, vector<9x32xf32>
    tpu.vector_store %arg11[%c160_244, %c0_245], %319 {strides = array<i32>} : memref<320x32xf32, #tpu.memory_space<vmem>>, vector<9x32xf32>,
    %c160_246 = arith.constant 160 : index
    %c0_247 = arith.constant 0 : index
    %321 = tpu.strided_load %arg11[%c160_246, %c0_247] {strides = array<i32: 2, 1>} : memref<320x32xf32, #tpu.memory_space<vmem>>, vector<4x32xf32>
    %322 = arith.truncf %321 : vector<4x32xf32> to vector<4x32xbf16>
    %c0_248 = arith.constant 0 : index
    %c0_249 = arith.constant 0 : index
    %c0_250 = arith.constant 0 : index
    %323 = vector.load %arg8[%c0_248, %c0_249, %c0_250] : memref<2x32x32xbf16, #tpu.memory_space<vmem>>, vector<1x32x32xbf16>
    %324 = vector.shape_cast %323 : vector<1x32x32xbf16> to vector<32x32xbf16>
    %cst_251 = arith.constant dense<0.000000e+00> : vector<4x32xf32>
    %325 = tpu.matmul %322, %324, %cst_251 {dimension_numbers = #tpu.dot_dimension_numbers<[1], [0], [0], [1], [0, 0, 1, 1], [], []>} : vector<4x32xbf16>, vector<32x32xbf16>, vector<4x32xf32> -> vector<4x32xf32>
    %c161_252 = arith.constant 161 : index
    %c0_253 = arith.constant 0 : index
    %326 = tpu.strided_load %arg11[%c161_252, %c0_253] {strides = array<i32: 2, 1>} : memref<320x32xf32, #tpu.memory_space<vmem>>, vector<4x32xf32>
    %327 = arith.truncf %326 : vector<4x32xf32> to vector<4x32xbf16>
    %c1_254 = arith.constant 1 : index
    %c0_255 = arith.constant 0 : index
    %c0_256 = arith.constant 0 : index
    %328 = vector.load %arg8[%c1_254, %c0_255, %c0_256] : memref<2x32x32xbf16, #tpu.memory_space<vmem>>, vector<1x32x32xbf16>
    %329 = vector.shape_cast %328 : vector<1x32x32xbf16> to vector<32x32xbf16>
    %cst_257 = arith.constant dense<0.000000e+00> : vector<4x32xf32>
    %330 = tpu.matmul %327, %329, %cst_257 {dimension_numbers = #tpu.dot_dimension_numbers<[1], [0], [0], [1], [0, 0, 1, 1], [], []>} : vector<4x32xbf16>, vector<32x32xbf16>, vector<4x32xf32> -> vector<4x32xf32>
    %331 = arith.addf %325, %330 : vector<4x32xf32>
    %cst_258 = arith.constant 5.000000e-01 : f32
    %332 = vector.broadcast %cst_258 : f32 to vector<4x32xf32>
    %333 = arith.mulf %332, %331 : vector<4x32xf32>
    %cst_259 = arith.constant 0.707106769 : f32
    %334 = vector.broadcast %cst_259 : f32 to vector<4x32xf32>
    %335 = arith.mulf %331, %334 : vector<4x32xf32>
    %336 = math.erf %335 : vector<4x32xf32>
    %cst_260 = arith.constant 1.000000e+00 : f32
    %337 = vector.broadcast %cst_260 : f32 to vector<4x32xf32>
    %338 = arith.addf %337, %336 : vector<4x32xf32>
    %339 = arith.mulf %333, %338 : vector<4x32xf32>
    %c160_261 = arith.constant 160 : index
    %c0_262 = arith.constant 0 : index
    %340 = vector.load %arg11[%c160_261, %c0_262] : memref<320x32xf32, #tpu.memory_space<vmem>>, vector<4x32xf32>
    tpu.vector_store %arg11[%c160_261, %c0_262], %339 {strides = array<i32>} : memref<320x32xf32, #tpu.memory_space<vmem>>, vector<4x32xf32>,
    %c160_263 = arith.constant 160 : index
    %c0_264 = arith.constant 0 : index
    %341 = tpu.strided_load %arg11[%c160_263, %c0_264] {strides = array<i32: 2, 1>} : memref<320x32xf32, #tpu.memory_space<vmem>>, vector<2x32xf32>
    %342 = arith.truncf %341 : vector<2x32xf32> to vector<2x32xbf16>
    %c0_265 = arith.constant 0 : index
    %c0_266 = arith.constant 0 : index
    %c0_267 = arith.constant 0 : index
    %343 = vector.load %arg9[%c0_265, %c0_266, %c0_267] : memref<2x32x32xbf16, #tpu.memory_space<vmem>>, vector<1x32x32xbf16>
    %344 = vector.shape_cast %343 : vector<1x32x32xbf16> to vector<32x32xbf16>
    %cst_268 = arith.constant dense<0.000000e+00> : vector<2x32xf32>
    %345 = tpu.matmul %342, %344, %cst_268 {dimension_numbers = #tpu.dot_dimension_numbers<[1], [0], [0], [1], [0, 0, 1, 1], [], []>} : vector<2x32xbf16>, vector<32x32xbf16>, vector<2x32xf32> -> vector<2x32xf32>
    %c161_269 = arith.constant 161 : index
    %c0_270 = arith.constant 0 : index
    %346 = tpu.strided_load %arg11[%c161_269, %c0_270] {strides = array<i32: 2, 1>} : memref<320x32xf32, #tpu.memory_space<vmem>>, vector<2x32xf32>
    %347 = arith.truncf %346 : vector<2x32xf32> to vector<2x32xbf16>
    %c1_271 = arith.constant 1 : index
    %c0_272 = arith.constant 0 : index
    %c0_273 = arith.constant 0 : index
    %348 = vector.load %arg9[%c1_271, %c0_272, %c0_273] : memref<2x32x32xbf16, #tpu.memory_space<vmem>>, vector<1x32x32xbf16>
    %349 = vector.shape_cast %348 : vector<1x32x32xbf16> to vector<32x32xbf16>
    %cst_274 = arith.constant dense<0.000000e+00> : vector<2x32xf32>
    %350 = tpu.matmul %347, %349, %cst_274 {dimension_numbers = #tpu.dot_dimension_numbers<[1], [0], [0], [1], [0, 0, 1, 1], [], []>} : vector<2x32xbf16>, vector<32x32xbf16>, vector<2x32xf32> -> vector<2x32xf32>
    %351 = arith.addf %345, %350 : vector<2x32xf32>
    %cst_275 = arith.constant 5.000000e-01 : f32
    %352 = vector.broadcast %cst_275 : f32 to vector<2x32xf32>
    %353 = arith.mulf %352, %351 : vector<2x32xf32>
    %cst_276 = arith.constant 0.707106769 : f32
    %354 = vector.broadcast %cst_276 : f32 to vector<2x32xf32>
    %355 = arith.mulf %351, %354 : vector<2x32xf32>
    %356 = math.erf %355 : vector<2x32xf32>
    %cst_277 = arith.constant 1.000000e+00 : f32
    %357 = vector.broadcast %cst_277 : f32 to vector<2x32xf32>
    %358 = arith.addf %357, %356 : vector<2x32xf32>
    %359 = arith.mulf %353, %358 : vector<2x32xf32>
    %c1_278 = arith.constant 1 : index
    %c0_279 = arith.constant 0 : index
    %c0_280 = arith.constant 0 : index
    %360 = vector.load %arg10[%c1_278, %c0_279, %c0_280] : memref<2x2x32xf32, #tpu.memory_space<vmem>>, vector<1x2x32xf32>
    %361 = vector.shape_cast %360 : vector<1x2x32xf32> to vector<2x32xf32>
    %362 = vector.shape_cast %359 : vector<2x32xf32> to vector<1x2x32xf32>
    tpu.vector_store %arg10[%c1_278, %c0_279, %c0_280], %362 {strides = array<i32>} : memref<2x2x32xf32, #tpu.memory_space<vmem>>, vector<1x2x32xf32>,
    return
  }
}

</mosaic_0001>

<bundles_post_ra>
// kernel: client_net_forward.1
= control target key start
LH: loop header
LB: loop body
LE: loop exit
PB: predicated region body
PF: predicated region fallthrough
CT: control target
= control target key end

     0   :  { %vm146_vm0 = vcmask 1044480   ;;  %vm115_vm1 = vcmask 80896   ;;  %vm263_vm2 = vcmask 261120   ;;  %vm301_vm3 = vcmask 260096   ;;  %s6575_s1 = inlined_call_operand.vmem [shape: bf16[10,32], index: 1, kind: input, shape index: {}]   ;;  %s6576_s0 = inlined_call_operand.vmem [shape: bf16[2,159,10], index: 0, kind: input, shape index: {}]   ;;  %s6577_s4 = inlined_call_operand.vmem [shape: bf16[3,32,32], index: 4, kind: input, shape index: {}]   ;;  %s6578_s2 = inlined_call_operand.vmem [shape: f32[1,32], index: 2, kind: input, shape index: {}]   ;;  %s6579_s3 = inlined_call_operand.vmem [shape: f32[1,32], index: 3, kind: input, shape index: {}]   ;;  %s6580_s5 = inlined_call_operand.vmem [shape: bf16[3,32,32], index: 5, kind: input, shape index: {}]   ;;  %s6581_s6 = inlined_call_operand.vmem [shape: bf16[3,32,32], index: 6, kind: input, shape index: {}]   ;;  %s6582_s7 = inlined_call_operand.vmem [shape: bf16[3,32,32], index: 7, kind: input, shape index: {}]   ;;  %s6583_s8 = inlined_call_operand.vmem [shape: bf16[2,32,32], index: 8, kind: input, shape index: {}]   ;;  %s6584_s9 = inlined_call_operand.vmem [shape: bf16[2,32,32], index: 9, kind: input, shape index: {}]   ;;  %s6585_s10 = inlined_call_operand.vmem [shape: f32[2,2,32], index: 10, kind: output, shape index: {}]  }
   0x1   :  { %v5135_v0 = vld [vmem:[%s6575_s1] sm:$0x1f]   ;;  %v5137_v3 = vld [vmem:[%s6576_s0 + $0x8] sm:$0xff]   ;;  %v5138_v4 = vld [vmem:[%s6576_s0 + $0x10] sm:$0xff]   ;;  %vm5396_vm4 = vmmov 0   ;;  %vm1601_vm5 = vcmask 256000  }
   0x2   :  { %v5136_v1 = vld [vmem:[%s6576_s0] sm:$0xff]   ;;  %5130 = vmatprep.subr.msk.bf16.mxu0 %vm146_vm0, %v5135_v0  ;;  %v5460_v2 = vsel %vm146_vm0, %v5135_v0, 0  ;;  %5131 = vmatprep.subr.msk.bf16.mxu1 %vm146_vm0, %v5135_v0  ;;  %v5139_v5 = vld [vmem:[%s6576_s0 + $0x18] sm:$0xff]   ;;  %v5145_v8 = vld [vmem:[%s6576_s0 + $0x48] sm:$0xff]   ;;  %vm1807_vm6 = vcmask 253952   ;;  %vm1937_vm7 = vcmask 257024  }
   0x3   :  { %4509 = vmatpush3.bf16.msra.mxu0 %v5460_v2  ;;  %4510 = vmatprep.mubr.msk.bf16.mxu0 %vm115_vm1, %v5136_v1  ;;  %v5140_v6 = vld [vmem:[%s6576_s0 + $0x20] sm:$0xff]   ;;  %v5141_v9 = vld [vmem:[%s6576_s0 + $0x28] sm:$0xff]   ;;  %v5142_v10 = vld [vmem:[%s6576_s0 + $0x30] sm:$0xff]   ;;  %vm2067_vm8 = vcmask 254976  }
   0x4   :  { %4953 = vmatpush3.bf16.msra.mxu1 %v5460_v2  ;;  %v5144_v7 = vld [vmem:[%s6576_s0 + $0x40] sm:$0xff]   ;;  %v5143_v11 = vld [vmem:[%s6576_s0 + $0x38] sm:$0xff]  }
   0x5   :  { %4526 = vmatprep.mubr.msk.bf16.mxu1 %vm115_vm1, %v5144_v7 }
   0x6   :  { %4511 = vmatmul.mubr.msk.bf16.vlgmr.msra.gmra.mrb[0].mxu0 %vm115_vm1, %v5137_v3 }
   0x7   :  { %4514 = vmatprep.mubr.msk.bf16.mxu0 %vm115_vm1, %v5138_v4  ;;  %4527 = vmatmul.mubr.msk.bf16.vlgmr.msra.gmra.mrb[0].mxu1 %vm115_vm1, %v5145_v8 }
   0xe   :  { %4515 = vmatmul.mubr.msk.bf16.gmra.mrb[4].mxu0 %vm115_vm1, %v5139_v5 }
   0xf   :  { %4518 = vmatprep.mubr.msk.bf16.mxu0 %vm115_vm1, %v5140_v6 }
  0x16   :  { %4519 = vmatmul.mubr.msk.bf16.gmra.mrb[8].mxu0 %vm115_vm1, %v5141_v9 }
  0x17   :  { %4522 = vmatprep.mubr.msk.bf16.mxu0 %vm115_vm1, %v5142_v10 }
  0x1e   :  { %4523 = vmatmul.mubr.msk.bf16.gmra.mrb[12].mxu0 %vm115_vm1, %v5143_v11 }
  0xd9   :  { %v5502_v12 = vpop.f32.mrb[0].mxu0 }
  0xda   :  { %v5504_v13 = vpop.f32.mrb[1].mxu0  ;;  %v267_v19 = vsel %vm263_vm2, %v5502_v12, 0.0  ;;  %v5516_v20 = vpop.f32.mrb[0].mxu1 }
  0xdb   :  { %v5506_v14 = vpop.f32.mrb[2].mxu0  ;;  %v264_v16 = vsel %vm263_vm2, %v5504_v13, 0.0  ;;  %v5518_v22 = vpop.f32.mrb[1].mxu1  ;;  %v299_v4 = vsel %vm263_vm2, %v5516_v20, 0.0 }
  0xdc   :  { %v5508_v15 = vpop.f32.mrb[3].mxu0  ;;  %v269_v23 = vsel %vm263_vm2, %v5506_v14, 0.0  ;;  %v5522_v25 = vpop.f32.mrb[2].mxu1  ;;  %v295_v62 = vsel %vm263_vm2, %v5518_v22, 0.0 }
  0xdd   :  { %v265_v17 = vsel %vm263_vm2, %v5508_v15, 0.0  ;;  %v5524_v28 = vpop.f32.mrb[3].mxu1  ;;  %v302_v6 = vsel %vm301_vm3, %v5522_v25, 0.0 }
  0xde   :  { %v266_v18 = vadd.f32 %v265_v17, %v264_v16  ;;  %v297_v1 = vsel %vm263_vm2, %v5524_v28, 0.0 }
  0xe0   :  { %v268_v21 = vadd.f32 %v267_v19, %v266_v18 }
  0xe1   :  { %v4516_v24 = vpop.f32.mrb[4].mxu0 }
  0xe2   :  { %v200_v26 = vpop.f32.mrb[5].mxu0  ;;  %v270_v27 = vadd.f32 %v269_v23, %v268_v21  ;;  %v275_v35 = vsel %vm263_vm2, %v4516_v24, 0.0 }
  0xe3   :  { %v271_v29 = vsel %vm263_vm2, %v200_v26, 0.0  ;;  %v4517_v30 = vpop.f32.mrb[6].mxu0 }
  0xe4   :  { %v272_v31 = vadd.f32 %v271_v29, %v270_v27  ;;  %v203_v32 = vpop.f32.mrb[7].mxu0  ;;  %v277_v37 = vsel %vm263_vm2, %v4517_v30, 0.0 }
  0xe5   :  { %v273_v33 = vsel %vm263_vm2, %v203_v32, 0.0 }
  0xe6   :  { %v274_v34 = vadd.f32 %v273_v33, %v272_v31 }
  0xe8   :  { %v276_v36 = vadd.f32 %v275_v35, %v274_v34 }
  0xe9   :  { %v4520_v38 = vpop.f32.mrb[8].mxu0 }
  0xea   :  { %v216_v39 = vpop.f32.mrb[9].mxu0  ;;  %v278_v40 = vadd.f32 %v277_v37, %v276_v36  ;;  %v283_v47 = vsel %vm263_vm2, %v4520_v38, 0.0 }
  0xeb   :  { %v279_v41 = vsel %vm263_vm2, %v216_v39, 0.0  ;;  %v4521_v42 = vpop.f32.mrb[10].mxu0 }
  0xec   :  { %v280_v43 = vadd.f32 %v279_v41, %v278_v40  ;;  %v219_v44 = vpop.f32.mrb[11].mxu0  ;;  %v285_v49 = vsel %vm263_vm2, %v4521_v42, 0.0 }
  0xed   :  { %v281_v45 = vsel %vm263_vm2, %v219_v44, 0.0 }
  0xee   :  { %v282_v46 = vadd.f32 %v281_v45, %v280_v43  ;;  %v5146_v45 = vld [vmem:[%s6577_s4 + $0x10] sm:$0xff]  }
  0xf0   :  { %v284_v48 = vadd.f32 %v283_v47, %v282_v46 }
  0xf1   :  { %v4524_v50 = vpop.f32.mrb[12].mxu0 }
  0xf2   :  { %v232_v51 = vpop.f32.mrb[13].mxu0  ;;  %v286_v52 = vadd.f32 %v285_v49, %v284_v48  ;;  %v291_v59 = vsel %vm263_vm2, %v4524_v50, 0.0  ;;  %v5147_v49 = vld [vmem:[%s6577_s4 + $0x18] sm:$0xff]  }
  0xf3   :  { %v287_v53 = vsel %vm263_vm2, %v232_v51, 0.0  ;;  %v4525_v54 = vpop.f32.mrb[14].mxu0 }
  0xf4   :  { %v288_v55 = vadd.f32 %v287_v53, %v286_v52  ;;  %v235_v56 = vpop.f32.mrb[15].mxu0  ;;  %v293_v61 = vsel %vm263_vm2, %v4525_v54, 0.0  ;;  %v5395_v52 = vmov 0.0  }
  0xf5   :  { %v289_v57 = vsel %vm263_vm2, %v235_v56, 0.0  ;;  %4530 = vmatprep.subr.bf16.mxu1 %v5395_v52  ;;  %4602 = vmatprep.subr.bf16.mxu0 %v5395_v52 }
  0xf6   :  { %v290_v58 = vadd.f32 %v289_v57, %v288_v55  ;;  %4531 = vmatpush3.bf16.msra.mxu1 %v5146_v45  ;;  %4534 = vmatprep.mubr.msk.bf16.mxu1 %vm5396_vm4, %v5395_v52 }
  0xf7   :  { %4532 = vmatprep.subr.bf16.mxu1 %v5395_v52  ;;  %4606 = vmatprep.mubr.msk.bf16.mxu0 %vm5396_vm4, %v5395_v52 }
  0xf8   :  { %v292_v60 = vadd.f32 %v291_v59, %v290_v58 }
  0xfa   :  { %v294_v63 = vadd.f32 %v293_v61, %v292_v60  ;;  %4533 = vmatpush3.bf16.msra.mxu1 %v5147_v49 }
  0xfb   :  { %4554 = vmatprep.subr.bf16.mxu1 %v5395_v52 }
  0xfc   :  { %v296_v0 = vadd.f32 %v295_v62, %v294_v63 }
  0xfe   :  { %v298_v3 = vadd.f32 %v297_v1, %v296_v0 }
 0x100   :  { %v300_v5 = vadd.f32 %v299_v4, %v298_v3 }
 0x102   :  { %v303_v7 = vadd.f32 %v302_v6, %v300_v5 }
 0x104   :  { %v304_v8 = vrot.slane %v303_v7, 4 }
 0x106   :  { %v305_v9 = vadd.f32 %v304_v8, %v303_v7 }
 0x108   :  { %v306_v10 = vrot.slane %v305_v9, 2 }
 0x10a   :  { %v307_v11 = vadd.f32 %v306_v10, %v305_v9 }
 0x10c   :  { %v308_v16 = vrot.slane %v307_v11, 1 }
 0x10e   :  { %v309_v17 = vadd.f32 %v308_v16, %v307_v11 }
 0x110   :  { %v311_v18 = vmul.f32 0.006289308, %v309_v17 }
 0x112   :  { %v5547_v19 = vsub.f32 %v5504_v13, %v311_v18  ;;  %v5550_v21 = vsub.f32 %v5508_v15, %v311_v18  ;;  %v5553_v23 = vsub.f32 %v5502_v12, %v311_v18  ;;  %v5556_v27 = vsub.f32 %v5506_v14, %v311_v18 }
 0x113   :  { %v5558_v29 = vsub.f32 %v200_v26, %v311_v18  ;;  %v5560_v31 = vsub.f32 %v203_v32, %v311_v18  ;;  %v5562_v33 = vsub.f32 %v4516_v24, %v311_v18  ;;  %v5564_v34 = vsub.f32 %v4517_v30, %v311_v18 }
 0x114   :  { %v5566_v35 = vsub.f32 %v216_v39, %v311_v18  ;;  %v5568_v13 = vsub.f32 %v219_v44, %v311_v18  ;;  %v5570_v15 = vsub.f32 %v4520_v38, %v311_v18  ;;  %v5572_v36 = vsub.f32 %v4521_v42, %v311_v18 }
 0x115   :  { %v5574_v12 = vsub.f32 %v232_v51, %v311_v18  ;;  %v5576_v14 = vsub.f32 %v235_v56, %v311_v18  ;;  %v5578_v26 = vsub.f32 %v4524_v50, %v311_v18  ;;  %v5580_v32 = vsub.f32 %v4525_v54, %v311_v18 }
 0x116   :  { %v5583_v24 = vsub.f32 %v5518_v22, %v311_v18  ;;  %v5586_v30 = vsub.f32 %v5524_v28, %v311_v18  ;;  %v5589_v37 = vsub.f32 %v5516_v20, %v311_v18  ;;  %v5592_v38 = vsub.f32 %v5522_v25, %v311_v18 }
 0x117   :  { %v332_v39 = vmul.f32 %v5547_v19, %v5547_v19  ;;  %v333_v40 = vmul.f32 %v5550_v21, %v5550_v21  ;;  %v334_v41 = vmul.f32 %v5553_v23, %v5553_v23  ;;  %v335_v22 = vmul.f32 %v5556_v27, %v5556_v27 }
 0x118   :  { %v336_v25 = vmul.f32 %v5558_v29, %v5558_v29  ;;  %v337_v46 = vmul.f32 %v5560_v31, %v5560_v31  ;;  %v338_v50 = vmul.f32 %v5562_v33, %v5562_v33  ;;  %v339_v54 = vmul.f32 %v5564_v34, %v5564_v34 }
 0x119   :  { %v352_v28 = vsel %vm263_vm2, %v332_v39, 0.0  ;;  %v353_v20 = vsel %vm263_vm2, %v333_v40, 0.0  ;;  %v355_v43 = vsel %vm263_vm2, %v334_v41, 0.0  ;;  %v357_v47 = vsel %vm263_vm2, %v335_v22, 0.0 }
 0x11a   :  { %v354_v42 = vadd.f32 %v353_v20, %v352_v28  ;;  %v359_v51 = vsel %vm263_vm2, %v336_v25, 0.0  ;;  %v361_v55 = vsel %vm263_vm2, %v337_v46, 0.0  ;;  %v340_v57 = vmul.f32 %v5566_v35, %v5566_v35 }
 0x11b   :  { %v363_v58 = vsel %vm263_vm2, %v338_v50, 0.0  ;;  %v341_v60 = vmul.f32 %v5568_v13, %v5568_v13  ;;  %v365_v61 = vsel %vm263_vm2, %v339_v54, 0.0  ;;  %v342_v63 = vmul.f32 %v5570_v15, %v5570_v15 }
 0x11c   :  { %v356_v44 = vadd.f32 %v355_v43, %v354_v42  ;;  %v367_v0 = vsel %vm263_vm2, %v340_v57, 0.0  ;;  %v343_v3 = vmul.f32 %v5572_v36, %v5572_v36  ;;  %v344_v6 = vmul.f32 %v5574_v12, %v5574_v12 }
 0x11d   :  { %v369_v4 = vsel %vm263_vm2, %v341_v60, 0.0  ;;  %v371_v7 = vsel %vm263_vm2, %v342_v63, 0.0  ;;  %v345_v9 = vmul.f32 %v5576_v14, %v5576_v14  ;;  %v346_v16 = vmul.f32 %v5578_v26, %v5578_v26 }
 0x11e   :  { %v358_v48 = vadd.f32 %v357_v47, %v356_v44  ;;  %v373_v10 = vsel %vm263_vm2, %v343_v3, 0.0  ;;  %v375_v17 = vsel %vm263_vm2, %v344_v6, 0.0  ;;  %v347_v39 = vmul.f32 %v5580_v32, %v5580_v32 }
 0x11f   :  { %v377_v40 = vsel %vm263_vm2, %v345_v9, 0.0  ;;  %v348_v22 = vmul.f32 %v5583_v24, %v5583_v24  ;;  %v379_v28 = vsel %vm263_vm2, %v346_v16, 0.0  ;;  %v349_v42 = vmul.f32 %v5586_v30, %v5586_v30 }
 0x120   :  { %v360_v53 = vadd.f32 %v359_v51, %v358_v48  ;;  %v381_v25 = vsel %vm263_vm2, %v347_v39, 0.0  ;;  %v350_v44 = vmul.f32 %v5589_v37, %v5589_v37  ;;  %v351_v47 = vmul.f32 %v5592_v38, %v5592_v38 }
 0x121   :  { %v383_v45 = vsel %vm263_vm2, %v348_v22, 0.0  ;;  %v385_v48 = vsel %vm263_vm2, %v349_v42, 0.0 }
 0x122   :  { %v362_v56 = vadd.f32 %v361_v55, %v360_v53  ;;  %v387_v50 = vsel %vm263_vm2, %v350_v44, 0.0  ;;  %v389_v53 = vsel %vm301_vm3, %v351_v47, 0.0 }
 0x124   :  { %v364_v59 = vadd.f32 %v363_v58, %v362_v56 }
 0x126   :  { %v366_v62 = vadd.f32 %v365_v61, %v364_v59 }
 0x128   :  { %v368_v1 = vadd.f32 %v367_v0, %v366_v62 }
 0x12a   :  { %v370_v5 = vadd.f32 %v369_v4, %v368_v1 }
 0x12c   :  { %v372_v8 = vadd.f32 %v371_v7, %v370_v5 }
 0x12e   :  { %v374_v11 = vadd.f32 %v373_v10, %v372_v8 }
 0x130   :  { %v376_v18 = vadd.f32 %v375_v17, %v374_v11 }
 0x132   :  { %v378_v41 = vadd.f32 %v377_v40, %v376_v18 }
 0x134   :  { %v380_v20 = vadd.f32 %v379_v28, %v378_v41 }
 0x136   :  { %v382_v43 = vadd.f32 %v381_v25, %v380_v20 }
 0x138   :  { %v384_v46 = vadd.f32 %v383_v45, %v382_v43 }
 0x13a   :  { %v386_v49 = vadd.f32 %v385_v48, %v384_v46 }
 0x13c   :  { %v388_v51 = vadd.f32 %v387_v50, %v386_v49 }
 0x13e   :  { %v390_v54 = vadd.f32 %v389_v53, %v388_v51 }
 0x140   :  { %v391_v55 = vrot.slane %v390_v54, 4 }
 0x142   :  { %v392_v56 = vadd.f32 %v391_v55, %v390_v54 }
 0x144   :  { %v393_v57 = vrot.slane %v392_v56, 2 }
 0x146   :  { %v394_v58 = vadd.f32 %v393_v57, %v392_v56 }
 0x148   :  { %v395_v59 = vrot.slane %v394_v58, 1 }
 0x14a   :  { %v396_v60 = vadd.f32 %v395_v59, %v394_v58 }
 0x14c   :  { %v397_v61 = vmul.f32 0.006289308, %v396_v60 }
 0x14e   :  { %v398_v62 = vadd.f32 1e-05, %v397_v61 }
 0x150   :  { %5220 = vrsqrt.f32 %v398_v62 }
 0x15a   :  { %v5221_v63 = vpop.eup %5220 }
 0x15b   :  { %v406_v0 = vmul.f32 %v5221_v63, %v5562_v33  ;;  %v407_v1 = vmul.f32 %v5221_v63, %v5564_v34  ;;  %v408_v3 = vmul.f32 %v5221_v63, %v5566_v35  ;;  %v409_v4 = vmul.f32 %v5221_v63, %v5568_v13 }
 0x15c   :  { %v410_v5 = vmul.f32 %v5221_v63, %v5570_v15  ;;  %v411_v6 = vmul.f32 %v5221_v63, %v5572_v36  ;;  %v412_v7 = vmul.f32 %v5221_v63, %v5574_v12  ;;  %v413_v8 = vmul.f32 %v5221_v63, %v5576_v14  ;;  %v4087_v14 = vld [vmem:[%s6578_s2] ss:$0 sm:$0xff] }
 0x15d   :  { %v414_v9 = vmul.f32 %v5221_v63, %v5578_v26  ;;  %v415_v10 = vmul.f32 %v5221_v63, %v5580_v32  ;;  %v416_v33 = vmul.f32 %v5221_v63, %v5583_v24  ;;  %v417_v34 = vmul.f32 %v5221_v63, %v5586_v30 }
 0x15e   :  { %v418_v35 = vmul.f32 %v5221_v63, %v5589_v37  ;;  %v419_v13 = vmul.f32 %v5221_v63, %v5592_v38  ;;  %v400_v15 = vmul.f32 %v5221_v63, %v5547_v19  ;;  %v401_v36 = vmul.f32 %v5221_v63, %v5550_v21  ;;  %v4088_v19 = vld [vmem:[%s6579_s3] ss:$0 sm:$0xff] }
 0x15f   :  { %v402_v12 = vmul.f32 %v5221_v63, %v5553_v23  ;;  %v403_v26 = vmul.f32 %v5221_v63, %v5556_v27  ;;  %v404_v32 = vmul.f32 %v5221_v63, %v5558_v29  ;;  %v405_v24 = vmul.f32 %v5221_v63, %v5560_v31 }
 0x160   :  { %v426_v30 = vmul.f32 %v4087_v14, %v400_v15  ;;  %v427_v37 = vmul.f32 %v4087_v14, %v401_v36  ;;  %v432_v16 = vmul.f32 %v4087_v14, %v406_v0  ;;  %v433_v40 = vmul.f32 %v4087_v14, %v407_v1 }
 0x161   :  { %v428_v11 = vmul.f32 %v4087_v14, %v402_v12  ;;  %v429_v21 = vmul.f32 %v4087_v14, %v403_v26  ;;  %v430_v38 = vmul.f32 %v4087_v14, %v404_v32  ;;  %v431_v23 = vmul.f32 %v4087_v14, %v405_v24 }
 0x162   :  { %v452_v17 = vadd.f32 %v4088_v19, %v426_v30  ;;  %v453_v18 = vadd.f32 %v4088_v19, %v427_v37  ;;  %v434_v41 = vmul.f32 %v4087_v14, %v408_v3  ;;  %v435_v22 = vmul.f32 %v4087_v14, %v409_v4 }
 0x163   :  { %v454_v39 = vadd.f32 %v4088_v19, %v428_v11  ;;  %v455_v27 = vadd.f32 %v4088_v19, %v429_v21  ;;  %v456_v29 = vadd.f32 %v4088_v19, %v430_v38  ;;  %v436_v31 = vmul.f32 %v4087_v14, %v410_v5 }
 0x164   :  { %v437_v28 = vmul.f32 %v4087_v14, %v411_v6  ;;  %v5694_v20 = vadd.f32 %v4088_v19, %v431_v23  ;;  %v5696_v42 = vadd.f32 %v4088_v19, %v432_v16  ;;  %v492_v25 = vmul.f32 0.70710677, %v452_v17 }
 0x165   :  { %v493_v43 = vmul.f32 0.70710677, %v453_v18  ;;  %v494_v44 = vmul.f32 0.70710677, %v454_v39  ;;  %v438_v45 = vmul.f32 %v4087_v14, %v412_v7  ;;  %v439_v46 = vmul.f32 %v4087_v14, %v413_v8 }
 0x166   :  { %v5698_v47 = vadd.f32 %v4088_v19, %v433_v40  ;;  %v495_v48 = vmul.f32 0.70710677, %v455_v27  ;;  %v440_v49 = vmul.f32 %v4087_v14, %v414_v9  ;;  %v5700_v50 = vadd.f32 %v4088_v19, %v434_v41 }
 0x167   :  { %v496_v51 = vmul.f32 0.70710677, %v456_v29  ;;  %5222 = verf.f32 %v492_v25  ;;  %v441_v53 = vmul.f32 %v4087_v14, %v415_v10  ;;  %v5702_v54 = vadd.f32 %v4088_v19, %v435_v22 }
 0x168   :  { %v497_v55 = vmul.f32 0.70710677, %v5694_v20  ;;  %5224 = verf.f32 %v493_v43  ;;  %v442_v56 = vmul.f32 %v4087_v14, %v416_v33  ;;  %v5705_v57 = vadd.f32 %v4088_v19, %v436_v31 }
 0x169   :  { %v498_v58 = vmul.f32 0.70710677, %v5696_v42  ;;  %5226 = verf.f32 %v494_v44  ;;  %v443_v59 = vmul.f32 %v4087_v14, %v417_v34  ;;  %v5708_v60 = vadd.f32 %v4088_v19, %v437_v28 }
 0x16a   :  { %v499_v61 = vmul.f32 0.70710677, %v5698_v47  ;;  %5228 = verf.f32 %v495_v48  ;;  %v444_v62 = vmul.f32 %v4087_v14, %v418_v35  ;;  %v5711_v63 = vadd.f32 %v4088_v19, %v438_v45 }
 0x16b   :  { %v500_v0 = vmul.f32 0.70710677, %v5700_v50  ;;  %5230 = verf.f32 %v496_v51  ;;  %v445_v1 = vmul.f32 %v4087_v14, %v419_v13  ;;  %v5714_v3 = vadd.f32 %v4088_v19, %v439_v46 }
 0x16c   :  { %v501_v4 = vmul.f32 0.70710677, %v5702_v54  ;;  %5232 = verf.f32 %v497_v55  ;;  %v5717_v5 = vadd.f32 %v4088_v19, %v440_v49  ;;  %v502_v6 = vmul.f32 0.70710677, %v5705_v57 }
 0x16d   :  { %5234 = verf.f32 %v498_v58  ;;  %v5720_v7 = vadd.f32 %v4088_v19, %v441_v53  ;;  %v5722_v8 = vadd.f32 %v4088_v19, %v442_v56  ;;  %v503_v9 = vmul.f32 0.70710677, %v5708_v60 }
 0x16e   :  { %5236 = verf.f32 %v499_v61  ;;  %v5725_v10 = vadd.f32 %v4088_v19, %v443_v59  ;;  %v5727_v33 = vadd.f32 %v4088_v19, %v444_v62  ;;  %v504_v34 = vmul.f32 0.70710677, %v5711_v63 }
 0x16f   :  { %5238 = verf.f32 %v500_v0  ;;  %v5730_v35 = vadd.f32 %v4088_v19, %v445_v1  ;;  %v472_v13 = vmul.f32 0.5, %v452_v17  ;;  %v505_v15 = vmul.f32 0.70710677, %v5714_v3 }
 0x170   :  { %5240 = verf.f32 %v501_v4  ;;  %v473_v12 = vmul.f32 0.5, %v453_v18  ;;  %v474_v14 = vmul.f32 0.5, %v454_v39  ;;  %v506_v26 = vmul.f32 0.70710677, %v5717_v5 }
 0x171   :  { %v5223_v36 = vpop.eup %5222  ;;  %5242 = verf.f32 %v502_v6  ;;  %v475_v24 = vmul.f32 0.5, %v455_v27  ;;  %v507_v30 = vmul.f32 0.70710677, %v5720_v7  ;;  %v476_v21 = vmul.f32 0.5, %v456_v29 }
 0x172   :  { %v5225_v32 = vpop.eup %5224  ;;  %5244 = verf.f32 %v503_v9  ;;  %v532_v37 = vadd.f32 1.0, %v5223_v36  ;;  %v508_v19 = vmul.f32 0.70710677, %v5722_v8  ;;  %v509_v16 = vmul.f32 0.70710677, %v5725_v10 }
 0x173   :  { %v5227_v11 = vpop.eup %5226  ;;  %5246 = verf.f32 %v504_v34  ;;  %v533_v38 = vadd.f32 1.0, %v5225_v32  ;;  %v510_v40 = vmul.f32 0.70710677, %v5727_v33  ;;  %v511_v31 = vmul.f32 0.70710677, %v5730_v35 }
 0x174   :  { %v5229_v23 = vpop.eup %5228  ;;  %5248 = verf.f32 %v505_v15  ;;  %v534_v17 = vadd.f32 1.0, %v5227_v11  ;;  %v552_v18 = vmul.f32 %v532_v37, %v472_v13  ;;  %v477_v43 = vmul.f32 0.5, %v5694_v20 }
 0x175   :  { %v5231_v39 = vpop.eup %5230  ;;  %5250 = verf.f32 %v506_v26  ;;  %v535_v27 = vadd.f32 1.0, %v5229_v23  ;;  %v553_v41 = vmul.f32 %v533_v38, %v473_v12  ;;  %v478_v48 = vmul.f32 0.5, %v5696_v42  ;;  %v5148_v38 = vld [vmem:[%s6577_s4] sm:$0xff]  }
 0x176   :  { %v5233_v22 = vpop.eup %5232  ;;  %5252 = verf.f32 %v507_v30  ;;  %v554_v29 = vmul.f32 %v534_v17, %v474_v14  ;;  %572 = vst.msk [vmem:[#allocation2] sm:$0xff] %vm263_vm2, %v552_v18  ;;  %v536_v28 = vadd.f32 1.0, %v5231_v39  ;;  %v479_v55 = vmul.f32 0.5, %v5698_v47 }
 0x177   :  { %v5235_v25 = vpop.eup %5234  ;;  %5254 = verf.f32 %v508_v19  ;;  %v537_v44 = vadd.f32 1.0, %v5233_v22  ;;  %v555_v45 = vmul.f32 %v535_v27, %v475_v24  ;;  %573 = vst.msk [vmem:[#allocation2 + $0x8] sm:$0xff] %vm263_vm2, %v553_v41  ;;  %v480_v59 = vmul.f32 0.5, %v5700_v50 }
 0x178   :  { %v5237_v46 = vpop.eup %5236  ;;  %5256 = verf.f32 %v509_v16  ;;  %v538_v49 = vadd.f32 1.0, %v5235_v25  ;;  %574 = vst.msk [vmem:[#allocation2 + $0x10] sm:$0xff] %vm263_vm2, %v554_v29  ;;  %v556_v51 = vmul.f32 %v536_v28, %v476_v21  ;;  %v481_v0 = vmul.f32 0.5, %v5702_v54 }
 0x179   :  { %v5239_v53 = vpop.eup %5238  ;;  %5258 = verf.f32 %v510_v40  ;;  %v539_v56 = vadd.f32 1.0, %v5237_v46  ;;  %575 = vst.msk [vmem:[#allocation2 + $0x18] sm:$0xff] %vm263_vm2, %v555_v45  ;;  %v557_v20 = vmul.f32 %v537_v44, %v477_v43  ;;  %v482_v6 = vmul.f32 0.5, %v5705_v57 }
 0x17a   :  { %v5241_v58 = vpop.eup %5240  ;;  %5260 = verf.f32 %v511_v31  ;;  %v540_v61 = vadd.f32 1.0, %v5239_v53  ;;  %v558_v62 = vmul.f32 %v538_v49, %v478_v48  ;;  %576 = vst.msk [vmem:[#allocation2 + $0x20] sm:$0xff] %vm263_vm2, %v556_v51  ;;  %v483_v13 = vmul.f32 0.5, %v5708_v60 }
 0x17b   :  { %v5243_v42 = vpop.eup %5242  ;;  %v541_v1 = vadd.f32 1.0, %v5241_v58  ;;  %v559_v4 = vmul.f32 %v539_v56, %v479_v55  ;;  %577 = vst.msk [vmem:[#allocation2 + $0x28] sm:$0xff] %vm263_vm2, %v557_v20  ;;  %v484_v54 = vmul.f32 0.5, %v5711_v63  ;;  %v485_v24 = vmul.f32 0.5, %v5714_v3 }
 0x17c   :  { %v5245_v47 = vpop.eup %5244  ;;  %v542_v9 = vadd.f32 1.0, %v5243_v42  ;;  %v560_v34 = vmul.f32 %v540_v61, %v480_v59  ;;  %578 = vst.msk [vmem:[#allocation2 + $0x30] sm:$0xff] %vm263_vm2, %v558_v62  ;;  %v486_v11 = vmul.f32 0.5, %v5717_v5  ;;  %v487_v16 = vmul.f32 0.5, %v5720_v7 }
 0x17d   :  { %v5247_v50 = vpop.eup %5246  ;;  %v543_v15 = vadd.f32 1.0, %v5245_v47  ;;  %v561_v36 = vmul.f32 %v541_v1, %v481_v0  ;;  %579 = vst.msk [vmem:[#allocation2 + $0x38] sm:$0xff] %vm263_vm2, %v559_v4  ;;  %v488_v5 = vmul.f32 0.5, %v5722_v8  ;;  %v489_v22 = vmul.f32 0.5, %v5725_v10  ;;  %v5149_v8 = vld [vmem:[%s6577_s4 + $0x8] sm:$0xff]   ;;  %v5150_v1 = vld [vmem:[%s6577_s4 + $0x20] sm:$0xff]  }
 0x17e   :  { %v5249_v12 = vpop.eup %5248  ;;  %v544_v14 = vadd.f32 1.0, %v5247_v50  ;;  %v562_v26 = vmul.f32 %v542_v9, %v482_v6  ;;  %580 = vst.msk [vmem:[#allocation2 + $0x40] sm:$0xff] %vm263_vm2, %v560_v34  ;;  %v621_v32 = vld [vmem:[#allocation2 + $0x1] ss:$2 sm:$0xff]  ;;  %v490_v28 = vmul.f32 0.5, %v5727_v33  ;;  %v491_v10 = vmul.f32 0.5, %v5730_v35 }
 0x17f   :  { %v5251_v57 = vpop.eup %5250  ;;  %v545_v30 = vadd.f32 1.0, %v5249_v12  ;;  %v563_v37 = vmul.f32 %v543_v15, %v483_v13  ;;  %581 = vst.msk [vmem:[#allocation2 + $0x48] sm:$0xff] %vm263_vm2, %v561_v36  ;;  %v592_v42 = vld [vmem:[#allocation2] ss:$2 sm:$0xff] }
 0x180   :  { %v5253_v60 = vpop.eup %5252  ;;  %v546_v21 = vadd.f32 1.0, %v5251_v57  ;;  %v564_v19 = vmul.f32 %v544_v14, %v484_v54  ;;  %582 = vst.msk [vmem:[#allocation2 + $0x50] sm:$0xff] %vm263_vm2, %v562_v26  ;;  %v623_v63 = vld [vmem:[#allocation2 + $0x11] ss:$2 sm:$0xff]  ;;  %v594_v0 = vld [vmem:[#allocation2 + $0x10] ss:$2 sm:$0xff] }
 0x181   :  { %v5255_v23 = vpop.eup %5254  ;;  %v547_v3 = vadd.f32 1.0, %v5253_v60  ;;  %v565_v17 = vmul.f32 %v545_v30, %v485_v24  ;;  %583 = vst.msk [vmem:[#allocation2 + $0x58] sm:$0xff] %vm263_vm2, %v563_v37  ;;  %v640_v18 = vpack.c.bf16 %v623_v63, %v621_v32  ;;  %v611_v4 = vpack.c.bf16 %v594_v0, %v592_v42  ;;  %v5151_v47 = vld [vmem:[%s6577_s4 + $0x28] sm:$0xff]   ;;  %v853_v24 = vld [vmem:[#allocation2 + $0x12] ss:$2 sm:$0xff] }
 0x182   :  { %v5257_v39 = vpop.eup %5256  ;;  %v548_v40 = vadd.f32 1.0, %v5255_v23  ;;  %v566_v27 = vmul.f32 %v546_v21, %v486_v11  ;;  %584 = vst.msk [vmem:[#allocation2 + $0x60] sm:$0xff] %vm263_vm2, %v564_v19  ;;  %v625_v46 = vld [vmem:[#allocation2 + $0x21] ss:$2 sm:$0xff]  ;;  %v596_v6 = vld [vmem:[#allocation2 + $0x20] ss:$2 sm:$0xff] }
 0x183   :  { %v5259_v41 = vpop.eup %5258  ;;  %v549_v31 = vadd.f32 1.0, %v5257_v39  ;;  %v567_v29 = vmul.f32 %v547_v3, %v487_v16  ;;  %585 = vst.msk [vmem:[#allocation2 + $0x68] sm:$0xff] %vm263_vm2, %v565_v17  ;;  %4535 = vmatmul.mubr.msk.bf16.vlgmr.msra.gmra.mrb[4].mxu1 %vm263_vm2, %v640_v18  ;;  %v851_v57 = vld [vmem:[#allocation2 + $0x2] ss:$2 sm:$0xff] }
 0x184   :  { %v5261_v7 = vpop.eup %5260  ;;  %v550_v25 = vadd.f32 1.0, %v5259_v41  ;;  %v568_v43 = vmul.f32 %v548_v40, %v488_v5  ;;  %586 = vst.msk [vmem:[#allocation2 + $0x70] sm:$0xff] %vm263_vm2, %v566_v27  ;;  %4555 = vmatpush3.bf16.msra.mxu1 %v5148_v38  ;;  %4538 = vmatprep.mubr.msk.bf16.mxu1 %vm5396_vm4, %v5395_v52  ;;  %v627_v48 = vld [vmem:[#allocation2 + $0x31] ss:$2 sm:$0xff]  ;;  %v598_v9 = vld [vmem:[#allocation2 + $0x30] ss:$2 sm:$0xff]  ;;  %v870_v30 = vpack.c.bf16 %v853_v24, %v851_v57 }
 0x185   :  { %v551_v44 = vadd.f32 1.0, %v5261_v7  ;;  %v569_v45 = vmul.f32 %v549_v31, %v489_v22  ;;  %587 = vst.msk [vmem:[#allocation2 + $0x78] sm:$0xff] %vm263_vm2, %v567_v29  ;;  %4556 = vmatprep.subr.bf16.mxu1 %v5395_v52  ;;  %v641_v35 = vpack.c.bf16 %v627_v48, %v625_v46  ;;  %v612_v34 = vpack.c.bf16 %v598_v9, %v596_v6  ;;  %v855_v37 = vld [vmem:[#allocation2 + $0x22] ss:$2 sm:$0xff]  ;;  %v857_v60 = vld [vmem:[#allocation2 + $0x32] ss:$2 sm:$0xff] }
 0x186   :  { %v570_v33 = vmul.f32 %v550_v25, %v490_v28  ;;  %588 = vst.msk [vmem:[#allocation2 + $0x80] sm:$0xff] %vm263_vm2, %v568_v43  ;;  %v629_v51 = vld [vmem:[#allocation2 + $0x41] ss:$2 sm:$0xff]  ;;  %v600_v50 = vld [vmem:[#allocation2 + $0x40] ss:$2 sm:$0xff]  ;;  %v871_v11 = vpack.c.bf16 %v857_v60, %v855_v37  ;;  %v5152_v39 = vld [vmem:[%s6580_s5 + $0x10] sm:$0xff]  }
 0x187   :  { %v571_v49 = vmul.f32 %v551_v44, %v491_v10  ;;  %589 = vst.msk [vmem:[#allocation2 + $0x88] sm:$0xff] %vm263_vm2, %v569_v45  ;;  %v859_v21 = vld [vmem:[#allocation2 + $0x42] ss:$2 sm:$0xff]  ;;  %4603 = vmatpush3.bf16.msra.mxu0 %v5152_v39  ;;  %v5153_v5 = vld [vmem:[%s6580_s5 + $0x18] sm:$0xff]  }
 0x188   :  { %590 = vst.msk [vmem:[#allocation2 + $0x90] sm:$0xff] %vm263_vm2, %v570_v33  ;;  %4557 = vmatpush3.bf16.msra.mxu1 %v5149_v8  ;;  %v631_v53 = vld [vmem:[#allocation2 + $0x51] ss:$2 sm:$0xff]  ;;  %v602_v13 = vld [vmem:[#allocation2 + $0x50] ss:$2 sm:$0xff]  ;;  %4604 = vmatprep.subr.bf16.mxu0 %v5395_v52 }
 0x189   :  { %591 = vst.msk [vmem:[#allocation2 + $0x98] sm:$0x7f] %vm301_vm3, %v571_v49  ;;  %4578 = vmatprep.subr.bf16.mxu1 %v5395_v52  ;;  %v642_v55 = vpack.c.bf16 %v631_v53, %v629_v51  ;;  %v613_v15 = vpack.c.bf16 %v602_v13, %v600_v50  ;;  %v861_v19 = vld [vmem:[#allocation2 + $0x52] ss:$2 sm:$0xff] }
 0x18a   :  { %v633_v56 = vld [vmem:[#allocation2 + $0x61] ss:$2 sm:$0xff]  ;;  %v604_v36 = vld [vmem:[#allocation2 + $0x60] ss:$2 sm:$0xff]  ;;  %v872_v63 = vpack.c.bf16 %v861_v19, %v859_v21 }
 0x18b   :  { %4539 = vmatmul.mubr.msk.bf16.gmra.mrb[8].mxu1 %vm263_vm2, %v641_v35  ;;  %v863_v38 = vld [vmem:[#allocation2 + $0x62] ss:$2 sm:$0xff]  ;;  %4605 = vmatpush3.bf16.msra.mxu0 %v5153_v5 }
 0x18c   :  { %4542 = vmatprep.mubr.msk.bf16.mxu1 %vm5396_vm4, %v5395_v52  ;;  %v635_v20 = vld [vmem:[#allocation2 + $0x71] ss:$2 sm:$0xff]  ;;  %v606_v12 = vld [vmem:[#allocation2 + $0x70] ss:$2 sm:$0xff]  ;;  %4618 = vmatprep.subr.bf16.mxu0 %v5395_v52 }
 0x18d   :  { %v643_v58 = vpack.c.bf16 %v635_v20, %v633_v56  ;;  %v614_v54 = vpack.c.bf16 %v606_v12, %v604_v36  ;;  %v865_v23 = vld [vmem:[#allocation2 + $0x72] ss:$2 sm:$0xff] }
 0x18e   :  { %v637_v59 = vld [vmem:[#allocation2 + $0x81] ss:$2 sm:$0xff]  ;;  %v608_v14 = vld [vmem:[#allocation2 + $0x80] ss:$2 sm:$0xff]  ;;  %v873_v16 = vpack.c.bf16 %v865_v23, %v863_v38 }
 0x18f   :  { %v867_v3 = vld [vmem:[#allocation2 + $0x82] ss:$2 sm:$0xff] }
 0x190   :  { %v639_v61 = vld [vmem:[#allocation2 + $0x91] ss:$2 sm:$0x7f]  ;;  %v610_v26 = vld [vmem:[#allocation2 + $0x90] ss:$2 sm:$0x7f] }
 0x191   :  { %v644_v62 = vpack.c.bf16 %v639_v61, %v637_v59  ;;  %v615_v32 = vpack.c.bf16 %v610_v26, %v608_v14  ;;  %v869_v17 = vld [vmem:[#allocation2 + $0x92] ss:$2 sm:$0x7f] }
 0x192   :  { %v874_v18 = vpack.c.bf16 %v869_v17, %v867_v3 }
 0x193   :  { %4543 = vmatmul.mubr.msk.bf16.gmra.mrb[12].mxu1 %vm263_vm2, %v642_v55 }
 0x194   :  { %4546 = vmatprep.mubr.msk.bf16.mxu1 %vm5396_vm4, %v5395_v52 }
 0x19b   :  { %4547 = vmatmul.mubr.msk.bf16.gmra.mrb[16].mxu1 %vm263_vm2, %v643_v58 }
 0x19c   :  { %4550 = vmatprep.mubr.msk.bf16.mxu1 %vm5396_vm4, %v5395_v52 }
 0x1a3   :  { %4551 = vmatmul.mubr.msk.bf16.gmra.mrb[20].mxu1 %vm263_vm2, %v644_v62 }
 0x1a4   :  { %4558 = vmatprep.mubr.msk.bf16.mxu1 %vm5396_vm4, %v5395_v52 }
 0x1ab   :  { %4559 = vmatmul.mubr.msk.bf16.vlgmr.msra.gmra.mrb[4].mxu1 %vm263_vm2, %v611_v4 }
 0x1ac   :  { %4579 = vmatpush3.bf16.msra.mxu1 %v5150_v1  ;;  %4562 = vmatprep.mubr.msk.bf16.mxu1 %vm5396_vm4, %v5395_v52 }
 0x1ad   :  { %4580 = vmatprep.subr.bf16.mxu1 %v5395_v52 }
 0x1b0   :  { %4581 = vmatpush3.bf16.msra.mxu1 %v5151_v47 }
 0x1b1   :  { %4674 = vmatprep.subr.bf16.mxu1 %v5395_v52 }
 0x1b3   :  { %4563 = vmatmul.mubr.msk.bf16.gmra.mrb[8].mxu1 %vm263_vm2, %v612_v34 }
 0x1b4   :  { %4566 = vmatprep.mubr.msk.bf16.mxu1 %vm5396_vm4, %v5395_v52 }
 0x1bb   :  { %4567 = vmatmul.mubr.msk.bf16.gmra.mrb[12].mxu1 %vm263_vm2, %v613_v15 }
 0x1bc   :  { %4570 = vmatprep.mubr.msk.bf16.mxu1 %vm5396_vm4, %v5395_v52 }
 0x1c3   :  { %4571 = vmatmul.mubr.msk.bf16.gmra.mrb[16].mxu1 %vm263_vm2, %v614_v54 }
 0x1c4   :  { %4574 = vmatprep.mubr.msk.bf16.mxu1 %vm5396_vm4, %v5395_v52 }
 0x1cb   :  { %4575 = vmatmul.mubr.msk.bf16.gmra.mrb[20].mxu1 %vm263_vm2, %v615_v32 }
 0x1cc   :  { %4582 = vmatprep.mubr.msk.bf16.mxu1 %vm5396_vm4, %v5395_v52 }
 0x1d3   :  { %4583 = vmatmul.mubr.msk.bf16.vlgmr.msra.gmra.mrb[4].mxu1 %vm263_vm2, %v870_v30 }
 0x1d4   :  { %4586 = vmatprep.mubr.msk.bf16.mxu1 %vm5396_vm4, %v5395_v52 }
 0x1db   :  { %4587 = vmatmul.mubr.msk.bf16.gmra.mrb[8].mxu1 %vm263_vm2, %v871_v11 }
 0x1dc   :  { %4590 = vmatprep.mubr.msk.bf16.mxu1 %vm5396_vm4, %v5395_v52 }
 0x1e3   :  { %4591 = vmatmul.mubr.msk.bf16.gmra.mrb[12].mxu1 %vm263_vm2, %v872_v63 }
 0x1e4   :  { %4594 = vmatprep.mubr.msk.bf16.mxu1 %vm5396_vm4, %v5395_v52 }
 0x1eb   :  { %4595 = vmatmul.mubr.msk.bf16.gmra.mrb[16].mxu1 %vm263_vm2, %v873_v16  ;;  %v5154_v16 = vld [vmem:[%s6580_s5] sm:$0xff]  }
 0x1ec   :  { %4598 = vmatprep.mubr.msk.bf16.mxu1 %vm5396_vm4, %v5395_v52 }
 0x1f3   :  { %4599 = vmatmul.mubr.msk.bf16.gmra.mrb[20].mxu1 %vm263_vm2, %v874_v18 }
 0x1f4   :  { %4678 = vmatprep.mubr.msk.bf16.mxu1 %vm5396_vm4, %v5395_v52 }
 0x2a6   :  { %v941_v40 = vpop.f32.mrb[4].mxu1 }
 0x2a7   :  { %v1000_v27 = vmul.f32 0.70710677, %v941_v40  ;;  %v4584_v41 = vpop.f32.mrb[5].mxu1  ;;  %v990_v45 = vmul.f32 0.5, %v941_v40  ;;  %v5155_v40 = vld [vmem:[%s6580_s5 + $0x8] sm:$0xff]  }
 0x2a8   :  { %v944_v22 = vpop.f32.mrb[6].mxu1 }
 0x2a9   :  { %5262 = verf.f32 %v1000_v27  ;;  %v1001_v31 = vmul.f32 0.70710677, %v944_v22  ;;  %v4585_v29 = vpop.f32.mrb[7].mxu1  ;;  %v991_v49 = vmul.f32 0.5, %v944_v22 }
 0x2ab   :  { %5264 = verf.f32 %v1001_v31 }
 0x2ae   :  { %v949_v7 = vpop.f32.mrb[8].mxu1 }
 0x2af   :  { %v1002_v28 = vmul.f32 0.70710677, %v949_v7  ;;  %v4588_v25 = vpop.f32.mrb[9].mxu1  ;;  %v992_v62 = vmul.f32 0.5, %v949_v7 }
 0x2b0   :  { %v952_v43 = vpop.f32.mrb[10].mxu1 }
 0x2b1   :  { %5266 = verf.f32 %v1002_v28  ;;  %v1003_v8 = vmul.f32 0.70710677, %v952_v43  ;;  %v4589_v10 = vpop.f32.mrb[11].mxu1  ;;  %v993_v4 = vmul.f32 0.5, %v952_v43 }
 0x2b3   :  { %v5263_v44 = vpop.eup %5262  ;;  %5268 = verf.f32 %v1003_v8 }
 0x2b4   :  { %v1020_v33 = vadd.f32 1.0, %v5263_v44 }
 0x2b5   :  { %v5265_v46 = vpop.eup %5264 }
 0x2b6   :  { %v1030_v48 = vmul.f32 %v1020_v33, %v990_v45  ;;  %v1021_v35 = vadd.f32 1.0, %v5265_v46  ;;  %v957_v51 = vpop.f32.mrb[12].mxu1 }
 0x2b7   :  { %v1004_v53 = vmul.f32 0.70710677, %v957_v51  ;;  %v4592_v55 = vpop.f32.mrb[13].mxu1  ;;  %v994_v54 = vmul.f32 0.5, %v957_v51 }
 0x2b8   :  { %1040 = vst.msk [vmem:[#allocation2] sm:$0xff] %vm263_vm2, %v1030_v48  ;;  %v1031_v56 = vmul.f32 %v1021_v35, %v991_v49  ;;  %v960_v20 = vpop.f32.mrb[14].mxu1 }
 0x2b9   :  { %5270 = verf.f32 %v1004_v53  ;;  %v1005_v58 = vmul.f32 0.70710677, %v960_v20  ;;  %v4593_v59 = vpop.f32.mrb[15].mxu1  ;;  %v995_v57 = vmul.f32 0.5, %v960_v20  ;;  %v5156_v53 = vld [vmem:[%s6580_s5 + $0x20] sm:$0xff]  }
 0x2ba   :  { %1041 = vst.msk [vmem:[#allocation2 + $0x8] sm:$0xff] %vm263_vm2, %v1031_v56  ;;  %v5157_v56 = vld [vmem:[%s6580_s5 + $0x28] sm:$0xff]  }
 0x2bb   :  { %v5267_v61 = vpop.eup %5266  ;;  %5272 = verf.f32 %v1005_v58 }
 0x2bc   :  { %v1022_v42 = vadd.f32 1.0, %v5267_v61 }
 0x2bd   :  { %v5269_v0 = vpop.eup %5268 }
 0x2be   :  { %v1032_v1 = vmul.f32 %v1022_v42, %v992_v62  ;;  %v1023_v47 = vadd.f32 1.0, %v5269_v0  ;;  %v965_v6 = vpop.f32.mrb[16].mxu1 }
 0x2bf   :  { %v1006_v9 = vmul.f32 0.70710677, %v965_v6  ;;  %v4596_v34 = vpop.f32.mrb[17].mxu1  ;;  %v996_v18 = vmul.f32 0.5, %v965_v6 }
 0x2c0   :  { %1042 = vst.msk [vmem:[#allocation2 + $0x10] sm:$0xff] %vm263_vm2, %v1032_v1  ;;  %v1033_v50 = vmul.f32 %v1023_v47, %v993_v4  ;;  %v968_v13 = vpop.f32.mrb[18].mxu1 }
 0x2c1   :  { %5274 = verf.f32 %v1006_v9  ;;  %v1007_v15 = vmul.f32 0.70710677, %v968_v13  ;;  %v4597_v36 = vpop.f32.mrb[19].mxu1  ;;  %v1062_v19 = vld [vmem:[#allocation2 + $0x1] ss:$2 sm:$0xff]  ;;  %v997_v41 = vmul.f32 0.5, %v968_v13 }
 0x2c2   :  { %1043 = vst.msk [vmem:[#allocation2 + $0x18] sm:$0xff] %vm263_vm2, %v1033_v50  ;;  %v1050_v51 = vld [vmem:[#allocation2] ss:$2 sm:$0xff]  ;;  %v5158_v50 = vld [vmem:[%s6581_s6 + $0x10] sm:$0xff]   ;;  %v5159_v13 = vld [vmem:[%s6581_s6 + $0x18] sm:$0xff]  }
 0x2c3   :  { %v5271_v12 = vpop.eup %5270  ;;  %5276 = verf.f32 %v1007_v15  ;;  %v5902_v15 = vld [vmem:[%s6581_s6] sm:$0xff]   ;;  %v5164_v36 = vld [vmem:[%s6582_s7 + $0x10] sm:$0xff]  }
 0x2c4   :  { %v1024_v14 = vadd.f32 1.0, %v5271_v12  ;;  %4675 = vmatpush3.bf16.msra.mxu1 %v5164_v36 }
 0x2c5   :  { %v5273_v26 = vpop.eup %5272  ;;  %4676 = vmatprep.subr.bf16.mxu1 %v5395_v52 }
 0x2c6   :  { %v1034_v32 = vmul.f32 %v1024_v14, %v994_v54  ;;  %v1025_v24 = vadd.f32 1.0, %v5273_v26  ;;  %v973_v30 = vpop.f32.mrb[20].mxu1 }
 0x2c7   :  { %v1008_v37 = vmul.f32 0.70710677, %v973_v30  ;;  %v4600_v60 = vpop.f32.mrb[21].mxu1  ;;  %v998_v7 = vmul.f32 0.5, %v973_v30  ;;  %v1229_v0 = vld [vmem:[#allocation2 + $0x2] ss:$2 sm:$0xff] }
 0x2c8   :  { %1044 = vst.msk [vmem:[#allocation2 + $0x20] sm:$0xff] %vm263_vm2, %v1034_v32  ;;  %v1035_v11 = vmul.f32 %v1025_v24, %v995_v57  ;;  %v976_v21 = vpop.f32.mrb[22].mxu1 }
 0x2c9   :  { %5278 = verf.f32 %v1008_v37  ;;  %v1009_v63 = vmul.f32 0.70710677, %v976_v21  ;;  %v4601_v38 = vpop.f32.mrb[23].mxu1  ;;  %v1063_v23 = vld [vmem:[#allocation2 + $0x11] ss:$2 sm:$0xff]  ;;  %v999_v8 = vmul.f32 0.5, %v976_v21 }
 0x2ca   :  { %1045 = vst.msk [vmem:[#allocation2 + $0x28] sm:$0xff] %vm263_vm2, %v1035_v11  ;;  %v1067_v3 = vpack.c.bf16 %v1063_v23, %v1062_v19  ;;  %v1051_v35 = vld [vmem:[#allocation2 + $0x10] ss:$2 sm:$0xff] }
 0x2cb   :  { %v5275_v17 = vpop.eup %5274  ;;  %5280 = verf.f32 %v1009_v63  ;;  %v1055_v55 = vpack.c.bf16 %v1051_v35, %v1050_v51 }
 0x2cc   :  { %v1026_v39 = vadd.f32 1.0, %v5275_v17  ;;  %4607 = vmatmul.mubr.msk.bf16.vlgmr.msra.gmra.mrb[16].mxu0 %vm263_vm2, %v1067_v3 }
 0x2cd   :  { %v5277_v5 = vpop.eup %5276  ;;  %4619 = vmatpush3.bf16.msra.mxu0 %v5154_v16  ;;  %4610 = vmatprep.mubr.msk.bf16.mxu0 %vm5396_vm4, %v5395_v52 }
 0x2ce   :  { %v1036_v27 = vmul.f32 %v1026_v39, %v996_v18  ;;  %v1027_v22 = vadd.f32 1.0, %v5277_v5  ;;  %4620 = vmatprep.subr.bf16.mxu0 %v5395_v52 }
 0x2cf   :  { %v1230_v42 = vld [vmem:[#allocation2 + $0x12] ss:$2 sm:$0xff] }
 0x2d0   :  { %1046 = vst.msk [vmem:[#allocation2 + $0x30] sm:$0xff] %vm263_vm2, %v1036_v27  ;;  %v1037_v31 = vmul.f32 %v1027_v22, %v997_v41  ;;  %v1234_v1 = vpack.c.bf16 %v1230_v42, %v1229_v0  ;;  %v5163_v0 = vld [vmem:[%s6581_s6 + $0x28] sm:$0xff]  }
 0x2d1   :  { %4621 = vmatpush3.bf16.msra.mxu0 %v5155_v40  ;;  %v1064_v45 = vld [vmem:[#allocation2 + $0x21] ss:$2 sm:$0xff]  ;;  %v1052_v58 = vld [vmem:[#allocation2 + $0x20] ss:$2 sm:$0xff] }
 0x2d2   :  { %1047 = vst.msk [vmem:[#allocation2 + $0x38] sm:$0xff] %vm263_vm2, %v1037_v31  ;;  %4634 = vmatprep.subr.bf16.mxu0 %v5395_v52 }
 0x2d3   :  { %v5279_v29 = vpop.eup %5278 }
 0x2d4   :  { %v1028_v28 = vadd.f32 1.0, %v5279_v29 }
 0x2d5   :  { %v5281_v25 = vpop.eup %5280 }
 0x2d6   :  { %v1038_v43 = vmul.f32 %v1028_v28, %v998_v7  ;;  %v1029_v10 = vadd.f32 1.0, %v5281_v25 }
 0x2d7   :  { %v1231_v47 = vld [vmem:[#allocation2 + $0x22] ss:$2 sm:$0xff] }
 0x2d8   :  { %1048 = vst.msk [vmem:[#allocation2 + $0x40] sm:$0xff] %vm263_vm2, %v1038_v43  ;;  %v1039_v44 = vmul.f32 %v1029_v10, %v999_v8 }
 0x2d9   :  { %v1065_v33 = vld [vmem:[#allocation2 + $0x31] ss:$2 sm:$0xff]  ;;  %v1053_v20 = vld [vmem:[#allocation2 + $0x30] ss:$2 sm:$0xff] }
 0x2da   :  { %1049 = vst.msk [vmem:[#allocation2 + $0x48] sm:$0x7f] %vm301_vm3, %v1039_v44  ;;  %v1068_v46 = vpack.c.bf16 %v1065_v33, %v1064_v45  ;;  %v1056_v59 = vpack.c.bf16 %v1053_v20, %v1052_v58  ;;  %v5162_v58 = vld [vmem:[%s6581_s6 + $0x20] sm:$0xff]  }
 0x2dc   :  { %4611 = vmatmul.mubr.msk.bf16.gmra.mrb[20].mxu0 %vm263_vm2, %v1068_v46 }
 0x2dd   :  { %4614 = vmatprep.mubr.msk.bf16.mxu0 %vm5396_vm4, %v5395_v52 }
 0x2df   :  { %v1232_v4 = vld [vmem:[#allocation2 + $0x32] ss:$2 sm:$0xff] }
 0x2e0   :  { %v1235_v6 = vpack.c.bf16 %v1232_v4, %v1231_v47 }
 0x2e1   :  { %v1066_v48 = vld [vmem:[#allocation2 + $0x41] ss:$2 sm:$0x7f]  ;;  %v1054_v61 = vld [vmem:[#allocation2 + $0x40] ss:$2 sm:$0x7f] }
 0x2e2   :  { %v1069_v49 = vpack.c.bf16 %v1066_v48, %v1066_v48  ;;  %v1057_v62 = vpack.c.bf16 %v1054_v61, %v1054_v61  ;;  %v1233_v9 = vld [vmem:[#allocation2 + $0x42] ss:$2 sm:$0x7f] }
 0x2e3   :  { %v1236_v34 = vpack.c.bf16 %v1233_v9, %v1233_v9 }
 0x2e4   :  { %4615 = vmatmul.mubr.msk.bf16.gmra.mrb[24].mxu0 %vm263_vm2, %v1069_v49 }
 0x2e5   :  { %4622 = vmatprep.mubr.msk.bf16.mxu0 %vm5396_vm4, %v5395_v52 }
 0x2ec   :  { %4623 = vmatmul.mubr.msk.bf16.vlgmr.msra.gmra.mrb[16].mxu0 %vm263_vm2, %v1055_v55 }
 0x2ed   :  { %4635 = vmatpush3.bf16.msra.mxu0 %v5156_v53  ;;  %4626 = vmatprep.mubr.msk.bf16.mxu0 %vm5396_vm4, %v5395_v52 }
 0x2ee   :  { %4636 = vmatprep.subr.bf16.mxu0 %v5395_v52 }
 0x2f1   :  { %4637 = vmatpush3.bf16.msra.mxu0 %v5157_v56  ;;  %v5161_v56 = vld [vmem:[%s6581_s6 + $0x8] sm:$0xff]  }
 0x2f2   :  { %4650 = vmatprep.subr.bf16.mxu0 %v5158_v50 }
 0x2f4   :  { %4627 = vmatmul.mubr.msk.bf16.gmra.mrb[20].mxu0 %vm263_vm2, %v1056_v59 }
 0x2f5   :  { %4630 = vmatprep.mubr.msk.bf16.mxu0 %vm5396_vm4, %v5395_v52 }
 0x2fc   :  { %4631 = vmatmul.mubr.msk.bf16.gmra.mrb[24].mxu0 %vm263_vm2, %v1057_v62 }
 0x2fd   :  { %4638 = vmatprep.mubr.msk.bf16.mxu0 %vm5396_vm4, %v5395_v52 }
 0x304   :  { %4639 = vmatmul.mubr.msk.bf16.vlgmr.msra.gmra.mrb[16].mxu0 %vm263_vm2, %v1234_v1 }
 0x305   :  { %4642 = vmatprep.mubr.msk.bf16.mxu0 %vm5396_vm4, %v5395_v52  ;;  %4651 = vmatpush3.bf16.msra.mxu0 %v5158_v50 }
 0x306   :  { %4652 = vmatprep.subr.bf16.mxu0 %v5159_v13 }
 0x309   :  { %4653 = vmatpush3.bf16.msra.mxu0 %v5159_v13 }
 0x30a   :  { %4658 = vmatprep.subr.bf16.mxu0 %v5902_v15 }
 0x30c   :  { %4643 = vmatmul.mubr.msk.bf16.gmra.mrb[20].mxu0 %vm263_vm2, %v1235_v6  ;;  %v5165_v6 = vld [vmem:[%s6582_s7 + $0x18] sm:$0xff]  }
 0x30d   :  { %4646 = vmatprep.mubr.msk.bf16.mxu0 %vm5396_vm4, %v5395_v52  ;;  %4677 = vmatpush3.bf16.msra.mxu1 %v5165_v6  ;;  %v5181_v6 = vld [vmem:[%s6576_s0 + $0x88] sm:$0xff]  }
 0x30e   :  { %4682 = vmatprep.subr.bf16.mxu1 %v5395_v52 }
 0x314   :  { %4647 = vmatmul.mubr.msk.bf16.gmra.mrb[24].mxu0 %vm263_vm2, %v1236_v34 }
 0x3d7   :  { %v1297_v12 = vpop.f32.mrb[16].mxu0 }
 0x3d8   :  { %v1329_v54 = vmul.f32 0.70710677, %v1297_v12  ;;  %v4640_v14 = vpop.f32.mrb[17].mxu0  ;;  %v1324_v63 = vmul.f32 0.5, %v1297_v12 }
 0x3d9   :  { %v1300_v26 = vpop.f32.mrb[18].mxu0 }
 0x3da   :  { %5282 = verf.f32 %v1329_v54  ;;  %v1330_v32 = vmul.f32 0.70710677, %v1300_v26  ;;  %v4641_v57 = vpop.f32.mrb[19].mxu0  ;;  %v1325_v3 = vmul.f32 0.5, %v1300_v26 }
 0x3dc   :  { %5284 = verf.f32 %v1330_v32 }
 0x3df   :  { %v1305_v24 = vpop.f32.mrb[20].mxu0 }
 0x3e0   :  { %v1331_v30 = vmul.f32 0.70710677, %v1305_v24  ;;  %v4644_v37 = vpop.f32.mrb[21].mxu0  ;;  %v1326_v31 = vmul.f32 0.5, %v1305_v24 }
 0x3e1   :  { %v1308_v60 = vpop.f32.mrb[22].mxu0 }
 0x3e2   :  { %5286 = verf.f32 %v1331_v30  ;;  %v1332_v11 = vmul.f32 0.70710677, %v1308_v60  ;;  %v4645_v21 = vpop.f32.mrb[23].mxu0  ;;  %v1327_v25 = vmul.f32 0.5, %v1308_v60 }
 0x3e4   :  { %v5283_v19 = vpop.eup %5282  ;;  %5288 = verf.f32 %v1332_v11 }
 0x3e5   :  { %v1339_v38 = vadd.f32 1.0, %v5283_v19 }
 0x3e6   :  { %v5285_v23 = vpop.eup %5284 }
 0x3e7   :  { %v1344_v16 = vmul.f32 %v1339_v38, %v1324_v63  ;;  %v1340_v17 = vadd.f32 1.0, %v5285_v23  ;;  %v1313_v18 = vpop.f32.mrb[24].mxu0  ;;  %v5166_v23 = vld [vmem:[%s6582_s7] sm:$0xff]  }
 0x3e8   :  { %v1333_v39 = vmul.f32 0.70710677, %v1313_v18  ;;  %v4648_v5 = vpop.f32.mrb[25].mxu0  ;;  %v1328_v44 = vmul.f32 0.5, %v1313_v18 }
 0x3e9   :  { %1349 = vst.msk [vmem:[#allocation2] sm:$0xff] %vm263_vm2, %v1344_v16  ;;  %v1345_v40 = vmul.f32 %v1340_v17, %v1325_v3  ;;  %v1316_v27 = vpop.f32.mrb[26].mxu0  ;;  %v5167_v3 = vld [vmem:[%s6582_s7 + $0x8] sm:$0xff]  }
 0x3ea   :  { %5290 = verf.f32 %v1333_v39  ;;  %v4649_v41 = vpop.f32.mrb[27].mxu0  ;;  %v5168_v39 = vld [vmem:[%s6582_s7 + $0x20] sm:$0xff]  }
 0x3eb   :  { %1350 = vst.msk [vmem:[#allocation2 + $0x8] sm:$0xff] %vm263_vm2, %v1345_v40  ;;  %v5169_v40 = vld [vmem:[%s6582_s7 + $0x28] sm:$0xff]  }
 0x3ec   :  { %v5287_v22 = vpop.eup %5286 }
 0x3ed   :  { %v1341_v29 = vadd.f32 1.0, %v5287_v22 }
 0x3ee   :  { %v5289_v7 = vpop.eup %5288 }
 0x3ef   :  { %v1346_v28 = vmul.f32 %v1341_v29, %v1326_v31  ;;  %v1342_v43 = vadd.f32 1.0, %v5289_v7  ;;  %v5170_v31 = vld [vmem:[%s6583_s8 + $0x10] sm:$0xff]   ;;  %v5171_v29 = vld [vmem:[%s6583_s8 + $0x18] sm:$0xff]  }
 0x3f1   :  { %1351 = vst.msk [vmem:[#allocation2 + $0x10] sm:$0xff] %vm263_vm2, %v1346_v28  ;;  %v1347_v8 = vmul.f32 %v1342_v43, %v1327_v25 }
 0x3f2   :  { %v1363_v46 = vld [vmem:[#allocation2 + $0x1] ss:$2 sm:$0xff]  ;;  %v1354_v55 = vld [vmem:[#allocation2] ss:$2 sm:$0xff] }
 0x3f3   :  { %1352 = vst.msk [vmem:[#allocation2 + $0x18] sm:$0xff] %vm263_vm2, %v1347_v8 }
 0x3f4   :  { %v5291_v10 = vpop.eup %5290 }
 0x3f5   :  { %v1343_v45 = vadd.f32 1.0, %v5291_v10 }
 0x3f7   :  { %v1348_v33 = vmul.f32 %v1343_v45, %v1328_v44 }
 0x3f8   :  { %v1505_v42 = vld [vmem:[#allocation2 + $0x2] ss:$2 sm:$0xff] }
 0x3f9   :  { %1353 = vst.msk [vmem:[#allocation2 + $0x20] sm:$0x7f] %vm301_vm3, %v1348_v33 }
 0x3fa   :  { %v1364_v48 = vld [vmem:[#allocation2 + $0x11] ss:$2 sm:$0xff]  ;;  %v1355_v35 = vld [vmem:[#allocation2 + $0x10] ss:$2 sm:$0xff] }
 0x3fb   :  { %v1366_v49 = vpack.c.bf16 %v1364_v48, %v1363_v46  ;;  %v1357_v20 = vpack.c.bf16 %v1355_v35, %v1354_v55  ;;  %v5172_v55 = vld [vmem:[%s6583_s8] sm:$0xff]  }
 0x3fd   :  { %4654 = vmatprep.mubr.msk.bf16.mxu0 %vm263_vm2, %v1366_v49 }
 0x400   :  { %v1365_v51 = vld [vmem:[#allocation2 + $0x21] ss:$2 sm:$0x7]  ;;  %v1356_v59 = vld [vmem:[#allocation2 + $0x20] ss:$2 sm:$0x7] }
 0x401   :  { %v1367_v53 = vpack.c.bf16 %v1365_v51, %v1365_v51  ;;  %v1506_v61 = vld [vmem:[#allocation2 + $0x12] ss:$2 sm:$0xff]  ;;  %v1358_v62 = vpack.c.bf16 %v1356_v59, %v1356_v59  ;;  %v1507_v4 = vld [vmem:[#allocation2 + $0x22] ss:$2 sm:$0x7] }
 0x402   :  { %v1508_v1 = vpack.c.bf16 %v1506_v61, %v1505_v42  ;;  %v1509_v47 = vpack.c.bf16 %v1507_v4, %v1507_v4  ;;  %v5174_v61 = vld [vmem:[%s6576_s0 + $0x50] sm:$0xff]   ;;  %v5175_v42 = vld [vmem:[%s6576_s0 + $0x58] sm:$0xff]  }
 0x403   :  { %4655 = vmatmul.mubr.msk.bf16.vlgmr.msra.gmra.mrb[28].mxu0 %vm263_vm2, %v1367_v53  ;;  %v5179_v4 = vld [vmem:[%s6576_s0 + $0x78] sm:$0xff]  }
 0x404   :  { %4659 = vmatpush3.bf16.msra.mxu0 %v5902_v15  ;;  %4662 = vmatprep.mubr.msk.bf16.mxu0 %vm263_vm2, %v1357_v20  ;;  %v5173_v20 = vld [vmem:[%s6583_s8 + $0x8] sm:$0xff]  }
 0x405   :  { %4660 = vmatprep.subr.bf16.mxu0 %v5161_v56 }
 0x408   :  { %4661 = vmatpush3.bf16.msra.mxu0 %v5161_v56 }
 0x409   :  { %4666 = vmatprep.subr.bf16.mxu0 %v5162_v58 }
 0x40f   :  { %4663 = vmatmul.mubr.msk.bf16.vlgmr.msra.gmra.mrb[28].mxu0 %vm263_vm2, %v1358_v62 }
 0x410   :  { %4667 = vmatpush3.bf16.msra.mxu0 %v5162_v58  ;;  %4670 = vmatprep.mubr.msk.bf16.mxu0 %vm263_vm2, %v1508_v1  ;;  %v5392_v58 = vld [vmem:[%s6575_s1] sm:$0x1f]   ;;  %v5178_v1 = vld [vmem:[%s6576_s0 + $0x70] sm:$0xff]  }
 0x411   :  { %4668 = vmatprep.subr.bf16.mxu0 %v5163_v0 }
 0x414   :  { %4669 = vmatpush3.bf16.msra.mxu0 %v5163_v0  ;;  %v5176_v0 = vld [vmem:[%s6576_s0 + $0x60] sm:$0xff]  }
 0x415   :  { %4698 = vmatprep.subr.bf16.mxu0 %v5395_v52 }
 0x41b   :  { %4671 = vmatmul.mubr.msk.bf16.vlgmr.msra.gmra.mrb[28].mxu0 %vm263_vm2, %v1509_v47  ;;  %v5180_v47 = vld [vmem:[%s6576_s0 + $0x80] sm:$0xff]  }
 0x41c   :  { %4702 = vmatprep.mubr.msk.bf16.mxu0 %vm5396_vm4, %v5395_v52  ;;  %4699 = vmatpush3.bf16.msra.mxu0 %v5170_v31 }
 0x41d   :  { %4700 = vmatprep.subr.bf16.mxu0 %v5395_v52 }
 0x420   :  { %4701 = vmatpush3.bf16.msra.mxu0 %v5171_v29 }
 0x421   :  { %4706 = vmatprep.subr.bf16.mxu0 %v5395_v52 }
 0x4ee   :  { %v4672_v9 = vpop.f32.mrb[28].mxu0 }
 0x4ef   :  { %v1589_v34 = vmul.f32 0.70710677, %v4672_v9  ;;  %v1567_v50 = vpop.f32.mrb[29].mxu0  ;;  %v1586_v26 = vmul.f32 0.5, %v4672_v9  ;;  %v5182_v9 = vld [vmem:[%s6576_s0 + $0x90] sm:$0xff]  }
 0x4f0   :  { %v1587_v13 = vmul.f32 0.70710677, %v1567_v50  ;;  %v4673_v15 = vpop.f32.mrb[30].mxu0  ;;  %v1584_v57 = vmul.f32 0.5, %v1567_v50  ;;  %v5184_v50 = vld [vmem:[%s6584_s9 + $0x10] sm:$0xff]  }
 0x4f1   :  { %5292 = verf.f32 %v1589_v34  ;;  %v1570_v36 = vpop.f32.mrb[31].mxu0  ;;  %v5183_v34 = vld [vmem:[%s6576_s0 + $0x98] sm:$0xff]  }
 0x4f2   :  { %5294 = verf.f32 %v1587_v13  ;;  %v1588_v12 = vmul.f32 0.70710677, %v1570_v36  ;;  %v1585_v11 = vmul.f32 0.5, %v1570_v36  ;;  %v5185_v13 = vld [vmem:[%s6584_s9 + $0x18] sm:$0xff]  }
 0x4f4   :  { %5296 = verf.f32 %v1588_v12 }
 0x4fb   :  { %v5293_v54 = vpop.eup %5292 }
 0x4fc   :  { %v5295_v14 = vpop.eup %5294  ;;  %v1595_v32 = vadd.f32 1.0, %v5293_v54 }
 0x4fd   :  { %v1593_v24 = vadd.f32 1.0, %v5295_v14 }
 0x4fe   :  { %v5297_v30 = vpop.eup %5296  ;;  %v1598_v37 = vmul.f32 %v1595_v32, %v1586_v26 }
 0x4ff   :  { %v1596_v60 = vmul.f32 %v1593_v24, %v1584_v57  ;;  %v1594_v21 = vadd.f32 1.0, %v5297_v30 }
 0x500   :  { %1602 = vst.msk [vmem:[#allocation2 + $0x10] sm:$0x7] %vm1601_vm5, %v1598_v37 }
 0x501   :  { %1599 = vst.msk [vmem:[#allocation2] sm:$0xff] %vm263_vm2, %v1596_v60  ;;  %v1597_v19 = vmul.f32 %v1594_v21, %v1585_v11 }
 0x503   :  { %1600 = vst.msk [vmem:[#allocation2 + $0x8] sm:$0xff] %vm263_vm2, %v1597_v19 }
 0x507   :  { %v1611_v38 = vld [vmem:[#allocation2 + $0x11] ss:$2 sm:$0x1]  ;;  %v1604_v18 = vld [vmem:[#allocation2 + $0x10] ss:$2 sm:$0x1] }
 0x508   :  { %v1731_v41 = vld [vmem:[#allocation2 + $0x12] ss:$2 sm:$0x1] }
 0x50a   :  { %v1610_v63 = vld [vmem:[#allocation2 + $0x1] ss:$2 sm:$0xff]  ;;  %v1603_v17 = vld [vmem:[#allocation2] ss:$2 sm:$0xff] }
 0x50b   :  { %v1612_v16 = vpack.c.bf16 %v1611_v38, %v1610_v63  ;;  %v1605_v5 = vpack.c.bf16 %v1604_v18, %v1603_v17  ;;  %v1730_v27 = vld [vmem:[#allocation2 + $0x2] ss:$2 sm:$0xff] }
 0x50c   :  { %v1732_v22 = vpack.c.bf16 %v1731_v41, %v1730_v27 }
 0x50d   :  { %4679 = vmatmul.mubr.msk.bf16.vlgmr.msra.gmra.mrb[24].mxu1 %vm263_vm2, %v1612_v16 }
 0x50e   :  { %4683 = vmatpush3.bf16.msra.mxu1 %v5166_v23  ;;  %4686 = vmatprep.mubr.msk.bf16.mxu1 %vm5396_vm4, %v5395_v52 }
 0x50f   :  { %4684 = vmatprep.subr.bf16.mxu1 %v5395_v52 }
 0x512   :  { %4685 = vmatpush3.bf16.msra.mxu1 %v5167_v3 }
 0x513   :  { %4690 = vmatprep.subr.bf16.mxu1 %v5395_v52 }
 0x519   :  { %4687 = vmatmul.mubr.msk.bf16.vlgmr.msra.gmra.mrb[24].mxu1 %vm263_vm2, %v1605_v5 }
 0x51a   :  { %4691 = vmatpush3.bf16.msra.mxu1 %v5168_v39  ;;  %4694 = vmatprep.mubr.msk.bf16.mxu1 %vm5396_vm4, %v5395_v52 }
 0x51b   :  { %4692 = vmatprep.subr.bf16.mxu1 %v5395_v52 }
 0x51e   :  { %4693 = vmatpush3.bf16.msra.mxu1 %v5169_v40 }
 0x51f   :  { %4714 = vmatprep.subr.bf16.mxu1 %v5395_v52 }
 0x525   :  { %4695 = vmatmul.mubr.msk.bf16.vlgmr.msra.gmra.mrb[24].mxu1 %vm263_vm2, %v1732_v22 }
 0x526   :  { %4718 = vmatprep.mubr.msk.bf16.mxu1 %vm5396_vm4, %v5395_v52  ;;  %4715 = vmatpush3.bf16.msra.mxu1 %v5184_v50 }
 0x527   :  { %4716 = vmatprep.subr.bf16.mxu1 %v5395_v52 }
 0x52a   :  { %4717 = vmatpush3.bf16.msra.mxu1 %v5185_v13 }
 0x52b   :  { %4722 = vmatprep.subr.bf16.mxu1 %v5395_v52 }
 0x5f8   :  { %v1787_v7 = vpop.f32.mrb[24].mxu1 }
 0x5f9   :  { %v1798_v28 = vmul.f32 0.70710677, %v1787_v7  ;;  %v4696_v25 = vpop.f32.mrb[25].mxu1  ;;  %v1796_v45 = vmul.f32 0.5, %v1787_v7 }
 0x5fa   :  { %v1790_v43 = vpop.f32.mrb[26].mxu1 }
 0x5fb   :  { %5298 = verf.f32 %v1798_v28  ;;  %v1799_v8 = vmul.f32 0.70710677, %v1790_v43  ;;  %v4697_v10 = vpop.f32.mrb[27].mxu1  ;;  %v1797_v49 = vmul.f32 0.5, %v1790_v43 }
 0x5fc   :  { %v5186_v10 = vld [vmem:[%s6584_s9] sm:$0xff]  }
 0x5fd   :  { %5300 = verf.f32 %v1799_v8 }
 0x605   :  { %v5299_v44 = vpop.eup %5298 }
 0x606   :  { %v1802_v33 = vadd.f32 1.0, %v5299_v44 }
 0x607   :  { %v5301_v46 = vpop.eup %5300 }
 0x608   :  { %v1804_v48 = vmul.f32 %v1802_v33, %v1796_v45  ;;  %v1803_v35 = vadd.f32 1.0, %v5301_v46 }
 0x60a   :  { %1806 = vst.msk [vmem:[#allocation2] sm:$0xff] %vm263_vm2, %v1804_v48  ;;  %v1805_v51 = vmul.f32 %v1803_v35, %v1797_v49 }
 0x60c   :  { %1808 = vst.msk [vmem:[#allocation2 + $0x8] sm:$0x1] %vm1807_vm6, %v1805_v51  ;;  %v5187_v51 = vld [vmem:[%s6584_s9 + $0x8] sm:$0xff]  }
 0x611   :  { %v1815_v53 = vld [vmem:[#allocation2 + $0x1] ss:$2 sm:$0xf]  ;;  %v1809_v59 = vld [vmem:[#allocation2] ss:$2 sm:$0xf] }
 0x612   :  { %v1816_v56 = vpack.c.bf16 %v1815_v53, %v1815_v53  ;;  %v1810_v62 = vpack.c.bf16 %v1809_v59, %v1809_v59 }
 0x614   :  { %4703 = vmatmul.mubr.msk.bf16.vlgmr.msra.gmra.mrb[32].mxu0 %vm263_vm2, %v1816_v56 }
 0x615   :  { %4707 = vmatpush3.bf16.msra.mxu0 %v5172_v55  ;;  %4710 = vmatprep.mubr.msk.bf16.mxu0 %vm5396_vm4, %v5395_v52 }
 0x616   :  { %4708 = vmatprep.subr.bf16.mxu0 %v5395_v52 }
 0x619   :  { %4709 = vmatpush3.bf16.msra.mxu0 %v5173_v20 }
 0x61a   :  { %5132 = vmatprep.subr.msk.bf16.mxu0 %vm146_vm0, %v5392_v58 }
 0x620   :  { %4711 = vmatmul.mubr.msk.bf16.vlgmr.msra.gmra.mrb[32].mxu0 %vm263_vm2, %v1810_v62 }
 0x621   :  { %4731 = vmatpush3.bf16.msra.mxu0 %v5460_v2  ;;  %4732 = vmatprep.mubr.msk.bf16.mxu0 %vm115_vm1, %v5174_v61  ;;  %v5177_v2 = vld [vmem:[%s6576_s0 + $0x68] sm:$0xff]  }
 0x622   :  { %4824 = vmatprep.subr.bf16.mxu0 %v5395_v52 }
 0x628   :  { %4733 = vmatmul.mubr.msk.bf16.vlgmr.msra.gmra.mrb[36].mxu0 %vm115_vm1, %v5175_v42 }
 0x629   :  { %4736 = vmatprep.mubr.msk.bf16.mxu0 %vm115_vm1, %v5176_v0 }
 0x630   :  { %4737 = vmatmul.mubr.msk.bf16.gmra.mrb[40].mxu0 %vm115_vm1, %v5177_v2 }
 0x631   :  { %4740 = vmatprep.mubr.msk.bf16.mxu0 %vm115_vm1, %v5178_v1 }
 0x638   :  { %4741 = vmatmul.mubr.msk.bf16.gmra.mrb[44].mxu0 %vm115_vm1, %v5179_v4 }
 0x639   :  { %4744 = vmatprep.mubr.msk.bf16.mxu0 %vm115_vm1, %v5180_v47 }
 0x640   :  { %4745 = vmatmul.mubr.msk.bf16.gmra.mrb[48].mxu0 %vm115_vm1, %v5181_v6 }
 0x641   :  { %4748 = vmatprep.mubr.msk.bf16.mxu0 %vm115_vm1, %v5182_v9 }
 0x648   :  { %4749 = vmatmul.mubr.msk.bf16.gmra.mrb[52].mxu0 %vm115_vm1, %v5183_v34 }
 0x649   :  { %4828 = vmatprep.mubr.msk.bf16.mxu0 %vm5396_vm4, %v5395_v52 }
 0x6f3   :  { %v1926_v15 = vpop.f32.mrb[32].mxu0 }
 0x6f4   :  { %v1933_v36 = vmul.f32 0.70710677, %v1926_v15  ;;  %v4712_v12 = vpop.f32.mrb[33].mxu0  ;;  %v1932_v21 = vmul.f32 0.5, %v1926_v15 }
 0x6f5   :  { %v1929_v54 = vpop.f32.mrb[34].mxu0 }
 0x6f6   :  { %5302 = verf.f32 %v1933_v36  ;;  %v4713_v14 = vpop.f32.mrb[35].mxu0 }
 0x6fb   :  { %v6042_v26 = vpop.f32.mrb[36].mxu0 }
 0x6fc   :  { %v6044_v32 = vpop.f32.mrb[37].mxu0  ;;  %v2286_v63 = vsel %vm263_vm2, %v6042_v26, 0.0 }
 0x6fd   :  { %v6046_v57 = vpop.f32.mrb[38].mxu0  ;;  %v2283_v30 = vsel %vm263_vm2, %v6044_v32, 0.0 }
 0x6fe   :  { %v6048_v24 = vpop.f32.mrb[39].mxu0  ;;  %v2288_v16 = vsel %vm263_vm2, %v6046_v57, 0.0 }
 0x6ff   :  { %v2284_v37 = vsel %vm263_vm2, %v6048_v24, 0.0 }
 0x700   :  { %v5303_v60 = vpop.eup %5302  ;;  %v2285_v11 = vadd.f32 %v2284_v37, %v2283_v30 }
 0x701   :  { %v1935_v19 = vadd.f32 1.0, %v5303_v60 }
 0x702   :  { %v2287_v38 = vadd.f32 %v2286_v63, %v2285_v11 }
 0x703   :  { %v1936_v23 = vmul.f32 %v1935_v19, %v1932_v21  ;;  %v6058_v3 = vpop.f32.mrb[40].mxu0 }
 0x704   :  { %v6060_v17 = vpop.f32.mrb[41].mxu0  ;;  %v2289_v18 = vadd.f32 %v2288_v16, %v2287_v38  ;;  %v2294_v31 = vsel %vm263_vm2, %v6058_v3, 0.0 }
 0x705   :  { %v2290_v39 = vsel %vm263_vm2, %v6060_v17, 0.0  ;;  %v6064_v5 = vpop.f32.mrb[42].mxu0  ;;  %1938 = vst.msk [vmem:[#allocation2] sm:$0xf] %vm1937_vm7, %v1936_v23 }
 0x706   :  { %v2291_v40 = vadd.f32 %v2290_v39, %v2289_v18  ;;  %v6067_v27 = vpop.f32.mrb[43].mxu0  ;;  %v2296_v7 = vsel %vm263_vm2, %v6064_v5, 0.0 }
 0x707   :  { %v2292_v41 = vsel %vm263_vm2, %v6067_v27, 0.0 }
 0x708   :  { %v2293_v22 = vadd.f32 %v2292_v41, %v2291_v40 }
 0x70a   :  { %v2295_v29 = vadd.f32 %v2294_v31, %v2293_v22 }
 0x70b   :  { %v6075_v28 = vpop.f32.mrb[44].mxu0 }
 0x70c   :  { %v6077_v25 = vpop.f32.mrb[45].mxu0  ;;  %v2297_v43 = vadd.f32 %v2296_v7, %v2295_v29  ;;  %v1945_v8 = vld [vmem:[#allocation2 + $0x1] ss:$2 sm:$0x3]  ;;  %v2302_v53 = vsel %vm263_vm2, %v6075_v28, 0.0 }
 0x70d   :  { %v2298_v44 = vsel %vm263_vm2, %v6077_v25, 0.0  ;;  %v6084_v45 = vpop.f32.mrb[46].mxu0  ;;  %v1946_v33 = vpack.c.bf16 %v1945_v8, %v1945_v8  ;;  %v1939_v2 = vld [vmem:[#allocation2] ss:$2 sm:$0x3] }
 0x70e   :  { %v2299_v46 = vadd.f32 %v2298_v44, %v2297_v43  ;;  %v2239_v48 = vpop.f32.mrb[47].mxu0  ;;  %v2304_v56 = vsel %vm263_vm2, %v6084_v45, 0.0  ;;  %v1940_v6 = vpack.c.bf16 %v1939_v2, %v1939_v2 }
 0x70f   :  { %v2300_v49 = vsel %vm263_vm2, %v2239_v48, 0.0  ;;  %4719 = vmatmul.mubr.msk.bf16.vlgmr.msra.gmra.mrb[28].mxu1 %vm263_vm2, %v1946_v33 }
 0x710   :  { %v2301_v35 = vadd.f32 %v2300_v49, %v2299_v46  ;;  %4723 = vmatpush3.bf16.msra.mxu1 %v5186_v10  ;;  %4726 = vmatprep.mubr.msk.bf16.mxu1 %vm5396_vm4, %v5395_v52  ;;  %v5189_v49 = vld [vmem:[%s6577_s4 + $0x18] sm:$0xff]  }
 0x711   :  { %4724 = vmatprep.subr.bf16.mxu1 %v5395_v52 }
 0x712   :  { %v2303_v55 = vadd.f32 %v2302_v53, %v2301_v35 }
 0x713   :  { %v4746_v20 = vpop.f32.mrb[48].mxu0 }
 0x714   :  { %v2252_v58 = vpop.f32.mrb[49].mxu0  ;;  %v2305_v59 = vadd.f32 %v2304_v56, %v2303_v55  ;;  %4725 = vmatpush3.bf16.msra.mxu1 %v5187_v51  ;;  %v2310_v47 = vsel %vm263_vm2, %v4746_v20, 0.0 }
 0x715   :  { %v2306_v61 = vsel %vm263_vm2, %v2252_v58, 0.0  ;;  %v4747_v62 = vpop.f32.mrb[50].mxu0  ;;  %4752 = vmatprep.subr.bf16.mxu1 %v5395_v52 }
 0x716   :  { %v2307_v42 = vadd.f32 %v2306_v61, %v2305_v59  ;;  %v2255_v0 = vpop.f32.mrb[51].mxu0  ;;  %v2312_v34 = vsel %vm263_vm2, %v4747_v62, 0.0 }
 0x717   :  { %v2308_v1 = vsel %vm263_vm2, %v2255_v0, 0.0 }
 0x718   :  { %v2309_v4 = vadd.f32 %v2308_v1, %v2307_v42 }
 0x71a   :  { %v2311_v9 = vadd.f32 %v2310_v47, %v2309_v4 }
 0x71b   :  { %4727 = vmatmul.mubr.msk.bf16.vlgmr.msra.gmra.mrb[28].mxu1 %vm263_vm2, %v1940_v6  ;;  %v4750_v50 = vpop.f32.mrb[52].mxu0 }
 0x71c   :  { %v2268_v13 = vpop.f32.mrb[53].mxu0  ;;  %v2313_v15 = vadd.f32 %v2312_v34, %v2311_v9  ;;  %4756 = vmatprep.mubr.msk.bf16.mxu1 %vm5396_vm4, %v5395_v52  ;;  %v2318_v60 = vsel %vm263_vm2, %v4750_v50, 0.0 }
 0x71d   :  { %v2314_v36 = vsel %vm263_vm2, %v2268_v13, 0.0  ;;  %v4751_v12 = vpop.f32.mrb[54].mxu0 }
 0x71e   :  { %v2315_v54 = vadd.f32 %v2314_v36, %v2313_v15  ;;  %v2271_v14 = vpop.f32.mrb[55].mxu0  ;;  %v2320_v21 = vsel %vm301_vm3, %v4751_v12, 0.0 }
 0x71f   :  { %v2316_v30 = vsel %vm263_vm2, %v2271_v14, 0.0 }
 0x720   :  { %v2317_v37 = vadd.f32 %v2316_v30, %v2315_v54 }
 0x722   :  { %v2319_v11 = vadd.f32 %v2318_v60, %v2317_v37 }
 0x724   :  { %v2321_v19 = vadd.f32 %v2320_v21, %v2319_v11 }
 0x726   :  { %v2322_v63 = vrot.slane %v2321_v19, 4 }
 0x728   :  { %v2323_v38 = vadd.f32 %v2322_v63, %v2321_v19 }
 0x72a   :  { %v2324_v23 = vrot.slane %v2323_v38, 2 }
 0x72c   :  { %v2325_v16 = vadd.f32 %v2324_v23, %v2323_v38 }
 0x72e   :  { %v2326_v18 = vrot.slane %v2325_v16, 1 }
 0x730   :  { %v2327_v39 = vadd.f32 %v2326_v18, %v2325_v16 }
 0x732   :  { %v2328_v40 = vmul.f32 0.006289308, %v2327_v39 }
 0x734   :  { %v6111_v41 = vsub.f32 %v6044_v32, %v2328_v40  ;;  %v6114_v22 = vsub.f32 %v6048_v24, %v2328_v40  ;;  %v6117_v31 = vsub.f32 %v6042_v26, %v2328_v40  ;;  %v6120_v29 = vsub.f32 %v6046_v57, %v2328_v40 }
 0x735   :  { %v6123_v7 = vsub.f32 %v6060_v17, %v2328_v40  ;;  %v6126_v43 = vsub.f32 %v6067_v27, %v2328_v40  ;;  %v6129_v8 = vsub.f32 %v6058_v3, %v2328_v40  ;;  %v6132_v32 = vsub.f32 %v6064_v5, %v2328_v40 }
 0x736   :  { %v6135_v24 = vsub.f32 %v6077_v25, %v2328_v40  ;;  %v6137_v26 = vsub.f32 %v2239_v48, %v2328_v40  ;;  %v6140_v57 = vsub.f32 %v6075_v28, %v2328_v40  ;;  %v6143_v17 = vsub.f32 %v6084_v45, %v2328_v40  ;;  %v5188_v28 = vld [vmem:[%s6577_s4 + $0x10] sm:$0xff]  }
 0x737   :  { %v6145_v10 = vsub.f32 %v2252_v58, %v2328_v40  ;;  %v6147_v27 = vsub.f32 %v2255_v0, %v2328_v40  ;;  %v6149_v3 = vsub.f32 %v4746_v20, %v2328_v40  ;;  %v6151_v44 = vsub.f32 %v4747_v62, %v2328_v40  ;;  %4753 = vmatpush3.bf16.msra.mxu1 %v5188_v28 }
 0x738   :  { %v6153_v5 = vsub.f32 %v2268_v13, %v2328_v40  ;;  %v6155_v25 = vsub.f32 %v2271_v14, %v2328_v40  ;;  %v6157_v33 = vsub.f32 %v4750_v50, %v2328_v40  ;;  %v6159_v46 = vsub.f32 %v4751_v12, %v2328_v40  ;;  %4754 = vmatprep.subr.bf16.mxu1 %v5395_v52 }
 0x739   :  { %v2349_v45 = vmul.f32 %v6111_v41, %v6111_v41  ;;  %v2350_v48 = vmul.f32 %v6114_v22, %v6114_v22  ;;  %v2351_v35 = vmul.f32 %v6117_v31, %v6117_v31  ;;  %v2352_v51 = vmul.f32 %v6120_v29, %v6120_v29 }
 0x73a   :  { %v2353_v20 = vmul.f32 %v6123_v7, %v6123_v7  ;;  %v2354_v61 = vmul.f32 %v6126_v43, %v6126_v43  ;;  %v2355_v0 = vmul.f32 %v6129_v8, %v6129_v8  ;;  %v2356_v4 = vmul.f32 %v6132_v32, %v6132_v32 }
 0x73b   :  { %v2369_v53 = vsel %vm263_vm2, %v2349_v45, 0.0  ;;  %v2370_v55 = vsel %vm263_vm2, %v2350_v48, 0.0  ;;  %4755 = vmatpush3.bf16.msra.mxu1 %v5189_v49  ;;  %v2372_v58 = vsel %vm263_vm2, %v2351_v35, 0.0  ;;  %v2374_v62 = vsel %vm263_vm2, %v2352_v51, 0.0 }
 0x73c   :  { %v2371_v56 = vadd.f32 %v2370_v55, %v2369_v53  ;;  %4776 = vmatprep.subr.bf16.mxu1 %v5395_v52  ;;  %v2376_v2 = vsel %vm263_vm2, %v2353_v20, 0.0  ;;  %v2378_v47 = vsel %vm263_vm2, %v2354_v61, 0.0  ;;  %v2357_v9 = vmul.f32 %v6135_v24, %v6135_v24 }
 0x73d   :  { %v2380_v34 = vsel %vm263_vm2, %v2355_v0, 0.0  ;;  %v2358_v13 = vmul.f32 %v6137_v26, %v6137_v26  ;;  %v2382_v15 = vsel %vm263_vm2, %v2356_v4, 0.0  ;;  %v2359_v12 = vmul.f32 %v6140_v57, %v6140_v57 }
 0x73e   :  { %v2373_v59 = vadd.f32 %v2372_v58, %v2371_v56  ;;  %v2384_v54 = vsel %vm263_vm2, %v2357_v9, 0.0  ;;  %v2360_v30 = vmul.f32 %v6143_v17, %v6143_v17  ;;  %v2361_v11 = vmul.f32 %v6145_v10, %v6145_v10 }
 0x73f   :  { %v2386_v37 = vsel %vm263_vm2, %v2358_v13, 0.0  ;;  %v2388_v21 = vsel %vm263_vm2, %v2359_v12, 0.0  ;;  %v2362_v63 = vmul.f32 %v6147_v27, %v6147_v27  ;;  %v2363_v16 = vmul.f32 %v6149_v3, %v6149_v3 }
 0x740   :  { %v2375_v42 = vadd.f32 %v2374_v62, %v2373_v59  ;;  %v2390_v38 = vsel %vm263_vm2, %v2360_v30, 0.0  ;;  %v2392_v18 = vsel %vm263_vm2, %v2361_v11, 0.0  ;;  %v2364_v40 = vmul.f32 %v6151_v44, %v6151_v44 }
 0x741   :  { %v2394_v28 = vsel %vm263_vm2, %v2362_v63, 0.0  ;;  %v2365_v48 = vmul.f32 %v6153_v5, %v6153_v5  ;;  %v2396_v49 = vsel %vm263_vm2, %v2363_v16, 0.0  ;;  %v2366_v51 = vmul.f32 %v6155_v25, %v6155_v25 }
 0x742   :  { %v2377_v1 = vadd.f32 %v2376_v2, %v2375_v42  ;;  %v2398_v53 = vsel %vm263_vm2, %v2364_v40, 0.0  ;;  %v2367_v56 = vmul.f32 %v6157_v33, %v6157_v33  ;;  %v2368_v59 = vmul.f32 %v6159_v46, %v6159_v46 }
 0x743   :  { %v2400_v20 = vsel %vm263_vm2, %v2365_v48, 0.0  ;;  %v2402_v61 = vsel %vm263_vm2, %v2366_v51, 0.0 }
 0x744   :  { %v2379_v6 = vadd.f32 %v2378_v47, %v2377_v1  ;;  %v2404_v42 = vsel %vm263_vm2, %v2367_v56, 0.0  ;;  %v2406_v2 = vsel %vm301_vm3, %v2368_v59, 0.0 }
 0x746   :  { %v2381_v50 = vadd.f32 %v2380_v34, %v2379_v6 }
 0x748   :  { %v2383_v36 = vadd.f32 %v2382_v15, %v2381_v50 }
 0x74a   :  { %v2385_v14 = vadd.f32 %v2384_v54, %v2383_v36 }
 0x74c   :  { %v2387_v60 = vadd.f32 %v2386_v37, %v2385_v14 }
 0x74e   :  { %v2389_v19 = vadd.f32 %v2388_v21, %v2387_v60 }
 0x750   :  { %v2391_v23 = vadd.f32 %v2390_v38, %v2389_v19 }
 0x752   :  { %v2393_v39 = vadd.f32 %v2392_v18, %v2391_v23 }
 0x754   :  { %v2395_v45 = vadd.f32 %v2394_v28, %v2393_v39 }
 0x756   :  { %v2397_v35 = vadd.f32 %v2396_v49, %v2395_v45 }
 0x758   :  { %v2399_v55 = vadd.f32 %v2398_v53, %v2397_v35 }
 0x75a   :  { %v2401_v58 = vadd.f32 %v2400_v20, %v2399_v55 }
 0x75c   :  { %v2403_v62 = vadd.f32 %v2402_v61, %v2401_v58 }
 0x75e   :  { %v2405_v0 = vadd.f32 %v2404_v42, %v2403_v62 }
 0x760   :  { %v2407_v1 = vadd.f32 %v2406_v2, %v2405_v0 }
 0x762   :  { %v2408_v4 = vrot.slane %v2407_v1, 4 }
 0x764   :  { %v2409_v47 = vadd.f32 %v2408_v4, %v2407_v1 }
 0x766   :  { %v2410_v6 = vrot.slane %v2409_v47, 2 }
 0x768   :  { %v2411_v9 = vadd.f32 %v2410_v6, %v2409_v47 }
 0x76a   :  { %v2412_v34 = vrot.slane %v2411_v9, 1 }
 0x76c   :  { %v2413_v50 = vadd.f32 %v2412_v34, %v2411_v9 }
 0x76e   :  { %v2414_v13 = vmul.f32 0.006289308, %v2413_v50 }
 0x770   :  { %v2415_v15 = vadd.f32 1e-05, %v2414_v13 }
 0x772   :  { %5304 = vrsqrt.f32 %v2415_v15 }
 0x77c   :  { %v5305_v36 = vpop.eup %5304 }
 0x77d   :  { %v2423_v12 = vmul.f32 %v5305_v36, %v6129_v8  ;;  %v2424_v54 = vmul.f32 %v5305_v36, %v6132_v32  ;;  %v2425_v14 = vmul.f32 %v5305_v36, %v6135_v24  ;;  %v2426_v30 = vmul.f32 %v5305_v36, %v6137_v26 }
 0x77e   :  { %v2427_v37 = vmul.f32 %v5305_v36, %v6140_v57  ;;  %v2428_v60 = vmul.f32 %v5305_v36, %v6143_v17  ;;  %v2429_v11 = vmul.f32 %v5305_v36, %v6145_v10  ;;  %v2430_v21 = vmul.f32 %v5305_v36, %v6147_v27 }
 0x77f   :  { %v2431_v19 = vmul.f32 %v5305_v36, %v6149_v3  ;;  %v2432_v63 = vmul.f32 %v5305_v36, %v6151_v44  ;;  %v2433_v8 = vmul.f32 %v5305_v36, %v6153_v5  ;;  %v2434_v32 = vmul.f32 %v5305_v36, %v6155_v25  ;;  %v5393_v5 = vld [vmem:[%s6578_s2] ss:$0 sm:$0xff] }
 0x780   :  { %v2435_v24 = vmul.f32 %v5305_v36, %v6157_v33  ;;  %v2436_v26 = vmul.f32 %v5305_v36, %v6159_v46  ;;  %v2417_v57 = vmul.f32 %v5305_v36, %v6111_v41  ;;  %v2418_v17 = vmul.f32 %v5305_v36, %v6114_v22  ;;  %v5394_v22 = vld [vmem:[%s6579_s3] ss:$0 sm:$0xff] }
 0x781   :  { %v2419_v10 = vmul.f32 %v5305_v36, %v6117_v31  ;;  %v2420_v27 = vmul.f32 %v5305_v36, %v6120_v29  ;;  %v2421_v3 = vmul.f32 %v5305_v36, %v6123_v7  ;;  %v2422_v44 = vmul.f32 %v5305_v36, %v6126_v43 }
 0x782   :  { %v2437_v25 = vmul.f32 %v5393_v5, %v2417_v57  ;;  %v2438_v33 = vmul.f32 %v5393_v5, %v2418_v17  ;;  %v2443_v16 = vmul.f32 %v5393_v5, %v2423_v12  ;;  %v2444_v18 = vmul.f32 %v5393_v5, %v2424_v54 }
 0x783   :  { %v2439_v38 = vmul.f32 %v5393_v5, %v2419_v10  ;;  %v2440_v46 = vmul.f32 %v5393_v5, %v2420_v27  ;;  %v2441_v23 = vmul.f32 %v5393_v5, %v2421_v3  ;;  %v2442_v41 = vmul.f32 %v5393_v5, %v2422_v44 }
 0x784   :  { %v2457_v31 = vadd.f32 %v5394_v22, %v2437_v25  ;;  %v2458_v29 = vadd.f32 %v5394_v22, %v2438_v33  ;;  %v2445_v39 = vmul.f32 %v5393_v5, %v2425_v14  ;;  %v2446_v28 = vmul.f32 %v5393_v5, %v2426_v30 }
 0x785   :  { %v2459_v7 = vadd.f32 %v5394_v22, %v2439_v38  ;;  %v2460_v43 = vadd.f32 %v5394_v22, %v2440_v46  ;;  %v2461_v40 = vadd.f32 %v5394_v22, %v2441_v23  ;;  %v2447_v45 = vmul.f32 %v5393_v5, %v2427_v37 }
 0x786   :  { %v2448_v48 = vmul.f32 %v5393_v5, %v2428_v60  ;;  %v6255_v49 = vadd.f32 %v5394_v22, %v2442_v41  ;;  %v6257_v35 = vadd.f32 %v5394_v22, %v2443_v16  ;;  %v2497_v51 = vmul.f32 0.70710677, %v2457_v31 }
 0x787   :  { %v2498_v53 = vmul.f32 0.70710677, %v2458_v29  ;;  %v2499_v55 = vmul.f32 0.70710677, %v2459_v7  ;;  %v2449_v56 = vmul.f32 %v5393_v5, %v2429_v11  ;;  %v2450_v20 = vmul.f32 %v5393_v5, %v2430_v21 }
 0x788   :  { %v6259_v58 = vadd.f32 %v5394_v22, %v2444_v18  ;;  %v2500_v59 = vmul.f32 0.70710677, %v2460_v43  ;;  %v2451_v61 = vmul.f32 %v5393_v5, %v2431_v19  ;;  %v6261_v62 = vadd.f32 %v5394_v22, %v2445_v39 }
 0x789   :  { %v2501_v42 = vmul.f32 0.70710677, %v2461_v40  ;;  %5306 = verf.f32 %v2497_v51  ;;  %v2452_v0 = vmul.f32 %v5393_v5, %v2432_v63  ;;  %v6263_v2 = vadd.f32 %v5394_v22, %v2446_v28 }
 0x78a   :  { %v2502_v1 = vmul.f32 0.70710677, %v6255_v49  ;;  %5308 = verf.f32 %v2498_v53  ;;  %v2453_v4 = vmul.f32 %v5393_v5, %v2433_v8  ;;  %v6266_v47 = vadd.f32 %v5394_v22, %v2447_v45 }
 0x78b   :  { %v2503_v6 = vmul.f32 0.70710677, %v6257_v35  ;;  %5310 = verf.f32 %v2499_v55  ;;  %v2454_v9 = vmul.f32 %v5393_v5, %v2434_v32  ;;  %v6269_v34 = vadd.f32 %v5394_v22, %v2448_v48 }
 0x78c   :  { %v2504_v50 = vmul.f32 0.70710677, %v6259_v58  ;;  %5312 = verf.f32 %v2500_v59  ;;  %v2455_v13 = vmul.f32 %v5393_v5, %v2435_v24  ;;  %v6272_v15 = vadd.f32 %v5394_v22, %v2449_v56 }
 0x78d   :  { %v2505_v36 = vmul.f32 0.70710677, %v6261_v62  ;;  %5314 = verf.f32 %v2501_v42  ;;  %v2456_v12 = vmul.f32 %v5393_v5, %v2436_v26  ;;  %v6275_v54 = vadd.f32 %v5394_v22, %v2450_v20 }
 0x78e   :  { %v2506_v14 = vmul.f32 0.70710677, %v6263_v2  ;;  %5316 = verf.f32 %v2502_v1  ;;  %v6278_v30 = vadd.f32 %v5394_v22, %v2451_v61  ;;  %v2507_v37 = vmul.f32 0.70710677, %v6266_v47 }
 0x78f   :  { %5318 = verf.f32 %v2503_v6  ;;  %v6281_v60 = vadd.f32 %v5394_v22, %v2452_v0  ;;  %v6283_v11 = vadd.f32 %v5394_v22, %v2453_v4  ;;  %v2508_v21 = vmul.f32 0.70710677, %v6269_v34 }
 0x790   :  { %5320 = verf.f32 %v2504_v50  ;;  %v6286_v19 = vadd.f32 %v5394_v22, %v2454_v9  ;;  %v6288_v63 = vadd.f32 %v5394_v22, %v2455_v13  ;;  %v2509_v8 = vmul.f32 0.70710677, %v6272_v15 }
 0x791   :  { %5322 = verf.f32 %v2505_v36  ;;  %v6291_v32 = vadd.f32 %v5394_v22, %v2456_v12  ;;  %v2477_v24 = vmul.f32 0.5, %v2457_v31  ;;  %v2510_v26 = vmul.f32 0.70710677, %v6275_v54 }
 0x792   :  { %5324 = verf.f32 %v2506_v14  ;;  %v2478_v17 = vmul.f32 0.5, %v2458_v29  ;;  %v2479_v10 = vmul.f32 0.5, %v2459_v7  ;;  %v2511_v27 = vmul.f32 0.70710677, %v6278_v30 }
 0x793   :  { %v5307_v57 = vpop.eup %5306  ;;  %5326 = verf.f32 %v2507_v37  ;;  %v2480_v44 = vmul.f32 0.5, %v2460_v43  ;;  %v2512_v5 = vmul.f32 0.70710677, %v6281_v60  ;;  %v2481_v38 = vmul.f32 0.5, %v2461_v40 }
 0x794   :  { %v5309_v3 = vpop.eup %5308  ;;  %5328 = verf.f32 %v2508_v21  ;;  %v2537_v25 = vadd.f32 1.0, %v5307_v57  ;;  %v2513_v46 = vmul.f32 0.70710677, %v6283_v11  ;;  %v2514_v16 = vmul.f32 0.70710677, %v6286_v19 }
 0x795   :  { %v5311_v33 = vpop.eup %5310  ;;  %5330 = verf.f32 %v2509_v8  ;;  %v2538_v23 = vadd.f32 1.0, %v5309_v3  ;;  %v2515_v7 = vmul.f32 0.70710677, %v6288_v63  ;;  %v2516_v28 = vmul.f32 0.70710677, %v6291_v32 }
 0x796   :  { %v5313_v41 = vpop.eup %5312  ;;  %5332 = verf.f32 %v2510_v26  ;;  %v2539_v22 = vadd.f32 1.0, %v5311_v33  ;;  %v2557_v31 = vmul.f32 %v2537_v25, %v2477_v24  ;;  %v2482_v51 = vmul.f32 0.5, %v6255_v49 }
 0x797   :  { %v5315_v29 = vpop.eup %5314  ;;  %5334 = verf.f32 %v2511_v27  ;;  %v2540_v18 = vadd.f32 1.0, %v5313_v41  ;;  %v2558_v43 = vmul.f32 %v2538_v23, %v2478_v17  ;;  %v2483_v20 = vmul.f32 0.5, %v6257_v35 }
 0x798   :  { %v5317_v39 = vpop.eup %5316  ;;  %5336 = verf.f32 %v2512_v5  ;;  %v2559_v40 = vmul.f32 %v2539_v22, %v2479_v10  ;;  %2577 = vst.msk [vmem:[#allocation2 + $0xa0] sm:$0xff] %vm263_vm2, %v2557_v31  ;;  %v2541_v45 = vadd.f32 1.0, %v5315_v29  ;;  %v2484_v0 = vmul.f32 0.5, %v6259_v58 }
 0x799   :  { %v5319_v48 = vpop.eup %5318  ;;  %5338 = verf.f32 %v2513_v46  ;;  %v2542_v53 = vadd.f32 1.0, %v5317_v39  ;;  %v2560_v55 = vmul.f32 %v2540_v18, %v2480_v44  ;;  %2578 = vst.msk [vmem:[#allocation2 + $0xa8] sm:$0xff] %vm263_vm2, %v2558_v43  ;;  %v2485_v6 = vmul.f32 0.5, %v6261_v62  ;;  %v5190_v46 = vld [vmem:[%s6577_s4] sm:$0xff]  }
 0x79a   :  { %v5321_v56 = vpop.eup %5320  ;;  %5340 = verf.f32 %v2514_v16  ;;  %v2543_v59 = vadd.f32 1.0, %v5319_v48  ;;  %2579 = vst.msk [vmem:[#allocation2 + $0xb0] sm:$0xff] %vm263_vm2, %v2559_v40  ;;  %v2561_v61 = vmul.f32 %v2541_v45, %v2481_v38  ;;  %v2486_v13 = vmul.f32 0.5, %v6263_v2 }
 0x79b   :  { %v5323_v42 = vpop.eup %5322  ;;  %5342 = verf.f32 %v2515_v7  ;;  %v2544_v1 = vadd.f32 1.0, %v5321_v56  ;;  %2580 = vst.msk [vmem:[#allocation2 + $0xb8] sm:$0xff] %vm263_vm2, %v2560_v55  ;;  %v2562_v49 = vmul.f32 %v2542_v53, %v2482_v51  ;;  %v2487_v14 = vmul.f32 0.5, %v6266_v47 }
 0x79c   :  { %v5325_v4 = vpop.eup %5324  ;;  %5344 = verf.f32 %v2516_v28  ;;  %v2545_v9 = vadd.f32 1.0, %v5323_v42  ;;  %v2563_v50 = vmul.f32 %v2543_v59, %v2483_v20  ;;  %2581 = vst.msk [vmem:[#allocation2 + $0xc0] sm:$0xff] %vm263_vm2, %v2561_v61  ;;  %v2488_v8 = vmul.f32 0.5, %v6269_v34 }
 0x79d   :  { %v5327_v35 = vpop.eup %5326  ;;  %v2546_v36 = vadd.f32 1.0, %v5325_v4  ;;  %v2564_v12 = vmul.f32 %v2544_v1, %v2484_v0  ;;  %2582 = vst.msk [vmem:[#allocation2 + $0xc8] sm:$0xff] %vm263_vm2, %v2562_v49  ;;  %v2489_v2 = vmul.f32 0.5, %v6272_v15  ;;  %v2490_v3 = vmul.f32 0.5, %v6275_v54 }
 0x79e   :  { %v5329_v58 = vpop.eup %5328  ;;  %v2547_v37 = vadd.f32 1.0, %v5327_v35  ;;  %v2565_v21 = vmul.f32 %v2545_v9, %v2485_v6  ;;  %2583 = vst.msk [vmem:[#allocation2 + $0xd0] sm:$0xff] %vm263_vm2, %v2563_v50  ;;  %v2491_v25 = vmul.f32 0.5, %v6278_v30  ;;  %v2492_v41 = vmul.f32 0.5, %v6281_v60 }
 0x79f   :  { %v5331_v62 = vpop.eup %5330  ;;  %v2548_v24 = vadd.f32 1.0, %v5329_v58  ;;  %v2566_v26 = vmul.f32 %v2546_v36, %v2486_v13  ;;  %2584 = vst.msk [vmem:[#allocation2 + $0xd8] sm:$0xff] %vm263_vm2, %v2564_v12  ;;  %v2493_v30 = vmul.f32 0.5, %v6283_v11  ;;  %v2494_v43 = vmul.f32 0.5, %v6286_v19  ;;  %v5191_v11 = vld [vmem:[%s6577_s4 + $0x8] sm:$0xff]   ;;  %v5192_v13 = vld [vmem:[%s6577_s4 + $0x20] sm:$0xff]  }
 0x7a0   :  { %v5333_v57 = vpop.eup %5332  ;;  %v2549_v17 = vadd.f32 1.0, %v5331_v62  ;;  %v2567_v10 = vmul.f32 %v2547_v37, %v2487_v14  ;;  %2585 = vst.msk [vmem:[#allocation2 + $0xe0] sm:$0xff] %vm263_vm2, %v2565_v21  ;;  %v2627_v27 = vld [vmem:[#allocation2 + $0xa1] ss:$2 sm:$0xff]  ;;  %v2495_v40 = vmul.f32 0.5, %v6288_v63  ;;  %v2496_v19 = vmul.f32 0.5, %v6291_v32 }
 0x7a1   :  { %v5335_v47 = vpop.eup %5334  ;;  %v2550_v44 = vadd.f32 1.0, %v5333_v57  ;;  %v2568_v5 = vmul.f32 %v2548_v24, %v2488_v8  ;;  %2586 = vst.msk [vmem:[#allocation2 + $0xe8] sm:$0xff] %vm263_vm2, %v2566_v26  ;;  %v2598_v50 = vld [vmem:[#allocation2 + $0xa0] ss:$2 sm:$0xff] }
 0x7a2   :  { %v5337_v34 = vpop.eup %5336  ;;  %v2551_v33 = vadd.f32 1.0, %v5335_v47  ;;  %v2569_v38 = vmul.f32 %v2549_v17, %v2489_v2  ;;  %2587 = vst.msk [vmem:[#allocation2 + $0xf0] sm:$0xff] %vm263_vm2, %v2567_v10  ;;  %v2629_v15 = vld [vmem:[#allocation2 + $0xb1] ss:$2 sm:$0xff]  ;;  %v2600_v35 = vld [vmem:[#allocation2 + $0xb0] ss:$2 sm:$0xff] }
 0x7a3   :  { %v5339_v23 = vpop.eup %5338  ;;  %v2552_v54 = vadd.f32 1.0, %v5337_v34  ;;  %v2570_v16 = vmul.f32 %v2550_v44, %v2490_v3  ;;  %2588 = vst.msk [vmem:[#allocation2 + $0xf8] sm:$0xff] %vm263_vm2, %v2568_v5  ;;  %v2646_v22 = vpack.c.bf16 %v2629_v15, %v2627_v27  ;;  %v2617_v36 = vpack.c.bf16 %v2600_v35, %v2598_v50  ;;  %v5193_v12 = vld [vmem:[%s6577_s4 + $0x28] sm:$0xff]   ;;  %v2858_v15 = vld [vmem:[#allocation2 + $0xb2] ss:$2 sm:$0xff] }
 0x7a4   :  { %v5341_v31 = vpop.eup %5340  ;;  %v2553_v29 = vadd.f32 1.0, %v5339_v23  ;;  %v2571_v7 = vmul.f32 %v2551_v33, %v2491_v25  ;;  %2589 = vst.msk [vmem:[#allocation2 + $0x100] sm:$0xff] %vm263_vm2, %v2569_v38  ;;  %v2631_v55 = vld [vmem:[#allocation2 + $0xc1] ss:$2 sm:$0xff]  ;;  %v2602_v58 = vld [vmem:[#allocation2 + $0xc0] ss:$2 sm:$0xff] }
 0x7a5   :  { %v5343_v18 = vpop.eup %5342  ;;  %v2554_v39 = vadd.f32 1.0, %v5341_v31  ;;  %v2572_v28 = vmul.f32 %v2552_v54, %v2492_v41  ;;  %2590 = vst.msk [vmem:[#allocation2 + $0x108] sm:$0xff] %vm263_vm2, %v2570_v16  ;;  %4757 = vmatmul.mubr.msk.bf16.vlgmr.msra.gmra.mrb[32].mxu1 %vm263_vm2, %v2646_v22  ;;  %v2856_v38 = vld [vmem:[#allocation2 + $0xa2] ss:$2 sm:$0xff] }
 0x7a6   :  { %v5345_v60 = vpop.eup %5344  ;;  %v2555_v45 = vadd.f32 1.0, %v5343_v18  ;;  %v2573_v48 = vmul.f32 %v2553_v29, %v2493_v30  ;;  %2591 = vst.msk [vmem:[#allocation2 + $0x110] sm:$0xff] %vm263_vm2, %v2571_v7  ;;  %4777 = vmatpush3.bf16.msra.mxu1 %v5190_v46  ;;  %4760 = vmatprep.mubr.msk.bf16.mxu1 %vm5396_vm4, %v5395_v52  ;;  %v2633_v56 = vld [vmem:[#allocation2 + $0xd1] ss:$2 sm:$0xff]  ;;  %v2604_v14 = vld [vmem:[#allocation2 + $0xd0] ss:$2 sm:$0xff]  ;;  %v2875_v23 = vpack.c.bf16 %v2858_v15, %v2856_v38 }
 0x7a7   :  { %v2556_v51 = vadd.f32 1.0, %v5345_v60  ;;  %v2574_v53 = vmul.f32 %v2554_v39, %v2494_v43  ;;  %2592 = vst.msk [vmem:[#allocation2 + $0x118] sm:$0xff] %vm263_vm2, %v2572_v28  ;;  %4778 = vmatprep.subr.bf16.mxu1 %v5395_v52  ;;  %v2647_v32 = vpack.c.bf16 %v2633_v56, %v2631_v55  ;;  %v2618_v37 = vpack.c.bf16 %v2604_v14, %v2602_v58  ;;  %v2860_v41 = vld [vmem:[#allocation2 + $0xc2] ss:$2 sm:$0xff]  ;;  %v2862_v54 = vld [vmem:[#allocation2 + $0xd2] ss:$2 sm:$0xff] }
 0x7a8   :  { %v2575_v63 = vmul.f32 %v2555_v45, %v2495_v40  ;;  %2593 = vst.msk [vmem:[#allocation2 + $0x120] sm:$0xff] %vm263_vm2, %v2573_v48  ;;  %v2635_v59 = vld [vmem:[#allocation2 + $0xe1] ss:$2 sm:$0xff]  ;;  %v2606_v21 = vld [vmem:[#allocation2 + $0xe0] ss:$2 sm:$0xff]  ;;  %v2876_v16 = vpack.c.bf16 %v2862_v54, %v2860_v41  ;;  %v5194_v60 = vld [vmem:[%s6580_s5 + $0x10] sm:$0xff]  }
 0x7a9   :  { %v2576_v20 = vmul.f32 %v2556_v51, %v2496_v19  ;;  %2594 = vst.msk [vmem:[#allocation2 + $0x128] sm:$0xff] %vm263_vm2, %v2574_v53  ;;  %v2864_v22 = vld [vmem:[#allocation2 + $0xe2] ss:$2 sm:$0xff]  ;;  %4825 = vmatpush3.bf16.msra.mxu0 %v5194_v60  ;;  %v5195_v40 = vld [vmem:[%s6580_s5 + $0x18] sm:$0xff]  }
 0x7aa   :  { %2595 = vst.msk [vmem:[#allocation2 + $0x130] sm:$0xff] %vm263_vm2, %v2575_v63  ;;  %4779 = vmatpush3.bf16.msra.mxu1 %v5191_v11  ;;  %v2637_v61 = vld [vmem:[#allocation2 + $0xf1] ss:$2 sm:$0xff]  ;;  %v2608_v62 = vld [vmem:[#allocation2 + $0xf0] ss:$2 sm:$0xff]  ;;  %4826 = vmatprep.subr.bf16.mxu0 %v5395_v52 }
 0x7ab   :  { %2596 = vst.msk [vmem:[#allocation2 + $0x138] sm:$0x7f] %vm301_vm3, %v2576_v20  ;;  %4800 = vmatprep.subr.bf16.mxu1 %v5395_v52  ;;  %v2648_v42 = vpack.c.bf16 %v2637_v61, %v2635_v59  ;;  %v2619_v8 = vpack.c.bf16 %v2608_v62, %v2606_v21  ;;  %v2866_v31 = vld [vmem:[#allocation2 + $0xf2] ss:$2 sm:$0xff] }
 0x7ac   :  { %v2639_v0 = vld [vmem:[#allocation2 + $0x101] ss:$2 sm:$0xff]  ;;  %v2610_v24 = vld [vmem:[#allocation2 + $0x100] ss:$2 sm:$0xff]  ;;  %v2877_v30 = vpack.c.bf16 %v2866_v31, %v2864_v22 }
 0x7ad   :  { %4761 = vmatmul.mubr.msk.bf16.gmra.mrb[36].mxu1 %vm263_vm2, %v2647_v32  ;;  %v2868_v29 = vld [vmem:[#allocation2 + $0x102] ss:$2 sm:$0xff]  ;;  %4827 = vmatpush3.bf16.msra.mxu0 %v5195_v40 }
 0x7ae   :  { %4764 = vmatprep.mubr.msk.bf16.mxu1 %vm5396_vm4, %v5395_v52  ;;  %v2641_v1 = vld [vmem:[#allocation2 + $0x111] ss:$2 sm:$0xff]  ;;  %v2612_v26 = vld [vmem:[#allocation2 + $0x110] ss:$2 sm:$0xff]  ;;  %4840 = vmatprep.subr.bf16.mxu0 %v5395_v52  ;;  %v5197_v40 = vld [vmem:[%s6580_s5 + $0x8] sm:$0xff]  }
 0x7af   :  { %v2649_v49 = vpack.c.bf16 %v2641_v1, %v2639_v0  ;;  %v2620_v10 = vpack.c.bf16 %v2612_v26, %v2610_v24  ;;  %v2870_v7 = vld [vmem:[#allocation2 + $0x112] ss:$2 sm:$0xff] }
 0x7b0   :  { %v2643_v4 = vld [vmem:[#allocation2 + $0x121] ss:$2 sm:$0xff]  ;;  %v2614_v3 = vld [vmem:[#allocation2 + $0x120] ss:$2 sm:$0xff]  ;;  %v2878_v18 = vpack.c.bf16 %v2870_v7, %v2868_v29 }
 0x7b1   :  { %v2872_v43 = vld [vmem:[#allocation2 + $0x122] ss:$2 sm:$0xff] }
 0x7b2   :  { %v2645_v6 = vld [vmem:[#allocation2 + $0x131] ss:$2 sm:$0x7f]  ;;  %v2616_v44 = vld [vmem:[#allocation2 + $0x130] ss:$2 sm:$0x7f] }
 0x7b3   :  { %v2650_v9 = vpack.c.bf16 %v2645_v6, %v2643_v4  ;;  %v2621_v5 = vpack.c.bf16 %v2616_v44, %v2614_v3  ;;  %v2874_v39 = vld [vmem:[#allocation2 + $0x132] ss:$2 sm:$0x7f]  ;;  %v5196_v7 = vld [vmem:[%s6580_s5] sm:$0xff]  }
 0x7b4   :  { %v2879_v28 = vpack.c.bf16 %v2874_v39, %v2872_v43 }
 0x7b5   :  { %4765 = vmatmul.mubr.msk.bf16.gmra.mrb[40].mxu1 %vm263_vm2, %v2648_v42 }
 0x7b6   :  { %4768 = vmatprep.mubr.msk.bf16.mxu1 %vm5396_vm4, %v5395_v52 }
 0x7bd   :  { %4769 = vmatmul.mubr.msk.bf16.gmra.mrb[44].mxu1 %vm263_vm2, %v2649_v49 }
 0x7be   :  { %4772 = vmatprep.mubr.msk.bf16.mxu1 %vm5396_vm4, %v5395_v52 }
 0x7c5   :  { %4773 = vmatmul.mubr.msk.bf16.gmra.mrb[48].mxu1 %vm263_vm2, %v2650_v9 }
 0x7c6   :  { %4780 = vmatprep.mubr.msk.bf16.mxu1 %vm5396_vm4, %v5395_v52 }
 0x7cd   :  { %4781 = vmatmul.mubr.msk.bf16.vlgmr.msra.gmra.mrb[32].mxu1 %vm263_vm2, %v2617_v36 }
 0x7ce   :  { %4801 = vmatpush3.bf16.msra.mxu1 %v5192_v13  ;;  %4784 = vmatprep.mubr.msk.bf16.mxu1 %vm5396_vm4, %v5395_v52 }
 0x7cf   :  { %4802 = vmatprep.subr.bf16.mxu1 %v5395_v52 }
 0x7d2   :  { %4803 = vmatpush3.bf16.msra.mxu1 %v5193_v12 }
 0x7d3   :  { %4896 = vmatprep.subr.bf16.mxu1 %v5395_v52 }
 0x7d5   :  { %4785 = vmatmul.mubr.msk.bf16.gmra.mrb[36].mxu1 %vm263_vm2, %v2618_v37 }
 0x7d6   :  { %4788 = vmatprep.mubr.msk.bf16.mxu1 %vm5396_vm4, %v5395_v52 }
 0x7dd   :  { %4789 = vmatmul.mubr.msk.bf16.gmra.mrb[40].mxu1 %vm263_vm2, %v2619_v8 }
 0x7de   :  { %4792 = vmatprep.mubr.msk.bf16.mxu1 %vm5396_vm4, %v5395_v52 }
 0x7e5   :  { %4793 = vmatmul.mubr.msk.bf16.gmra.mrb[44].mxu1 %vm263_vm2, %v2620_v10 }
 0x7e6   :  { %4796 = vmatprep.mubr.msk.bf16.mxu1 %vm5396_vm4, %v5395_v52 }
 0x7ed   :  { %4797 = vmatmul.mubr.msk.bf16.gmra.mrb[48].mxu1 %vm263_vm2, %v2621_v5 }
 0x7ee   :  { %v2056_v57 = vpop.f32.mrb[28].mxu1  ;;  %4804 = vmatprep.mubr.msk.bf16.mxu1 %vm5396_vm4, %v5395_v52 }
 0x7ef   :  { %v2063_v2 = vmul.f32 0.70710677, %v2056_v57  ;;  %v4728_v17 = vpop.f32.mrb[29].mxu1  ;;  %v2062_v25 = vmul.f32 0.5, %v2056_v57 }
 0x7f0   :  { %v2059_v27 = vpop.f32.mrb[30].mxu1 }
 0x7f1   :  { %5346 = verf.f32 %v2063_v2  ;;  %v4729_v47 = vpop.f32.mrb[31].mxu1 }
 0x7f5   :  { %4805 = vmatmul.mubr.msk.bf16.vlgmr.msra.gmra.mrb[32].mxu1 %vm263_vm2, %v2875_v23 }
 0x7f6   :  { %4808 = vmatprep.mubr.msk.bf16.mxu1 %vm5396_vm4, %v5395_v52 }
 0x7fb   :  { %v5347_v34 = vpop.eup %5346 }
 0x7fc   :  { %v2065_v33 = vadd.f32 1.0, %v5347_v34 }
 0x7fd   :  { %4809 = vmatmul.mubr.msk.bf16.gmra.mrb[36].mxu1 %vm263_vm2, %v2876_v16 }
 0x7fe   :  { %v2066_v46 = vmul.f32 %v2065_v33, %v2062_v25  ;;  %4812 = vmatprep.mubr.msk.bf16.mxu1 %vm5396_vm4, %v5395_v52 }
 0x800   :  { %2068 = vst.msk [vmem:[%s6585_s10] sm:$0x3] %vm2067_vm8, %v2066_v46 }
 0x805   :  { %4813 = vmatmul.mubr.msk.bf16.gmra.mrb[40].mxu1 %vm263_vm2, %v2877_v30 }
 0x806   :  { %4816 = vmatprep.mubr.msk.bf16.mxu1 %vm5396_vm4, %v5395_v52 }
 0x80d   :  { %4817 = vmatmul.mubr.msk.bf16.gmra.mrb[44].mxu1 %vm263_vm2, %v2878_v18 }
 0x80e   :  { %4820 = vmatprep.mubr.msk.bf16.mxu1 %vm5396_vm4, %v5395_v52 }
 0x815   :  { %4821 = vmatmul.mubr.msk.bf16.gmra.mrb[48].mxu1 %vm263_vm2, %v2879_v28 }
 0x816   :  { %4900 = vmatprep.mubr.msk.bf16.mxu1 %vm5396_vm4, %v5395_v52 }
 0x8c8   :  { %v2945_v45 = vpop.f32.mrb[32].mxu1 }
 0x8c9   :  { %v3004_v48 = vmul.f32 0.70710677, %v2945_v45  ;;  %v4806_v11 = vpop.f32.mrb[33].mxu1  ;;  %v2994_v42 = vmul.f32 0.5, %v2945_v45 }
 0x8ca   :  { %v2948_v19 = vpop.f32.mrb[34].mxu1 }
 0x8cb   :  { %5348 = verf.f32 %v3004_v48  ;;  %v3005_v51 = vmul.f32 0.70710677, %v2948_v19  ;;  %v4807_v53 = vpop.f32.mrb[35].mxu1  ;;  %v2995_v4 = vmul.f32 0.5, %v2948_v19 }
 0x8cd   :  { %5350 = verf.f32 %v3005_v51 }
 0x8d0   :  { %v2953_v63 = vpop.f32.mrb[36].mxu1 }
 0x8d1   :  { %v3006_v55 = vmul.f32 0.70710677, %v2953_v63  ;;  %v4810_v56 = vpop.f32.mrb[37].mxu1  ;;  %v2996_v37 = vmul.f32 0.5, %v2953_v63 }
 0x8d2   :  { %v2956_v20 = vpop.f32.mrb[38].mxu1 }
 0x8d3   :  { %5352 = verf.f32 %v3006_v55  ;;  %v3007_v32 = vmul.f32 0.70710677, %v2956_v20  ;;  %v4811_v59 = vpop.f32.mrb[39].mxu1  ;;  %v2997_v24 = vmul.f32 0.5, %v2956_v20 }
 0x8d5   :  { %v5349_v61 = vpop.eup %5348  ;;  %5354 = verf.f32 %v3007_v32 }
 0x8d6   :  { %v3024_v0 = vadd.f32 1.0, %v5349_v61 }
 0x8d7   :  { %v5351_v1 = vpop.eup %5350 }
 0x8d8   :  { %v3034_v49 = vmul.f32 %v3024_v0, %v2994_v42  ;;  %v3025_v6 = vadd.f32 1.0, %v5351_v1  ;;  %v2961_v9 = vpop.f32.mrb[40].mxu1 }
 0x8d9   :  { %v3008_v50 = vmul.f32 0.70710677, %v2961_v9  ;;  %v4814_v35 = vpop.f32.mrb[41].mxu1  ;;  %v2998_v5 = vmul.f32 0.5, %v2961_v9  ;;  %v5198_v9 = vld [vmem:[%s6580_s5 + $0x20] sm:$0xff]  }
 0x8da   :  { %3044 = vst.msk [vmem:[#allocation2 + $0xa0] sm:$0xff] %vm263_vm2, %v3034_v49  ;;  %v3035_v13 = vmul.f32 %v3025_v6, %v2995_v4  ;;  %v2964_v36 = vpop.f32.mrb[42].mxu1  ;;  %v5199_v35 = vld [vmem:[%s6580_s5 + $0x28] sm:$0xff]  }
 0x8db   :  { %5356 = verf.f32 %v3008_v50  ;;  %v3009_v12 = vmul.f32 0.70710677, %v2964_v36  ;;  %v4815_v58 = vpop.f32.mrb[43].mxu1  ;;  %v2999_v38 = vmul.f32 0.5, %v2964_v36 }
 0x8dc   :  { %3045 = vst.msk [vmem:[#allocation2 + $0xa8] sm:$0xff] %vm263_vm2, %v3035_v13 }
 0x8dd   :  { %v5353_v14 = vpop.eup %5352  ;;  %5358 = verf.f32 %v3009_v12 }
 0x8de   :  { %v3026_v21 = vadd.f32 1.0, %v5353_v14 }
 0x8df   :  { %v5355_v62 = vpop.eup %5354 }
 0x8e0   :  { %v3036_v8 = vmul.f32 %v3026_v21, %v2996_v37  ;;  %v3027_v26 = vadd.f32 1.0, %v5355_v62  ;;  %v2969_v57 = vpop.f32.mrb[44].mxu1 }
 0x8e1   :  { %v3010_v2 = vmul.f32 0.70710677, %v2969_v57  ;;  %v4818_v17 = vpop.f32.mrb[45].mxu1  ;;  %v3000_v39 = vmul.f32 0.5, %v2969_v57 }
 0x8e2   :  { %3046 = vst.msk [vmem:[#allocation2 + $0xb0] sm:$0xff] %vm263_vm2, %v3036_v8  ;;  %v3037_v10 = vmul.f32 %v3027_v26, %v2997_v24  ;;  %v2972_v27 = vpop.f32.mrb[46].mxu1  ;;  %v5200_v17 = vld [vmem:[%s6581_s6 + $0x10] sm:$0xff]  }
 0x8e3   :  { %5360 = verf.f32 %v3010_v2  ;;  %v3011_v47 = vmul.f32 0.70710677, %v2972_v27  ;;  %v4819_v3 = vpop.f32.mrb[47].mxu1  ;;  %v3066_v22 = vld [vmem:[#allocation2 + $0xa1] ss:$2 sm:$0xff]  ;;  %v3001_v48 = vmul.f32 0.5, %v2972_v27 }
 0x8e4   :  { %3047 = vst.msk [vmem:[#allocation2 + $0xb8] sm:$0xff] %vm263_vm2, %v3037_v10  ;;  %v3054_v6 = vld [vmem:[#allocation2 + $0xa0] ss:$2 sm:$0xff]  ;;  %v5201_v10 = vld [vmem:[%s6581_s6 + $0x18] sm:$0xff]  }
 0x8e5   :  { %v5357_v44 = vpop.eup %5356  ;;  %5362 = verf.f32 %v3011_v47  ;;  %v6467_v27 = vld [vmem:[%s6581_s6] sm:$0xff]   ;;  %v5206_v47 = vld [vmem:[%s6582_s7 + $0x10] sm:$0xff]  }
 0x8e6   :  { %v3028_v34 = vadd.f32 1.0, %v5357_v44  ;;  %4897 = vmatpush3.bf16.msra.mxu1 %v5206_v47 }
 0x8e7   :  { %v5359_v25 = vpop.eup %5358  ;;  %4898 = vmatprep.subr.bf16.mxu1 %v5395_v52 }
 0x8e8   :  { %v3038_v33 = vmul.f32 %v3028_v34, %v2998_v5  ;;  %v3029_v15 = vadd.f32 1.0, %v5359_v25  ;;  %v2977_v46 = vpop.f32.mrb[48].mxu1 }
 0x8e9   :  { %v3012_v23 = vmul.f32 0.70710677, %v2977_v46  ;;  %v4822_v41 = vpop.f32.mrb[49].mxu1  ;;  %v3002_v53 = vmul.f32 0.5, %v2977_v46  ;;  %v3232_v21 = vld [vmem:[#allocation2 + $0xa2] ss:$2 sm:$0xff] }
 0x8ea   :  { %3048 = vst.msk [vmem:[#allocation2 + $0xc0] sm:$0xff] %vm263_vm2, %v3038_v33  ;;  %v3039_v54 = vmul.f32 %v3029_v15, %v2999_v38  ;;  %v2980_v16 = vpop.f32.mrb[50].mxu1 }
 0x8eb   :  { %5364 = verf.f32 %v3012_v23  ;;  %v3013_v31 = vmul.f32 0.70710677, %v2980_v16  ;;  %v4823_v30 = vpop.f32.mrb[51].mxu1  ;;  %v3067_v29 = vld [vmem:[#allocation2 + $0xb1] ss:$2 sm:$0xff]  ;;  %v3003_v20 = vmul.f32 0.5, %v2980_v16 }
 0x8ec   :  { %3049 = vst.msk [vmem:[#allocation2 + $0xc8] sm:$0xff] %vm263_vm2, %v3039_v54  ;;  %v3071_v18 = vpack.c.bf16 %v3067_v29, %v3066_v22  ;;  %v3055_v4 = vld [vmem:[#allocation2 + $0xb0] ss:$2 sm:$0xff] }
 0x8ed   :  { %v5361_v43 = vpop.eup %5360  ;;  %5366 = verf.f32 %v3013_v31  ;;  %v3059_v50 = vpack.c.bf16 %v3055_v4, %v3054_v6 }
 0x8ee   :  { %v3030_v28 = vadd.f32 1.0, %v5361_v43  ;;  %4829 = vmatmul.mubr.msk.bf16.vlgmr.msra.gmra.mrb[56].mxu0 %vm263_vm2, %v3071_v18 }
 0x8ef   :  { %v5363_v60 = vpop.eup %5362  ;;  %4841 = vmatpush3.bf16.msra.mxu0 %v5196_v7  ;;  %4832 = vmatprep.mubr.msk.bf16.mxu0 %vm5396_vm4, %v5395_v52 }
 0x8f0   :  { %v3040_v45 = vmul.f32 %v3030_v28, %v3000_v39  ;;  %v3031_v11 = vadd.f32 1.0, %v5363_v60  ;;  %4842 = vmatprep.subr.bf16.mxu0 %v5395_v52 }
 0x8f1   :  { %v3233_v37 = vld [vmem:[#allocation2 + $0xb2] ss:$2 sm:$0xff] }
 0x8f2   :  { %3050 = vst.msk [vmem:[#allocation2 + $0xd0] sm:$0xff] %vm263_vm2, %v3040_v45  ;;  %v3041_v19 = vmul.f32 %v3031_v11, %v3001_v48  ;;  %v3237_v62 = vpack.c.bf16 %v3233_v37, %v3232_v21  ;;  %v5205_v37 = vld [vmem:[%s6581_s6 + $0x28] sm:$0xff]  }
 0x8f3   :  { %4843 = vmatpush3.bf16.msra.mxu0 %v5197_v40  ;;  %v3068_v61 = vld [vmem:[#allocation2 + $0xc1] ss:$2 sm:$0xff]  ;;  %v3056_v36 = vld [vmem:[#allocation2 + $0xc0] ss:$2 sm:$0xff] }
 0x8f4   :  { %3051 = vst.msk [vmem:[#allocation2 + $0xd8] sm:$0xff] %vm263_vm2, %v3041_v19  ;;  %4856 = vmatprep.subr.bf16.mxu0 %v5395_v52 }
 0x8f5   :  { %v5365_v51 = vpop.eup %5364 }
 0x8f6   :  { %v3032_v63 = vadd.f32 1.0, %v5365_v51 }
 0x8f7   :  { %v5367_v55 = vpop.eup %5366 }
 0x8f8   :  { %v3042_v56 = vmul.f32 %v3032_v63, %v3002_v53  ;;  %v3033_v32 = vadd.f32 1.0, %v5367_v55 }
 0x8f9   :  { %v3234_v24 = vld [vmem:[#allocation2 + $0xc2] ss:$2 sm:$0xff] }
 0x8fa   :  { %3052 = vst.msk [vmem:[#allocation2 + $0xe0] sm:$0xff] %vm263_vm2, %v3042_v56  ;;  %v3043_v59 = vmul.f32 %v3033_v32, %v3003_v20 }
 0x8fb   :  { %v3069_v42 = vld [vmem:[#allocation2 + $0xd1] ss:$2 sm:$0xff]  ;;  %v3057_v13 = vld [vmem:[#allocation2 + $0xd0] ss:$2 sm:$0xff] }
 0x8fc   :  { %3053 = vst.msk [vmem:[#allocation2 + $0xe8] sm:$0x7f] %vm301_vm3, %v3043_v59  ;;  %v3072_v0 = vpack.c.bf16 %v3069_v42, %v3068_v61  ;;  %v3060_v12 = vpack.c.bf16 %v3057_v13, %v3056_v36  ;;  %v5204_v13 = vld [vmem:[%s6581_s6 + $0x20] sm:$0xff]  }
 0x8fe   :  { %4833 = vmatmul.mubr.msk.bf16.gmra.mrb[60].mxu0 %vm263_vm2, %v3072_v0 }
 0x8ff   :  { %4836 = vmatprep.mubr.msk.bf16.mxu0 %vm5396_vm4, %v5395_v52 }
 0x901   :  { %v3235_v8 = vld [vmem:[#allocation2 + $0xd2] ss:$2 sm:$0xff] }
 0x902   :  { %v3238_v26 = vpack.c.bf16 %v3235_v8, %v3234_v24  ;;  %v5207_v24 = vld [vmem:[%s6582_s7 + $0x18] sm:$0xff]  }
 0x903   :  { %v3070_v1 = vld [vmem:[#allocation2 + $0xe1] ss:$2 sm:$0x7f]  ;;  %v3058_v58 = vld [vmem:[#allocation2 + $0xe0] ss:$2 sm:$0x7f]  ;;  %4899 = vmatpush3.bf16.msra.mxu1 %v5207_v24 }
 0x904   :  { %v3073_v49 = vpack.c.bf16 %v3070_v1, %v3070_v1  ;;  %v3061_v14 = vpack.c.bf16 %v3058_v58, %v3058_v58  ;;  %v3236_v57 = vld [vmem:[#allocation2 + $0xe2] ss:$2 sm:$0x7f]  ;;  %4904 = vmatprep.subr.bf16.mxu1 %v5395_v52 }
 0x905   :  { %v3239_v2 = vpack.c.bf16 %v3236_v57, %v3236_v57 }
 0x906   :  { %4837 = vmatmul.mubr.msk.bf16.gmra.mrb[64].mxu0 %vm263_vm2, %v3073_v49 }
 0x907   :  { %4844 = vmatprep.mubr.msk.bf16.mxu0 %vm5396_vm4, %v5395_v52 }
 0x90e   :  { %4845 = vmatmul.mubr.msk.bf16.vlgmr.msra.gmra.mrb[56].mxu0 %vm263_vm2, %v3059_v50  ;;  %v5203_v50 = vld [vmem:[%s6581_s6 + $0x8] sm:$0xff]  }
 0x90f   :  { %4857 = vmatpush3.bf16.msra.mxu0 %v5198_v9  ;;  %4848 = vmatprep.mubr.msk.bf16.mxu0 %vm5396_vm4, %v5395_v52 }
 0x910   :  { %4858 = vmatprep.subr.bf16.mxu0 %v5395_v52 }
 0x913   :  { %4859 = vmatpush3.bf16.msra.mxu0 %v5199_v35 }
 0x914   :  { %4872 = vmatprep.subr.bf16.mxu0 %v5200_v17 }
 0x916   :  { %4849 = vmatmul.mubr.msk.bf16.gmra.mrb[60].mxu0 %vm263_vm2, %v3060_v12 }
 0x917   :  { %4852 = vmatprep.mubr.msk.bf16.mxu0 %vm5396_vm4, %v5395_v52 }
 0x91e   :  { %4853 = vmatmul.mubr.msk.bf16.gmra.mrb[64].mxu0 %vm263_vm2, %v3061_v14 }
 0x91f   :  { %4860 = vmatprep.mubr.msk.bf16.mxu0 %vm5396_vm4, %v5395_v52 }
 0x926   :  { %4861 = vmatmul.mubr.msk.bf16.vlgmr.msra.gmra.mrb[56].mxu0 %vm263_vm2, %v3237_v62 }
 0x927   :  { %4864 = vmatprep.mubr.msk.bf16.mxu0 %vm5396_vm4, %v5395_v52  ;;  %4873 = vmatpush3.bf16.msra.mxu0 %v5200_v17 }
 0x928   :  { %4874 = vmatprep.subr.bf16.mxu0 %v5201_v10 }
 0x92b   :  { %4875 = vmatpush3.bf16.msra.mxu0 %v5201_v10 }
 0x92c   :  { %4880 = vmatprep.subr.bf16.mxu0 %v6467_v27 }
 0x92e   :  { %4865 = vmatmul.mubr.msk.bf16.gmra.mrb[60].mxu0 %vm263_vm2, %v3238_v26 }
 0x92f   :  { %4868 = vmatprep.mubr.msk.bf16.mxu0 %vm5396_vm4, %v5395_v52 }
 0x936   :  { %4869 = vmatmul.mubr.msk.bf16.gmra.mrb[64].mxu0 %vm263_vm2, %v3239_v2 }
 0x9f9   :  { %v3299_v3 = vpop.f32.mrb[56].mxu0 }
 0x9fa   :  { %v3331_v44 = vmul.f32 0.70710677, %v3299_v3  ;;  %v4862_v5 = vpop.f32.mrb[57].mxu0  ;;  %v3326_v22 = vmul.f32 0.5, %v3299_v3 }
 0x9fb   :  { %v3302_v34 = vpop.f32.mrb[58].mxu0 }
 0x9fc   :  { %5368 = verf.f32 %v3331_v44  ;;  %v3332_v25 = vmul.f32 0.70710677, %v3302_v34  ;;  %v4863_v33 = vpop.f32.mrb[59].mxu0  ;;  %v3327_v7 = vmul.f32 0.5, %v3302_v34 }
 0x9fe   :  { %5370 = verf.f32 %v3332_v25 }
 0xa01   :  { %v3307_v38 = vpop.f32.mrb[60].mxu0 }
 0xa02   :  { %v3333_v15 = vmul.f32 0.70710677, %v3307_v38  ;;  %v4866_v46 = vpop.f32.mrb[61].mxu0  ;;  %v3328_v11 = vmul.f32 0.5, %v3307_v38 }
 0xa03   :  { %v3310_v23 = vpop.f32.mrb[62].mxu0 }
 0xa04   :  { %5372 = verf.f32 %v3333_v15  ;;  %v3334_v41 = vmul.f32 0.70710677, %v3310_v23  ;;  %v4867_v54 = vpop.f32.mrb[63].mxu0  ;;  %v3329_v63 = vmul.f32 0.5, %v3310_v23 }
 0xa06   :  { %v5369_v16 = vpop.eup %5368  ;;  %5374 = verf.f32 %v3334_v41 }
 0xa07   :  { %v3341_v31 = vadd.f32 1.0, %v5369_v16 }
 0xa08   :  { %v5371_v30 = vpop.eup %5370 }
 0xa09   :  { %v3346_v29 = vmul.f32 %v3341_v31, %v3326_v22  ;;  %v3342_v18 = vadd.f32 1.0, %v5371_v30  ;;  %v3315_v43 = vpop.f32.mrb[64].mxu0  ;;  %v5208_v31 = vld [vmem:[%s6582_s7] sm:$0xff]  }
 0xa0a   :  { %v3335_v39 = vmul.f32 0.70710677, %v3315_v43  ;;  %v4870_v28 = vpop.f32.mrb[65].mxu0  ;;  %v3330_v32 = vmul.f32 0.5, %v3315_v43  ;;  %v5210_v43 = vld [vmem:[%s6582_s7 + $0x20] sm:$0xff]  }
 0xa0b   :  { %3351 = vst.msk [vmem:[#allocation2 + $0xa0] sm:$0xff] %vm263_vm2, %v3346_v29  ;;  %v3347_v60 = vmul.f32 %v3342_v18, %v3327_v7  ;;  %v3318_v40 = vpop.f32.mrb[66].mxu0  ;;  %v5209_v29 = vld [vmem:[%s6582_s7 + $0x8] sm:$0xff]  }
 0xa0c   :  { %5376 = verf.f32 %v3335_v39  ;;  %v4871_v45 = vpop.f32.mrb[67].mxu0  ;;  %v5211_v28 = vld [vmem:[%s6582_s7 + $0x28] sm:$0xff]  }
 0xa0d   :  { %3352 = vst.msk [vmem:[#allocation2 + $0xa8] sm:$0xff] %vm263_vm2, %v3347_v60 }
 0xa0e   :  { %v5373_v48 = vpop.eup %5372 }
 0xa0f   :  { %v3343_v19 = vadd.f32 1.0, %v5373_v48  ;;  %v5212_v48 = vld [vmem:[%s6583_s8 + $0x10] sm:$0xff]  }
 0xa10   :  { %v5375_v51 = vpop.eup %5374 }
 0xa11   :  { %v3348_v53 = vmul.f32 %v3343_v19, %v3328_v11  ;;  %v3344_v55 = vadd.f32 1.0, %v5375_v51  ;;  %v5213_v11 = vld [vmem:[%s6583_s8 + $0x18] sm:$0xff]  }
 0xa13   :  { %3353 = vst.msk [vmem:[#allocation2 + $0xb0] sm:$0xff] %vm263_vm2, %v3348_v53  ;;  %v3349_v56 = vmul.f32 %v3344_v55, %v3329_v63 }
 0xa14   :  { %v3365_v42 = vld [vmem:[#allocation2 + $0xa1] ss:$2 sm:$0xff]  ;;  %v3356_v9 = vld [vmem:[#allocation2 + $0xa0] ss:$2 sm:$0xff] }
 0xa15   :  { %3354 = vst.msk [vmem:[#allocation2 + $0xb8] sm:$0xff] %vm263_vm2, %v3349_v56 }
 0xa16   :  { %v5377_v20 = vpop.eup %5376 }
 0xa17   :  { %v3345_v59 = vadd.f32 1.0, %v5377_v20 }
 0xa19   :  { %v3350_v61 = vmul.f32 %v3345_v59, %v3330_v32 }
 0xa1a   :  { %v3506_v14 = vld [vmem:[#allocation2 + $0xa2] ss:$2 sm:$0xff] }
 0xa1b   :  { %3355 = vst.msk [vmem:[#allocation2 + $0xc0] sm:$0x7f] %vm301_vm3, %v3350_v61 }
 0xa1c   :  { %v3366_v0 = vld [vmem:[#allocation2 + $0xb1] ss:$2 sm:$0xff]  ;;  %v3357_v49 = vld [vmem:[#allocation2 + $0xb0] ss:$2 sm:$0xff] }
 0xa1d   :  { %v3368_v1 = vpack.c.bf16 %v3366_v0, %v3365_v42  ;;  %v3359_v35 = vpack.c.bf16 %v3357_v49, %v3356_v9 }
 0xa1f   :  { %4876 = vmatprep.mubr.msk.bf16.mxu0 %vm263_vm2, %v3368_v1 }
 0xa22   :  { %v3367_v4 = vld [vmem:[#allocation2 + $0xc1] ss:$2 sm:$0x7]  ;;  %v3358_v36 = vld [vmem:[#allocation2 + $0xc0] ss:$2 sm:$0x7] }
 0xa23   :  { %v3369_v6 = vpack.c.bf16 %v3367_v4, %v3367_v4  ;;  %v3507_v12 = vld [vmem:[#allocation2 + $0xb2] ss:$2 sm:$0xff]  ;;  %v3360_v58 = vpack.c.bf16 %v3358_v36, %v3358_v36  ;;  %v3508_v62 = vld [vmem:[#allocation2 + $0xc2] ss:$2 sm:$0x7] }
 0xa24   :  { %v3509_v21 = vpack.c.bf16 %v3507_v12, %v3506_v14  ;;  %v3510_v8 = vpack.c.bf16 %v3508_v62, %v3508_v62  ;;  %v5216_v36 = vld [vmem:[%s6584_s9 + $0x10] sm:$0xff]   ;;  %v5217_v12 = vld [vmem:[%s6584_s9 + $0x18] sm:$0xff]  }
 0xa25   :  { %4877 = vmatmul.mubr.msk.bf16.vlgmr.msra.gmra.mrb[68].mxu0 %vm263_vm2, %v3369_v6  ;;  %v5214_v6 = vld [vmem:[%s6583_s8] sm:$0xff]  }
 0xa26   :  { %4881 = vmatpush3.bf16.msra.mxu0 %v6467_v27  ;;  %4884 = vmatprep.mubr.msk.bf16.mxu0 %vm263_vm2, %v3359_v35 }
 0xa27   :  { %4882 = vmatprep.subr.bf16.mxu0 %v5203_v50 }
 0xa2a   :  { %4883 = vmatpush3.bf16.msra.mxu0 %v5203_v50  ;;  %v5215_v50 = vld [vmem:[%s6583_s8 + $0x8] sm:$0xff]  }
 0xa2b   :  { %4888 = vmatprep.subr.bf16.mxu0 %v5204_v13 }
 0xa31   :  { %4885 = vmatmul.mubr.msk.bf16.vlgmr.msra.gmra.mrb[68].mxu0 %vm263_vm2, %v3360_v58 }
 0xa32   :  { %4889 = vmatpush3.bf16.msra.mxu0 %v5204_v13  ;;  %4892 = vmatprep.mubr.msk.bf16.mxu0 %vm263_vm2, %v3509_v21 }
 0xa33   :  { %4890 = vmatprep.subr.bf16.mxu0 %v5205_v37 }
 0xa36   :  { %4891 = vmatpush3.bf16.msra.mxu0 %v5205_v37 }
 0xa37   :  { %4920 = vmatprep.subr.bf16.mxu0 %v5395_v52 }
 0xa3d   :  { %4893 = vmatmul.mubr.msk.bf16.vlgmr.msra.gmra.mrb[68].mxu0 %vm263_vm2, %v3510_v8 }
 0xa3e   :  { %4924 = vmatprep.mubr.msk.bf16.mxu0 %vm5396_vm4, %v5395_v52  ;;  %4921 = vmatpush3.bf16.msra.mxu0 %v5212_v48 }
 0xa3f   :  { %4922 = vmatprep.subr.bf16.mxu0 %v5395_v52 }
 0xa42   :  { %4923 = vmatpush3.bf16.msra.mxu0 %v5213_v11 }
 0xa43   :  { %4928 = vmatprep.subr.bf16.mxu0 %v5395_v52 }
 0xb10   :  { %v4894_v26 = vpop.f32.mrb[68].mxu0 }
 0xb11   :  { %v3589_v57 = vmul.f32 0.70710677, %v4894_v26  ;;  %v3567_v2 = vpop.f32.mrb[69].mxu0  ;;  %v3586_v5 = vmul.f32 0.5, %v4894_v26 }
 0xb12   :  { %v3587_v17 = vmul.f32 0.70710677, %v3567_v2  ;;  %v4895_v10 = vpop.f32.mrb[70].mxu0  ;;  %v3584_v25 = vmul.f32 0.5, %v3567_v2 }
 0xb13   :  { %5378 = verf.f32 %v3589_v57  ;;  %v3570_v27 = vpop.f32.mrb[71].mxu0 }
 0xb14   :  { %5380 = verf.f32 %v3587_v17  ;;  %v3588_v47 = vmul.f32 0.70710677, %v3570_v27  ;;  %v3585_v23 = vmul.f32 0.5, %v3570_v27  ;;  %v5218_v17 = vld [vmem:[%s6584_s9] sm:$0xff]   ;;  %v5219_v27 = vld [vmem:[%s6584_s9 + $0x8] sm:$0xff]  }
 0xb16   :  { %5382 = verf.f32 %v3588_v47 }
 0xb1d   :  { %v5379_v3 = vpop.eup %5378 }
 0xb1e   :  { %v5381_v44 = vpop.eup %5380  ;;  %v3595_v34 = vadd.f32 1.0, %v5379_v3 }
 0xb1f   :  { %v3593_v33 = vadd.f32 1.0, %v5381_v44 }
 0xb20   :  { %v5383_v38 = vpop.eup %5382  ;;  %v3598_v15 = vmul.f32 %v3595_v34, %v3586_v5 }
 0xb21   :  { %v3596_v46 = vmul.f32 %v3593_v33, %v3584_v25  ;;  %v3594_v41 = vadd.f32 1.0, %v5383_v38 }
 0xb22   :  { %3601 = vst.msk [vmem:[#allocation2 + $0xb0] sm:$0x7] %vm1601_vm5, %v3598_v15 }
 0xb23   :  { %3599 = vst.msk [vmem:[#allocation2 + $0xa0] sm:$0xff] %vm263_vm2, %v3596_v46  ;;  %v3597_v54 = vmul.f32 %v3594_v41, %v3585_v23 }
 0xb25   :  { %3600 = vst.msk [vmem:[#allocation2 + $0xa8] sm:$0xff] %vm263_vm2, %v3597_v54 }
 0xb29   :  { %v3610_v22 = vld [vmem:[#allocation2 + $0xb1] ss:$2 sm:$0x1]  ;;  %v3603_v18 = vld [vmem:[#allocation2 + $0xb0] ss:$2 sm:$0x1] }
 0xb2a   :  { %v3729_v40 = vld [vmem:[#allocation2 + $0xb2] ss:$2 sm:$0x1] }
 0xb2c   :  { %v3609_v16 = vld [vmem:[#allocation2 + $0xa1] ss:$2 sm:$0xff]  ;;  %v3602_v7 = vld [vmem:[#allocation2 + $0xa0] ss:$2 sm:$0xff] }
 0xb2d   :  { %v3611_v30 = vpack.c.bf16 %v3610_v22, %v3609_v16  ;;  %v3604_v39 = vpack.c.bf16 %v3603_v18, %v3602_v7  ;;  %v3728_v60 = vld [vmem:[#allocation2 + $0xa2] ss:$2 sm:$0xff] }
 0xb2e   :  { %v3730_v45 = vpack.c.bf16 %v3729_v40, %v3728_v60 }
 0xb2f   :  { %4901 = vmatmul.mubr.msk.bf16.vlgmr.msra.gmra.mrb[52].mxu1 %vm263_vm2, %v3611_v30 }
 0xb30   :  { %4905 = vmatpush3.bf16.msra.mxu1 %v5208_v31  ;;  %4908 = vmatprep.mubr.msk.bf16.mxu1 %vm5396_vm4, %v5395_v52 }
 0xb31   :  { %4906 = vmatprep.subr.bf16.mxu1 %v5395_v52 }
 0xb34   :  { %4907 = vmatpush3.bf16.msra.mxu1 %v5209_v29 }
 0xb35   :  { %4912 = vmatprep.subr.bf16.mxu1 %v5395_v52 }
 0xb3b   :  { %4909 = vmatmul.mubr.msk.bf16.vlgmr.msra.gmra.mrb[52].mxu1 %vm263_vm2, %v3604_v39 }
 0xb3c   :  { %4913 = vmatpush3.bf16.msra.mxu1 %v5210_v43  ;;  %4916 = vmatprep.mubr.msk.bf16.mxu1 %vm5396_vm4, %v5395_v52 }
 0xb3d   :  { %4914 = vmatprep.subr.bf16.mxu1 %v5395_v52 }
 0xb40   :  { %4915 = vmatpush3.bf16.msra.mxu1 %v5211_v28 }
 0xb47   :  { %4917 = vmatmul.mubr.msk.bf16.vlgmr.msra.gmra.mrb[52].mxu1 %vm263_vm2, %v3730_v45 }
 0xc1a   :  { %v3784_v19 = vpop.f32.mrb[52].mxu1 }
 0xc1b   :  { %v3795_v51 = vmul.f32 0.70710677, %v3784_v19  ;;  %v4918_v53 = vpop.f32.mrb[53].mxu1  ;;  %v3793_v32 = vmul.f32 0.5, %v3784_v19 }
 0xc1c   :  { %v3787_v63 = vpop.f32.mrb[54].mxu1 }
 0xc1d   :  { %5384 = verf.f32 %v3795_v51  ;;  %v3796_v55 = vmul.f32 0.70710677, %v3787_v63  ;;  %v4919_v56 = vpop.f32.mrb[55].mxu1  ;;  %v3794_v0 = vmul.f32 0.5, %v3787_v63 }
 0xc1f   :  { %5386 = verf.f32 %v3796_v55 }
 0xc27   :  { %v5385_v20 = vpop.eup %5384 }
 0xc28   :  { %v3799_v59 = vadd.f32 1.0, %v5385_v20 }
 0xc29   :  { %v5387_v61 = vpop.eup %5386 }
 0xc2a   :  { %v3801_v42 = vmul.f32 %v3799_v59, %v3793_v32  ;;  %v3800_v1 = vadd.f32 1.0, %v5387_v61 }
 0xc2c   :  { %3803 = vst.msk [vmem:[#allocation2 + $0xa0] sm:$0xff] %vm263_vm2, %v3801_v42  ;;  %v3802_v49 = vmul.f32 %v3800_v1, %v3794_v0 }
 0xc2e   :  { %3804 = vst.msk [vmem:[#allocation2 + $0xa8] sm:$0x1] %vm1807_vm6, %v3802_v49 }
 0xc33   :  { %v3811_v4 = vld [vmem:[#allocation2 + $0xa1] ss:$2 sm:$0xf]  ;;  %v3805_v35 = vld [vmem:[#allocation2 + $0xa0] ss:$2 sm:$0xf] }
 0xc34   :  { %v3812_v9 = vpack.c.bf16 %v3811_v4, %v3811_v4  ;;  %v3806_v13 = vpack.c.bf16 %v3805_v35, %v3805_v35 }
 0xc36   :  { %4925 = vmatmul.mubr.msk.bf16.vlgmr.msra.gmra.mrb[72].mxu0 %vm263_vm2, %v3812_v9 }
 0xc37   :  { %4929 = vmatpush3.bf16.msra.mxu0 %v5214_v6  ;;  %4932 = vmatprep.mubr.msk.bf16.mxu0 %vm5396_vm4, %v5395_v52 }
 0xc38   :  { %4930 = vmatprep.subr.bf16.mxu0 %v5395_v52 }
 0xc3b   :  { %4931 = vmatpush3.bf16.msra.mxu0 %v5215_v50 }
 0xc3c   :  { %4936 = vmatprep.subr.bf16.mxu0 %v5395_v52 }
 0xc42   :  { %4933 = vmatmul.mubr.msk.bf16.vlgmr.msra.gmra.mrb[72].mxu0 %vm263_vm2, %v3806_v13 }
 0xc43   :  { %4940 = vmatprep.mubr.msk.bf16.mxu0 %vm5396_vm4, %v5395_v52  ;;  %4937 = vmatpush3.bf16.msra.mxu0 %v5216_v36 }
 0xc44   :  { %4938 = vmatprep.subr.bf16.mxu0 %v5395_v52 }
 0xc47   :  { %4939 = vmatpush3.bf16.msra.mxu0 %v5217_v12 }
 0xc48   :  { %4944 = vmatprep.subr.bf16.mxu0 %v5395_v52 }
 0xd15   :  { %v3921_v58 = vpop.f32.mrb[72].mxu0 }
 0xd16   :  { %v3928_v14 = vmul.f32 0.70710677, %v3921_v58  ;;  %v4934_v37 = vpop.f32.mrb[73].mxu0  ;;  %v3927_v24 = vmul.f32 0.5, %v3921_v58 }
 0xd17   :  { %v3924_v21 = vpop.f32.mrb[74].mxu0 }
 0xd18   :  { %5388 = verf.f32 %v3928_v14  ;;  %v4935_v62 = vpop.f32.mrb[75].mxu0 }
 0xd22   :  { %v5389_v8 = vpop.eup %5388 }
 0xd23   :  { %v3930_v26 = vadd.f32 1.0, %v5389_v8 }
 0xd25   :  { %v3931_v57 = vmul.f32 %v3930_v26, %v3927_v24 }
 0xd27   :  { %3932 = vst.msk [vmem:[#allocation2 + $0xa0] sm:$0xf] %vm1937_vm7, %v3931_v57 }
 0xd2e   :  { %v3939_v2 = vld [vmem:[#allocation2 + $0xa1] ss:$2 sm:$0x3]  ;;  %v3933_v47 = vld [vmem:[#allocation2 + $0xa0] ss:$2 sm:$0x3] }
 0xd2f   :  { %v3940_v10 = vpack.c.bf16 %v3939_v2, %v3939_v2  ;;  %v3934_v3 = vpack.c.bf16 %v3933_v47, %v3933_v47 }
 0xd31   :  { %4941 = vmatmul.mubr.msk.bf16.vlgmr.msra.gmra.mrb[76].mxu0 %vm263_vm2, %v3940_v10 }
 0xd32   :  { %4945 = vmatpush3.bf16.msra.mxu0 %v5218_v17  ;;  %4948 = vmatprep.mubr.msk.bf16.mxu0 %vm5396_vm4, %v5395_v52 }
 0xd33   :  { %4946 = vmatprep.subr.bf16.mxu0 %v5395_v52 }
 0xd36   :  { %4947 = vmatpush3.bf16.msra.mxu0 %v5219_v27 }
 0xd3d   :  { %4949 = vmatmul.mubr.msk.bf16.vlgmr.msra.gmra.mrb[76].mxu0 %vm263_vm2, %v3934_v3 }
 0xe10   :  { %v4049_v44 = vpop.f32.mrb[76].mxu0 }
 0xe11   :  { %v4056_v5 = vmul.f32 0.70710677, %v4049_v44  ;;  %v4950_v34 = vpop.f32.mrb[77].mxu0  ;;  %v4055_v15 = vmul.f32 0.5, %v4049_v44 }
 0xe12   :  { %v4052_v25 = vpop.f32.mrb[78].mxu0 }
 0xe13   :  { %5390 = verf.f32 %v4056_v5  ;;  %v4951_v33 = vpop.f32.mrb[79].mxu0 }
 0xe1d   :  { %v5391_v38 = vpop.eup %5390 }
 0xe1e   :  { %v4058_v46 = vadd.f32 1.0, %v5391_v38 }
 0xe20   :  { %v4059_v23 = vmul.f32 %v4058_v46, %v4055_v15 }
 0xe22   :  { %4347 = vst.msk [vmem:[%s6585_s10 + $0x2] sm:$0x3] %vm2067_vm8, %v4059_v23 }

</bundles_post_ra>
